<compile_context>
chip_gen: v5e
topology: v5e:2x2
jax: 0.10.0
libtpu: 0.0.40
codegen_flags: <defaults>
</compile_context>

<pallas_src>
import functools

import jax
import jax.numpy as jnp
from jax.experimental import pallas as pl
from jax.experimental.pallas import tpu as pltpu

LANE = 128


def _round_up(x, m):
    return (x + m - 1) // m * m


def _largest_divisor(total, target, multiple):
    """Largest divisor of `total` that is <= target and a multiple of `multiple`;
    falls back to `total` (the full extent is always a legal block)."""
    best = None
    d = multiple
    cap = min(total, target)
    while d <= cap:
        if total % d == 0:
            best = d
        d += multiple
    return best if best is not None else total


def _vmem_limit_bytes():
    """Scoped-VMEM limit derived from the actual part (128 MiB on v5e/v6e, 64 MiB on v7x),
    with headroom left for Mosaic-internal scratch."""
    cap = 64 * 1024 * 1024
    try:
        cap = pltpu.get_tpu_info().vmem_capacity_bytes
    except Exception:   # conservative fallback (old jax / no hw query)
        pass
    return int(min(cap, 128 * 1024 * 1024) * 0.85)


_VMEM_LIMIT = _vmem_limit_bytes()


# ---------------------------------------------------------------------------
# Pass 1 kernel: [optional fused BN+ReLU of the incoming activation] ->
#   3x3 "same" conv (bias-free) as 3 dy-tap MXU matmuls over a width-unrolled
#   padded VMEM scratch -> per-channel sum / sum-of-squares partial statistics.
# ---------------------------------------------------------------------------
def conv3x3_stats_kernel(x_ref, scale_ref, shift_ref, w_ref,
                         y_ref, ssum_ref, ssq_ref, xp3_ref,
                         *, nb, h, w, apply_input_bn_relu):
    """x_ref   : (nb*h*w, Cin)       incoming activation rows (compute dtype)
       scale_ref, shift_ref : (1, Cin) f32  folded BN of the PREVIOUS block
                                            (used iff apply_input_bn_relu)
       w_ref   : (3, 3*Cin, Co)      dy-major / dx-merged conv weight (resident)
       y_ref   : (nb*h*w, Co)        pre-BN conv output tile (compute dtype)
       ssum_ref, ssq_ref : (1, 1, Co) f32 per-tile sum(y) / sum(y*y)
       xp3_ref : (nb, h+2, w, 3*Cin) VMEM scratch: width-unrolled, spatially padded input
                 (slab dx holds x_padded[:, Y, X+dx, :])."""
    cin3 = xp3_ref.shape[-1]
    c = cin3 // 3
    rows = nb * h * w

    xin = x_ref[...]
    if apply_input_bn_relu:
        # Fused BatchNorm of the previous block (single FMA, f32 math) + ReLU.
        xin = jnp.maximum(xin.astype(jnp.float32) * scale_ref[...] + shift_ref[...], 0.0)
    xin = xin.astype(xp3_ref.dtype).reshape(nb, h, w, c)

    # Build the zero halo + the three dx-shifted channel slabs.  Borders are rewritten
    # every grid step (no cross-step scratch state) so "parallel"/megacore is safe.
    zrow3 = jnp.zeros((nb, 1, w, cin3), xp3_ref.dtype)
    zcol = jnp.zeros((nb, h, 1, c), xp3_ref.dtype)
    xp3_ref[:, 0:1, :, :] = zrow3                        # top padding row (all slabs)
    xp3_ref[:, h + 1:h + 2, :, :] = zrow3                # bottom padding row
    # dx = 1 slab: aligned, full-width store.
    xp3_ref[:, 1:h + 1, :, c:2 * c] = xin
    # dx = 0 slab: x_padded[., ., X, :] = xin[., ., X-1, :]; column 0 is left padding.
    xp3_ref[:, 1:h + 1, 0:1, 0:c] = zcol
    xp3_ref[:, 1:h + 1, 1:w, 0:c] = xin[:, :, 0:w - 1, :]
    # dx = 2 slab: x_padded[., ., X+2, :] = xin[., ., X+1, :]; column w-1 is right padding.
    xp3_ref[:, 1:h + 1, w - 1:w, 2 * c:3 * c] = zcol
    xp3_ref[:, 1:h + 1, 0:w - 1, 2 * c:3 * c] = xin[:, :, 1:w, :]

    # 3x3 conv = 3 dy-shifted MXU matmuls with K = 3*Cin, accumulated in f32.
    acc = None
    for dy in range(3):
        patch = xp3_ref[:, dy:dy + h, :, :].reshape(rows, cin3)
        contrib = jnp.dot(patch, w_ref[dy], preferred_element_type=jnp.float32)
        acc = contrib if acc is None else acc + contrib

    # Per-tile partial batch statistics (f32) + compute-dtype (bf16) writeback of y.
    ssum_ref[0] = jnp.sum(acc, axis=0, keepdims=True)
    ssq_ref[0] = jnp.sum(acc * acc, axis=0, keepdims=True)
    y_ref[...] = acc.astype(y_ref.dtype)


# ---------------------------------------------------------------------------
# Final pass: folded BatchNorm (single FMA) + ReLU over lane-dense row tiles.
# ---------------------------------------------------------------------------
def bn_relu_kernel(y_ref, scale_ref, shift_ref, o_ref):
    o_ref[...] = jnp.maximum(
        y_ref[...].astype(jnp.float32) * scale_ref[...] + shift_ref[...], 0.0
    ).astype(o_ref.dtype)


def _conv3x3_stats(x_rows, scale, shift, wmat, *, n, h, w, nb, apply_input_bn_relu,
                   compute_dtype):
    """One 3x3 conv (pad=1, bias-free) over rows-layout activations, optionally fused with
    the previous block's BN+ReLU.  Returns (y, ssum, ssq)."""
    cin3 = wmat.shape[1]
    cin_p = cin3 // 3
    cop = wmat.shape[2]
    hw = h * w
    m = n * hw
    assert n % nb == 0
    n_steps = n // nb
    rows_blk = nb * hw
    assert rows_blk % 8 == 0 or nb == n, "rows per block must be a multiple of 8"

    cost = pl.CostEstimate(
        flops=2 * m * 3 * cin3 * cop,
        transcendentals=0,
        bytes_accessed=(x_rows.size * x_rows.dtype.itemsize
                        + wmat.size * wmat.dtype.itemsize
                        + m * cop * jnp.dtype(compute_dtype).itemsize))

    return pl.pallas_call(
        functools.partial(conv3x3_stats_kernel, nb=nb, h=h, w=w,
                          apply_input_bn_relu=apply_input_bn_relu),
        out_shape=(jax.ShapeDtypeStruct((m, cop), compute_dtype),
                   jax.ShapeDtypeStruct((n_steps, 1, cop), jnp.float32),
                   jax.ShapeDtypeStruct((n_steps, 1, cop), jnp.float32)),
        grid_spec=pltpu.PrefetchScalarGridSpec(
            num_scalar_prefetch=0,
            grid=(n_steps,),
            in_specs=[
                pl.BlockSpec((rows_blk, cin_p), lambda i: (i, 0)),
                pl.BlockSpec((1, cin_p), lambda i: (0, 0)),
                pl.BlockSpec((1, cin_p), lambda i: (0, 0)),
                # constant index_map -> weight stays resident across the grid.
                # TODO(synk): for very wide channels verify it is not double-buffered.
                pl.BlockSpec((3, cin3, cop), lambda i: (0, 0, 0)),
            ],
            out_specs=[
                pl.BlockSpec((rows_blk, cop), lambda i: (i, 0)),
                pl.BlockSpec((1, 1, cop), lambda i: (i, 0, 0)),
                pl.BlockSpec((1, 1, cop), lambda i: (i, 0, 0)),
            ],
            scratch_shapes=[pltpu.VMEM((nb, h + 2, w, cin3), compute_dtype)],
        ),
        compiler_params=pltpu.CompilerParams(
            dimension_semantics=("parallel",),   # image tiles shard across v7x's 2 TCs
            vmem_limit_bytes=_VMEM_LIMIT),
        cost_estimate=cost,
    )(x_rows, scale, shift, wmat)


def _fold_bn(ssum, ssq, gamma, beta, m, eps):
    """Fold training-mode BatchNorm (biased variance) into one per-channel FMA."""
    s = jnp.sum(ssum, axis=(0, 1))
    q = jnp.sum(ssq, axis=(0, 1))
    mean = s / m
    # One-pass E[y^2]-E[y]^2 in f32, clamped; adequate for conv outputs whose |mean| is
    # not >> std.  TODO(synk): Welford combine of per-tile partials for extreme inputs.
    var = jnp.maximum(q / m - mean * mean, 0.0)
    inv = jax.lax.rsqrt(var + eps)
    scale = (gamma * inv).reshape(1, -1).astype(jnp.float32)
    shift = (beta - mean * gamma * inv).reshape(1, -1).astype(jnp.float32)
    return scale, shift


def _bn_relu(y, scale, shift, *, row_block, out_dtype):
    m, cop = y.shape
    assert m % row_block == 0
    return pl.pallas_call(
        bn_relu_kernel,
        out_shape=jax.ShapeDtypeStruct((m, cop), out_dtype),
        grid_spec=pltpu.PrefetchScalarGridSpec(
            num_scalar_prefetch=0,
            grid=(m // row_block,),
            in_specs=[
                pl.BlockSpec((row_block, cop), lambda i: (i, 0)),
                pl.BlockSpec((1, cop), lambda i: (0, 0)),
                pl.BlockSpec((1, cop), lambda i: (0, 0)),
            ],
            out_specs=pl.BlockSpec((row_block, cop), lambda i: (i, 0)),
        ),
        compiler_params=pltpu.CompilerParams(
            dimension_semantics=("parallel",),
            vmem_limit_bytes=_VMEM_LIMIT),
    )(y, scale, shift)


def _prep_weight(w_oihw, cin_p, cout_p, dtype):
    """(Cout, Cin, 3, 3) torch conv weight -> (3, 3*Cin_p, Cout_p): dy-major, dx merged
    into the contraction axis (row index = dx*Cin_p + cin), matching the xp3 slab layout."""
    co, ci, kh, kw = w_oihw.shape
    wt = jnp.transpose(w_oihw, (2, 3, 1, 0))                       # (dy, dx, cin, cout)
    wt = jnp.pad(wt, ((0, 0), (0, 0), (0, cin_p - ci), (0, cout_p - co)))
    return wt.reshape(kh, kw * cin_p, cout_p).astype(dtype)


def _prep_affine(gamma, beta, c_p):
    c = gamma.shape[0]
    g = jnp.pad(gamma.astype(jnp.float32), (0, c_p - c), constant_values=1.0)
    b = jnp.pad(beta.astype(jnp.float32), (0, c_p - c))
    return g, b


def center_block_forward(x_nchw, params, *, eps=1e-5, compute_dtype=jnp.bfloat16,
                         images_per_block=None, row_block=None):
    """Forward of CenterBlock.  Input/output in PyTorch NCHW layout (f32 output).

    The conv biases params['b1'] / params['b2'] are intentionally unused: a per-channel
    bias added before training-mode BatchNorm cancels exactly in the mean subtraction."""
    n, cin, h, w = x_nchw.shape
    cmid = params["w1"].shape[0]
    assert params["w2"].shape[1] == cmid, (
        "CenterBlock's second conv takes in_channels inputs; forward only runs when "
        "in_channels == middle_channels.")

    cin_p = _round_up(cin, LANE)
    cmid_p = _round_up(cmid, LANE)
    hw = h * w
    m = n * hw

    if images_per_block is None:
        # 1 image/step: max pipeline depth, even grid for v7x's 2 TCs, bounded VMEM/step.
        images_per_block = 1 if hw % 8 == 0 else n   # full-extent fallback for odd h*w
    nb = images_per_block
    if row_block is None:
        row_block = _largest_divisor(m, max(8, min(2048, m // 2)), 8)

    # Layout glue done ONCE each way: NCHW -> lane-dense (rows, channels), channel pad.
    # No XLA spatial padding: the conv kernels build their own halo in VMEM.
    x_rows = jnp.transpose(x_nchw, (0, 2, 3, 1)).astype(compute_dtype)
    x_rows = jnp.pad(x_rows, ((0, 0), (0, 0), (0, 0), (0, cin_p - cin))).reshape(m, cin_p)

    w1 = _prep_weight(params["w1"], cin_p, cmid_p, compute_dtype)
    w2 = _prep_weight(params["w2"], cmid_p, cmid_p, compute_dtype)
    g1, be1 = _prep_affine(params["g1"], params["be1"], cmid_p)
    g2, be2 = _prep_affine(params["g2"], params["be2"], cmid_p)

    one = jnp.ones((1, cin_p), jnp.float32)
    zero = jnp.zeros((1, cin_p), jnp.float32)

    # Block 1 conv (+stats).  y1 stays in compute dtype, rows layout (single HBM write).
    y1, ssum1, ssq1 = _conv3x3_stats(x_rows, one, zero, w1, n=n, h=h, w=w, nb=nb,
                                     apply_input_bn_relu=False,
                                     compute_dtype=compute_dtype)
    scale1, shift1 = _fold_bn(ssum1, ssq1, g1, be1, m, eps)

    # Block 2 conv with block 1's BN+ReLU fused in (no bn_relu pass, no re-pad, y1 read once).
    y2, ssum2, ssq2 = _conv3x3_stats(y1, scale1, shift1, w2, n=n, h=h, w=w, nb=nb,
                                     apply_input_bn_relu=True,
                                     compute_dtype=compute_dtype)
    scale2, shift2 = _fold_bn(ssum2, ssq2, g2, be2, m, eps)

    # Final BN + ReLU -> f32 module output, lane-dense row tiles.
    out_rows = _bn_relu(y2, scale2, shift2, row_block=row_block, out_dtype=jnp.float32)
    out = out_rows.reshape(n, h, w, cmid_p)[..., :cmid]
    return jnp.transpose(out, (0, 3, 1, 2))   # NHWC -> NCHW once, at the very end


def init_params(key, in_channels, middle_channels):
    """Deterministic synthetic parameters matching the module's __init__ shapes."""
    k1, k2, k3, k4, k5, k6 = jax.random.split(key, 6)
    w1 = 0.1 * jax.random.normal(k1, (middle_channels, in_channels, 3, 3), jnp.float32)
    b1 = 0.05 * jax.random.normal(k2, (middle_channels,), jnp.float32)
    # the second conv is declared Conv2d(in, mid, 3) in the original (requires in == mid)
    w2 = 0.1 * jax.random.normal(k3, (middle_channels, in_channels, 3, 3), jnp.float32)
    b2 = 0.05 * jax.random.normal(k4, (middle_channels,), jnp.float32)
    g1 = 1.0 + 0.1 * jax.random.normal(k5, (middle_channels,), jnp.float32)
    be1 = 0.05 * jax.random.normal(k6, (middle_channels,), jnp.float32)
    g2 = jnp.ones((middle_channels,), jnp.float32)
    be2 = jnp.zeros((middle_channels,), jnp.float32)
    return dict(w1=w1, b1=b1, g1=g1, be1=be1, w2=w2, b2=b2, g2=g2, be2=be2)


def _reference_forward(x_nchw, params, eps=1e-5):
    """Pure-JAX reference (lax conv WITH bias + training-mode BN) for correctness checks."""
    def block(x, w, b, g, be):
        y = jax.lax.conv_general_dilated(
            x, w, window_strides=(1, 1), padding=((1, 1), (1, 1)),
            dimension_numbers=("NCHW", "OIHW", "NCHW"))
        y = y + b[None, :, None, None]
        mean = jnp.mean(y, axis=(0, 2, 3), keepdims=True)
        var = jnp.mean((y - mean) ** 2, axis=(0, 2, 3), keepdims=True)
        y = (y - mean) * jax.lax.rsqrt(var + eps)
        y = y * g[None, :, None, None] + be[None, :, None, None]
        return jnp.maximum(y, 0.0)

    hh = block(x_nchw, params["w1"], params["b1"], params["g1"], params["be1"])
    hh = block(hh, params["w2"], params["b2"], params["g2"], params["be2"])
    return hh


if __name__ == "__main__":
    # Small shapes; the module requires in_channels == middle_channels to run.
    N, Cin, Cmid, Cout, H, W = 2, 4, 4, 8, 16, 16   # Cout / dropout unused by forward()

    key = jax.random.PRNGKey(0)
    kx, kp = jax.random.split(key)
    x = jax.random.normal(kx, (N, Cin, H, W), jnp.float32)
    params = init_params(kp, Cin, Cmid)

    ref = jax.block_until_ready(_reference_forward(x, params))

    # f32 compute path (defaults: 1 image per conv step, multi-step final grid): tight
    # check of the module semantics incl. bias-drop, BN fusion and dx-merged conv rewrites.
    fwd_f32 = jax.jit(functools.partial(center_block_forward, compute_dtype=jnp.float32))
    out_f32 = jax.block_until_ready(fwd_f32(x, params))
    assert out_f32.shape == (N, Cmid, H, W)
    assert jnp.allclose(out_f32, ref, atol=2e-3, rtol=2e-3)

    # bf16-MXU production path (also exercises multi-image blocks / single-step conv grid);
    # looser tolerance only accounts for bf16 rounding through two conv+BN stages.
    fwd_bf16 = jax.jit(functools.partial(center_block_forward, compute_dtype=jnp.bfloat16,
                                         images_per_block=2, row_block=256))
    out_bf16 = jax.block_until_ready(fwd_bf16(x, params))
    assert out_bf16.shape == (N, Cmid, H, W)
    assert jnp.allclose(out_bf16, ref, atol=1e-1, rtol=5e-2)

    print("KERNEL_OK")
</pallas_src>

<mosaic_0001>
module attributes {stable_mosaic.version = 11 : i64} {
  func.func @conv3x3_stats_kernel(%arg0: i32, %arg1: memref<256x128xf32, #tpu.memory_space<vmem>>, %arg2: memref<1x128xf32, #tpu.memory_space<vmem>>, %arg3: memref<1x128xf32, #tpu.memory_space<vmem>>, %arg4: memref<3x384x128xf32, #tpu.memory_space<vmem>>, %arg5: memref<256x128xf32, #tpu.memory_space<vmem>>, %arg6: memref<1x1x128xf32, #tpu.memory_space<vmem>>, %arg7: memref<1x1x128xf32, #tpu.memory_space<vmem>>, %arg8: memref<1x18x16x384xf32, #tpu.memory_space<vmem>>) attributes {dimension_semantics = [#tpu.dimension_semantics<parallel>], iteration_bounds = array<i64: 2>, scalar_prefetch = 0 : i64, scratch_operands = 1 : i64, tpu.core_type = #tpu.core_type<tc>, window_params = [{transform_indices = @transform_0, window_bounds = array<i64: 256, 128>}, {pipeline_mode = #tpu.pipeline_mode<synchronous>, transform_indices = @transform_1, window_bounds = array<i64: 1, 128>}, {pipeline_mode = #tpu.pipeline_mode<synchronous>, transform_indices = @transform_2, window_bounds = array<i64: 1, 128>}, {pipeline_mode = #tpu.pipeline_mode<synchronous>, transform_indices = @transform_3, window_bounds = array<i64: 3, 384, 128>}, {transform_indices = @transform_4, window_bounds = array<i64: 256, 128>}, {transform_indices = @transform_5, window_bounds = array<i64: 1, 1, 128>}, {transform_indices = @transform_6, window_bounds = array<i64: 1, 1, 128>}]} {
    %c0 = arith.constant 0 : index
    %c0_0 = arith.constant 0 : index
    %0 = vector.load %arg1[%c0, %c0_0] : memref<256x128xf32, #tpu.memory_space<vmem>>, vector<256x128xf32>
    %1 = vector.shape_cast %0 : vector<256x128xf32> to vector<1x16x16x128xf32>
    %cst = arith.constant 0.000000e+00 : f32
    %2 = vector.broadcast %cst : f32 to vector<1x1x16x384xf32>
    %cst_1 = arith.constant 0.000000e+00 : f32
    %3 = vector.broadcast %cst_1 : f32 to vector<1x16x1x128xf32>
    %c0_2 = arith.constant 0 : index
    %c0_3 = arith.constant 0 : index
    %c0_4 = arith.constant 0 : index
    %c0_5 = arith.constant 0 : index
    %4 = vector.load %arg8[%c0_2, %c0_3, %c0_4, %c0_5] : memref<1x18x16x384xf32, #tpu.memory_space<vmem>>, vector<1x1x16x384xf32>
    tpu.vector_store %arg8[%c0_2, %c0_3, %c0_4, %c0_5], %2 {strides = array<i32>} : memref<1x18x16x384xf32, #tpu.memory_space<vmem>>, vector<1x1x16x384xf32>,
    %c0_6 = arith.constant 0 : index
    %c17 = arith.constant 17 : index
    %c0_7 = arith.constant 0 : index
    %c0_8 = arith.constant 0 : index
    %5 = vector.load %arg8[%c0_6, %c17, %c0_7, %c0_8] : memref<1x18x16x384xf32, #tpu.memory_space<vmem>>, vector<1x1x16x384xf32>
    tpu.vector_store %arg8[%c0_6, %c17, %c0_7, %c0_8], %2 {strides = array<i32>} : memref<1x18x16x384xf32, #tpu.memory_space<vmem>>, vector<1x1x16x384xf32>,
    %c0_9 = arith.constant 0 : index
    %c1 = arith.constant 1 : index
    %c0_10 = arith.constant 0 : index
    %c128 = arith.constant 128 : index
    %6 = vector.load %arg8[%c0_9, %c1, %c0_10, %c128] : memref<1x18x16x384xf32, #tpu.memory_space<vmem>>, vector<1x16x16x128xf32>
    tpu.vector_store %arg8[%c0_9, %c1, %c0_10, %c128], %1 {strides = array<i32>} : memref<1x18x16x384xf32, #tpu.memory_space<vmem>>, vector<1x16x16x128xf32>,
    %c0_11 = arith.constant 0 : index
    %c1_12 = arith.constant 1 : index
    %c0_13 = arith.constant 0 : index
    %c0_14 = arith.constant 0 : index
    %7 = vector.load %arg8[%c0_11, %c1_12, %c0_13, %c0_14] : memref<1x18x16x384xf32, #tpu.memory_space<vmem>>, vector<1x16x1x128xf32>
    tpu.vector_store %arg8[%c0_11, %c1_12, %c0_13, %c0_14], %3 {strides = array<i32>} : memref<1x18x16x384xf32, #tpu.memory_space<vmem>>, vector<1x16x1x128xf32>,
    %8 = vector.extract_strided_slice %1 {offsets = [0, 0, 0, 0], sizes = [1, 16, 15, 128], strides = [1, 1, 1, 1]} : vector<1x16x16x128xf32> to vector<1x16x15x128xf32>
    %c0_15 = arith.constant 0 : index
    %c1_16 = arith.constant 1 : index
    %c1_17 = arith.constant 1 : index
    %c0_18 = arith.constant 0 : index
    %9 = vector.load %arg8[%c0_15, %c1_16, %c1_17, %c0_18] : memref<1x18x16x384xf32, #tpu.memory_space<vmem>>, vector<1x16x15x128xf32>
    tpu.vector_store %arg8[%c0_15, %c1_16, %c1_17, %c0_18], %8 {strides = array<i32>} : memref<1x18x16x384xf32, #tpu.memory_space<vmem>>, vector<1x16x15x128xf32>,
    %c0_19 = arith.constant 0 : index
    %c1_20 = arith.constant 1 : index
    %c15 = arith.constant 15 : index
    %c256 = arith.constant 256 : index
    %10 = vector.load %arg8[%c0_19, %c1_20, %c15, %c256] : memref<1x18x16x384xf32, #tpu.memory_space<vmem>>, vector<1x16x1x128xf32>
    tpu.vector_store %arg8[%c0_19, %c1_20, %c15, %c256], %3 {strides = array<i32>} : memref<1x18x16x384xf32, #tpu.memory_space<vmem>>, vector<1x16x1x128xf32>,
    %11 = vector.extract_strided_slice %1 {offsets = [0, 0, 1, 0], sizes = [1, 16, 15, 128], strides = [1, 1, 1, 1]} : vector<1x16x16x128xf32> to vector<1x16x15x128xf32>
    %c0_21 = arith.constant 0 : index
    %c1_22 = arith.constant 1 : index
    %c0_23 = arith.constant 0 : index
    %c256_24 = arith.constant 256 : index
    %12 = vector.load %arg8[%c0_21, %c1_22, %c0_23, %c256_24] : memref<1x18x16x384xf32, #tpu.memory_space<vmem>>, vector<1x16x15x128xf32>
    tpu.vector_store %arg8[%c0_21, %c1_22, %c0_23, %c256_24], %11 {strides = array<i32>} : memref<1x18x16x384xf32, #tpu.memory_space<vmem>>, vector<1x16x15x128xf32>,
    %c0_25 = arith.constant 0 : index
    %c0_26 = arith.constant 0 : index
    %c0_27 = arith.constant 0 : index
    %c0_28 = arith.constant 0 : index
    %13 = vector.load %arg8[%c0_25, %c0_26, %c0_27, %c0_28] : memref<1x18x16x384xf32, #tpu.memory_space<vmem>>, vector<1x16x16x384xf32>
    %14 = vector.shape_cast %13 : vector<1x16x16x384xf32> to vector<256x384xf32>
    %c0_29 = arith.constant 0 : index
    %c0_30 = arith.constant 0 : index
    %c0_31 = arith.constant 0 : index
    %15 = vector.load %arg4[%c0_29, %c0_30, %c0_31] : memref<3x384x128xf32, #tpu.memory_space<vmem>>, vector<1x384x128xf32>
    %16 = vector.shape_cast %15 : vector<1x384x128xf32> to vector<384x128xf32>
    %cst_32 = arith.constant dense<0.000000e+00> : vector<256x128xf32>
    %17 = tpu.matmul %14, %16, %cst_32 {dimension_numbers = #tpu.dot_dimension_numbers<[1], [0], [0], [1], [0, 0, 1, 1], [], []>} : vector<256x384xf32>, vector<384x128xf32>, vector<256x128xf32> -> vector<256x128xf32>
    %c0_33 = arith.constant 0 : index
    %c1_34 = arith.constant 1 : index
    %c0_35 = arith.constant 0 : index
    %c0_36 = arith.constant 0 : index
    %18 = vector.load %arg8[%c0_33, %c1_34, %c0_35, %c0_36] : memref<1x18x16x384xf32, #tpu.memory_space<vmem>>, vector<1x16x16x384xf32>
    %19 = vector.shape_cast %18 : vector<1x16x16x384xf32> to vector<256x384xf32>
    %c1_37 = arith.constant 1 : index
    %c0_38 = arith.constant 0 : index
    %c0_39 = arith.constant 0 : index
    %20 = vector.load %arg4[%c1_37, %c0_38, %c0_39] : memref<3x384x128xf32, #tpu.memory_space<vmem>>, vector<1x384x128xf32>
    %21 = vector.shape_cast %20 : vector<1x384x128xf32> to vector<384x128xf32>
    %cst_40 = arith.constant dense<0.000000e+00> : vector<256x128xf32>
    %22 = tpu.matmul %19, %21, %cst_40 {dimension_numbers = #tpu.dot_dimension_numbers<[1], [0], [0], [1], [0, 0, 1, 1], [], []>} : vector<256x384xf32>, vector<384x128xf32>, vector<256x128xf32> -> vector<256x128xf32>
    %23 = arith.addf %17, %22 : vector<256x128xf32>
    %c0_41 = arith.constant 0 : index
    %c2 = arith.constant 2 : index
    %c0_42 = arith.constant 0 : index
    %c0_43 = arith.constant 0 : index
    %24 = vector.load %arg8[%c0_41, %c2, %c0_42, %c0_43] : memref<1x18x16x384xf32, #tpu.memory_space<vmem>>, vector<1x16x16x384xf32>
    %25 = vector.shape_cast %24 : vector<1x16x16x384xf32> to vector<256x384xf32>
    %c2_44 = arith.constant 2 : index
    %c0_45 = arith.constant 0 : index
    %c0_46 = arith.constant 0 : index
    %26 = vector.load %arg4[%c2_44, %c0_45, %c0_46] : memref<3x384x128xf32, #tpu.memory_space<vmem>>, vector<1x384x128xf32>
    %27 = vector.shape_cast %26 : vector<1x384x128xf32> to vector<384x128xf32>
    %cst_47 = arith.constant dense<0.000000e+00> : vector<256x128xf32>
    %28 = tpu.matmul %25, %27, %cst_47 {dimension_numbers = #tpu.dot_dimension_numbers<[1], [0], [0], [1], [0, 0, 1, 1], [], []>} : vector<256x384xf32>, vector<384x128xf32>, vector<256x128xf32> -> vector<256x128xf32>
    %29 = arith.addf %23, %28 : vector<256x128xf32>
    %cst_48 = arith.constant dense<0.000000e+00> : vector<128xf32>
    %30 = vector.multi_reduction <add>, %29, %cst_48 [0] : vector<256x128xf32> to vector<128xf32>
    %31 = vector.shape_cast %30 : vector<128xf32> to vector<1x128xf32>
    %c0_49 = arith.constant 0 : index
    %c0_50 = arith.constant 0 : index
    %c0_51 = arith.constant 0 : index
    %32 = vector.load %arg6[%c0_49, %c0_50, %c0_51] : memref<1x1x128xf32, #tpu.memory_space<vmem>>, vector<1x1x128xf32>
    %33 = vector.shape_cast %32 : vector<1x1x128xf32> to vector<1x128xf32>
    %34 = vector.shape_cast %31 : vector<1x128xf32> to vector<1x1x128xf32>
    tpu.vector_store %arg6[%c0_49, %c0_50, %c0_51], %34 {strides = array<i32>} : memref<1x1x128xf32, #tpu.memory_space<vmem>>, vector<1x1x128xf32>,
    %35 = arith.mulf %29, %29 : vector<256x128xf32>
    %cst_52 = arith.constant dense<0.000000e+00> : vector<128xf32>
    %36 = vector.multi_reduction <add>, %35, %cst_52 [0] : vector<256x128xf32> to vector<128xf32>
    %37 = vector.shape_cast %36 : vector<128xf32> to vector<1x128xf32>
    %c0_53 = arith.constant 0 : index
    %c0_54 = arith.constant 0 : index
    %c0_55 = arith.constant 0 : index
    %38 = vector.load %arg7[%c0_53, %c0_54, %c0_55] : memref<1x1x128xf32, #tpu.memory_space<vmem>>, vector<1x1x128xf32>
    %39 = vector.shape_cast %38 : vector<1x1x128xf32> to vector<1x128xf32>
    %40 = vector.shape_cast %37 : vector<1x128xf32> to vector<1x1x128xf32>
    tpu.vector_store %arg7[%c0_53, %c0_54, %c0_55], %40 {strides = array<i32>} : memref<1x1x128xf32, #tpu.memory_space<vmem>>, vector<1x1x128xf32>,
    %c0_56 = arith.constant 0 : index
    %c0_57 = arith.constant 0 : index
    %41 = vector.load %arg5[%c0_56, %c0_57] : memref<256x128xf32, #tpu.memory_space<vmem>>, vector<256x128xf32>
    tpu.vector_store %arg5[%c0_56, %c0_57], %29 {strides = array<i32>} : memref<256x128xf32, #tpu.memory_space<vmem>>, vector<256x128xf32>,
    return
  }
  func.func @transform_0(%arg0: i32) -> (i32, i32) {
    %c0_i32 = arith.constant 0 : i32
    %c0_i32_0 = arith.constant 0 : i32
    return %arg0, %c0_i32 : i32, i32
  }
  func.func @transform_1(%arg0: i32) -> (i32, i32) {
    %c0_i32 = arith.constant 0 : i32
    %c0_i32_0 = arith.constant 0 : i32
    %c0_i32_1 = arith.constant 0 : i32
    return %c0_i32, %c0_i32_0 : i32, i32
  }
  func.func @transform_2(%arg0: i32) -> (i32, i32) {
    %c0_i32 = arith.constant 0 : i32
    %c0_i32_0 = arith.constant 0 : i32
    %c0_i32_1 = arith.constant 0 : i32
    return %c0_i32, %c0_i32_0 : i32, i32
  }
  func.func @transform_3(%arg0: i32) -> (i32, i32, i32) {
    %c0_i32 = arith.constant 0 : i32
    %c0_i32_0 = arith.constant 0 : i32
    %c0_i32_1 = arith.constant 0 : i32
    %c0_i32_2 = arith.constant 0 : i32
    return %c0_i32, %c0_i32_0, %c0_i32_1 : i32, i32, i32
  }
  func.func @transform_4(%arg0: i32) -> (i32, i32) {
    %c0_i32 = arith.constant 0 : i32
    %c0_i32_0 = arith.constant 0 : i32
    return %arg0, %c0_i32 : i32, i32
  }
  func.func @transform_5(%arg0: i32) -> (i32, i32, i32) {
    %c0_i32 = arith.constant 0 : i32
    %c0_i32_0 = arith.constant 0 : i32
    %c0_i32_1 = arith.constant 0 : i32
    return %arg0, %c0_i32, %c0_i32_0 : i32, i32, i32
  }
  func.func @transform_6(%arg0: i32) -> (i32, i32, i32) {
    %c0_i32 = arith.constant 0 : i32
    %c0_i32_0 = arith.constant 0 : i32
    %c0_i32_1 = arith.constant 0 : i32
    return %arg0, %c0_i32, %c0_i32_0 : i32, i32, i32
  }
}

module attributes {stable_mosaic.version = 11 : i64} {
  func.func @bn_relu_kernel(%arg0: i32, %arg1: memref<256x128xf32, #tpu.memory_space<vmem>>, %arg2: memref<1x128xf32, #tpu.memory_space<vmem>>, %arg3: memref<1x128xf32, #tpu.memory_space<vmem>>, %arg4: memref<256x128xf32, #tpu.memory_space<vmem>>) attributes {dimension_semantics = [#tpu.dimension_semantics<parallel>], iteration_bounds = array<i64: 2>, scalar_prefetch = 0 : i64, scratch_operands = 0 : i64, tpu.core_type = #tpu.core_type<tc>, window_params = [{transform_indices = @transform_0, window_bounds = array<i64: 256, 128>}, {pipeline_mode = #tpu.pipeline_mode<synchronous>, transform_indices = @transform_1, window_bounds = array<i64: 1, 128>}, {pipeline_mode = #tpu.pipeline_mode<synchronous>, transform_indices = @transform_2, window_bounds = array<i64: 1, 128>}, {transform_indices = @transform_3, window_bounds = array<i64: 256, 128>}]} {
    %c0 = arith.constant 0 : index
    %c0_0 = arith.constant 0 : index
    %0 = vector.load %arg1[%c0, %c0_0] : memref<256x128xf32, #tpu.memory_space<vmem>>, vector<256x128xf32>
    %c0_1 = arith.constant 0 : index
    %c0_2 = arith.constant 0 : index
    %1 = vector.load %arg2[%c0_1, %c0_2] : memref<1x128xf32, #tpu.memory_space<vmem>>, vector<1x128xf32>
    %2 = vector.broadcast %1 : vector<1x128xf32> to vector<256x128xf32>
    %3 = arith.mulf %0, %2 : vector<256x128xf32>
    %c0_3 = arith.constant 0 : index
    %c0_4 = arith.constant 0 : index
    %4 = vector.load %arg3[%c0_3, %c0_4] : memref<1x128xf32, #tpu.memory_space<vmem>>, vector<1x128xf32>
    %5 = vector.broadcast %4 : vector<1x128xf32> to vector<256x128xf32>
    %6 = arith.addf %3, %5 : vector<256x128xf32>
    %cst = arith.constant 0.000000e+00 : f32
    %7 = vector.broadcast %cst : f32 to vector<256x128xf32>
    %8 = arith.maximumf %6, %7 : vector<256x128xf32>
    %c0_5 = arith.constant 0 : index
    %c0_6 = arith.constant 0 : index
    %9 = vector.load %arg4[%c0_5, %c0_6] : memref<256x128xf32, #tpu.memory_space<vmem>>, vector<256x128xf32>
    tpu.vector_store %arg4[%c0_5, %c0_6], %8 {strides = array<i32>} : memref<256x128xf32, #tpu.memory_space<vmem>>, vector<256x128xf32>,
    return
  }
  func.func @transform_0(%arg0: i32) -> (i32, i32) {
    %c0_i32 = arith.constant 0 : i32
    %c0_i32_0 = arith.constant 0 : i32
    return %arg0, %c0_i32 : i32, i32
  }
  func.func @transform_1(%arg0: i32) -> (i32, i32) {
    %c0_i32 = arith.constant 0 : i32
    %c0_i32_0 = arith.constant 0 : i32
    %c0_i32_1 = arith.constant 0 : i32
    return %c0_i32, %c0_i32_0 : i32, i32
  }
  func.func @transform_2(%arg0: i32) -> (i32, i32) {
    %c0_i32 = arith.constant 0 : i32
    %c0_i32_0 = arith.constant 0 : i32
    %c0_i32_1 = arith.constant 0 : i32
    return %c0_i32, %c0_i32_0 : i32, i32
  }
  func.func @transform_3(%arg0: i32) -> (i32, i32) {
    %c0_i32 = arith.constant 0 : i32
    %c0_i32_0 = arith.constant 0 : i32
    return %arg0, %c0_i32 : i32, i32
  }
}

module attributes {stable_mosaic.version = 11 : i64} {
  func.func @conv3x3_stats_kernel(%arg0: i32, %arg1: memref<256x128xf32, #tpu.memory_space<vmem>>, %arg2: memref<1x128xf32, #tpu.memory_space<vmem>>, %arg3: memref<1x128xf32, #tpu.memory_space<vmem>>, %arg4: memref<3x384x128xf32, #tpu.memory_space<vmem>>, %arg5: memref<256x128xf32, #tpu.memory_space<vmem>>, %arg6: memref<1x1x128xf32, #tpu.memory_space<vmem>>, %arg7: memref<1x1x128xf32, #tpu.memory_space<vmem>>, %arg8: memref<1x18x16x384xf32, #tpu.memory_space<vmem>>) attributes {dimension_semantics = [#tpu.dimension_semantics<parallel>], iteration_bounds = array<i64: 2>, scalar_prefetch = 0 : i64, scratch_operands = 1 : i64, tpu.core_type = #tpu.core_type<tc>, window_params = [{transform_indices = @transform_0, window_bounds = array<i64: 256, 128>}, {pipeline_mode = #tpu.pipeline_mode<synchronous>, transform_indices = @transform_1, window_bounds = array<i64: 1, 128>}, {pipeline_mode = #tpu.pipeline_mode<synchronous>, transform_indices = @transform_2, window_bounds = array<i64: 1, 128>}, {pipeline_mode = #tpu.pipeline_mode<synchronous>, transform_indices = @transform_3, window_bounds = array<i64: 3, 384, 128>}, {transform_indices = @transform_4, window_bounds = array<i64: 256, 128>}, {transform_indices = @transform_5, window_bounds = array<i64: 1, 1, 128>}, {transform_indices = @transform_6, window_bounds = array<i64: 1, 1, 128>}]} {
    %c0 = arith.constant 0 : index
    %c0_0 = arith.constant 0 : index
    %0 = vector.load %arg1[%c0, %c0_0] : memref<256x128xf32, #tpu.memory_space<vmem>>, vector<256x128xf32>
    %c0_1 = arith.constant 0 : index
    %c0_2 = arith.constant 0 : index
    %1 = vector.load %arg2[%c0_1, %c0_2] : memref<1x128xf32, #tpu.memory_space<vmem>>, vector<1x128xf32>
    %2 = vector.broadcast %1 : vector<1x128xf32> to vector<256x128xf32>
    %3 = arith.mulf %0, %2 : vector<256x128xf32>
    %c0_3 = arith.constant 0 : index
    %c0_4 = arith.constant 0 : index
    %4 = vector.load %arg3[%c0_3, %c0_4] : memref<1x128xf32, #tpu.memory_space<vmem>>, vector<1x128xf32>
    %5 = vector.broadcast %4 : vector<1x128xf32> to vector<256x128xf32>
    %6 = arith.addf %3, %5 : vector<256x128xf32>
    %cst = arith.constant 0.000000e+00 : f32
    %7 = vector.broadcast %cst : f32 to vector<256x128xf32>
    %8 = arith.maximumf %6, %7 : vector<256x128xf32>
    %9 = vector.shape_cast %8 : vector<256x128xf32> to vector<1x16x16x128xf32>
    %cst_5 = arith.constant 0.000000e+00 : f32
    %10 = vector.broadcast %cst_5 : f32 to vector<1x1x16x384xf32>
    %cst_6 = arith.constant 0.000000e+00 : f32
    %11 = vector.broadcast %cst_6 : f32 to vector<1x16x1x128xf32>
    %c0_7 = arith.constant 0 : index
    %c0_8 = arith.constant 0 : index
    %c0_9 = arith.constant 0 : index
    %c0_10 = arith.constant 0 : index
    %12 = vector.load %arg8[%c0_7, %c0_8, %c0_9, %c0_10] : memref<1x18x16x384xf32, #tpu.memory_space<vmem>>, vector<1x1x16x384xf32>
    tpu.vector_store %arg8[%c0_7, %c0_8, %c0_9, %c0_10], %10 {strides = array<i32>} : memref<1x18x16x384xf32, #tpu.memory_space<vmem>>, vector<1x1x16x384xf32>,
    %c0_11 = arith.constant 0 : index
    %c17 = arith.constant 17 : index
    %c0_12 = arith.constant 0 : index
    %c0_13 = arith.constant 0 : index
    %13 = vector.load %arg8[%c0_11, %c17, %c0_12, %c0_13] : memref<1x18x16x384xf32, #tpu.memory_space<vmem>>, vector<1x1x16x384xf32>
    tpu.vector_store %arg8[%c0_11, %c17, %c0_12, %c0_13], %10 {strides = array<i32>} : memref<1x18x16x384xf32, #tpu.memory_space<vmem>>, vector<1x1x16x384xf32>,
    %c0_14 = arith.constant 0 : index
    %c1 = arith.constant 1 : index
    %c0_15 = arith.constant 0 : index
    %c128 = arith.constant 128 : index
    %14 = vector.load %arg8[%c0_14, %c1, %c0_15, %c128] : memref<1x18x16x384xf32, #tpu.memory_space<vmem>>, vector<1x16x16x128xf32>
    tpu.vector_store %arg8[%c0_14, %c1, %c0_15, %c128], %9 {strides = array<i32>} : memref<1x18x16x384xf32, #tpu.memory_space<vmem>>, vector<1x16x16x128xf32>,
    %c0_16 = arith.constant 0 : index
    %c1_17 = arith.constant 1 : index
    %c0_18 = arith.constant 0 : index
    %c0_19 = arith.constant 0 : index
    %15 = vector.load %arg8[%c0_16, %c1_17, %c0_18, %c0_19] : memref<1x18x16x384xf32, #tpu.memory_space<vmem>>, vector<1x16x1x128xf32>
    tpu.vector_store %arg8[%c0_16, %c1_17, %c0_18, %c0_19], %11 {strides = array<i32>} : memref<1x18x16x384xf32, #tpu.memory_space<vmem>>, vector<1x16x1x128xf32>,
    %16 = vector.extract_strided_slice %9 {offsets = [0, 0, 0, 0], sizes = [1, 16, 15, 128], strides = [1, 1, 1, 1]} : vector<1x16x16x128xf32> to vector<1x16x15x128xf32>
    %c0_20 = arith.constant 0 : index
    %c1_21 = arith.constant 1 : index
    %c1_22 = arith.constant 1 : index
    %c0_23 = arith.constant 0 : index
    %17 = vector.load %arg8[%c0_20, %c1_21, %c1_22, %c0_23] : memref<1x18x16x384xf32, #tpu.memory_space<vmem>>, vector<1x16x15x128xf32>
    tpu.vector_store %arg8[%c0_20, %c1_21, %c1_22, %c0_23], %16 {strides = array<i32>} : memref<1x18x16x384xf32, #tpu.memory_space<vmem>>, vector<1x16x15x128xf32>,
    %c0_24 = arith.constant 0 : index
    %c1_25 = arith.constant 1 : index
    %c15 = arith.constant 15 : index
    %c256 = arith.constant 256 : index
    %18 = vector.load %arg8[%c0_24, %c1_25, %c15, %c256] : memref<1x18x16x384xf32, #tpu.memory_space<vmem>>, vector<1x16x1x128xf32>
    tpu.vector_store %arg8[%c0_24, %c1_25, %c15, %c256], %11 {strides = array<i32>} : memref<1x18x16x384xf32, #tpu.memory_space<vmem>>, vector<1x16x1x128xf32>,
    %19 = vector.extract_strided_slice %9 {offsets = [0, 0, 1, 0], sizes = [1, 16, 15, 128], strides = [1, 1, 1, 1]} : vector<1x16x16x128xf32> to vector<1x16x15x128xf32>
    %c0_26 = arith.constant 0 : index
    %c1_27 = arith.constant 1 : index
    %c0_28 = arith.constant 0 : index
    %c256_29 = arith.constant 256 : index
    %20 = vector.load %arg8[%c0_26, %c1_27, %c0_28, %c256_29] : memref<1x18x16x384xf32, #tpu.memory_space<vmem>>, vector<1x16x15x128xf32>
    tpu.vector_store %arg8[%c0_26, %c1_27, %c0_28, %c256_29], %19 {strides = array<i32>} : memref<1x18x16x384xf32, #tpu.memory_space<vmem>>, vector<1x16x15x128xf32>,
    %c0_30 = arith.constant 0 : index
    %c0_31 = arith.constant 0 : index
    %c0_32 = arith.constant 0 : index
    %c0_33 = arith.constant 0 : index
    %21 = vector.load %arg8[%c0_30, %c0_31, %c0_32, %c0_33] : memref<1x18x16x384xf32, #tpu.memory_space<vmem>>, vector<1x16x16x384xf32>
    %22 = vector.shape_cast %21 : vector<1x16x16x384xf32> to vector<256x384xf32>
    %c0_34 = arith.constant 0 : index
    %c0_35 = arith.constant 0 : index
    %c0_36 = arith.constant 0 : index
    %23 = vector.load %arg4[%c0_34, %c0_35, %c0_36] : memref<3x384x128xf32, #tpu.memory_space<vmem>>, vector<1x384x128xf32>
    %24 = vector.shape_cast %23 : vector<1x384x128xf32> to vector<384x128xf32>
    %cst_37 = arith.constant dense<0.000000e+00> : vector<256x128xf32>
    %25 = tpu.matmul %22, %24, %cst_37 {dimension_numbers = #tpu.dot_dimension_numbers<[1], [0], [0], [1], [0, 0, 1, 1], [], []>} : vector<256x384xf32>, vector<384x128xf32>, vector<256x128xf32> -> vector<256x128xf32>
    %c0_38 = arith.constant 0 : index
    %c1_39 = arith.constant 1 : index
    %c0_40 = arith.constant 0 : index
    %c0_41 = arith.constant 0 : index
    %26 = vector.load %arg8[%c0_38, %c1_39, %c0_40, %c0_41] : memref<1x18x16x384xf32, #tpu.memory_space<vmem>>, vector<1x16x16x384xf32>
    %27 = vector.shape_cast %26 : vector<1x16x16x384xf32> to vector<256x384xf32>
    %c1_42 = arith.constant 1 : index
    %c0_43 = arith.constant 0 : index
    %c0_44 = arith.constant 0 : index
    %28 = vector.load %arg4[%c1_42, %c0_43, %c0_44] : memref<3x384x128xf32, #tpu.memory_space<vmem>>, vector<1x384x128xf32>
    %29 = vector.shape_cast %28 : vector<1x384x128xf32> to vector<384x128xf32>
    %cst_45 = arith.constant dense<0.000000e+00> : vector<256x128xf32>
    %30 = tpu.matmul %27, %29, %cst_45 {dimension_numbers = #tpu.dot_dimension_numbers<[1], [0], [0], [1], [0, 0, 1, 1], [], []>} : vector<256x384xf32>, vector<384x128xf32>, vector<256x128xf32> -> vector<256x128xf32>
    %31 = arith.addf %25, %30 : vector<256x128xf32>
    %c0_46 = arith.constant 0 : index
    %c2 = arith.constant 2 : index
    %c0_47 = arith.constant 0 : index
    %c0_48 = arith.constant 0 : index
    %32 = vector.load %arg8[%c0_46, %c2, %c0_47, %c0_48] : memref<1x18x16x384xf32, #tpu.memory_space<vmem>>, vector<1x16x16x384xf32>
    %33 = vector.shape_cast %32 : vector<1x16x16x384xf32> to vector<256x384xf32>
    %c2_49 = arith.constant 2 : index
    %c0_50 = arith.constant 0 : index
    %c0_51 = arith.constant 0 : index
    %34 = vector.load %arg4[%c2_49, %c0_50, %c0_51] : memref<3x384x128xf32, #tpu.memory_space<vmem>>, vector<1x384x128xf32>
    %35 = vector.shape_cast %34 : vector<1x384x128xf32> to vector<384x128xf32>
    %cst_52 = arith.constant dense<0.000000e+00> : vector<256x128xf32>
    %36 = tpu.matmul %33, %35, %cst_52 {dimension_numbers = #tpu.dot_dimension_numbers<[1], [0], [0], [1], [0, 0, 1, 1], [], []>} : vector<256x384xf32>, vector<384x128xf32>, vector<256x128xf32> -> vector<256x128xf32>
    %37 = arith.addf %31, %36 : vector<256x128xf32>
    %cst_53 = arith.constant dense<0.000000e+00> : vector<128xf32>
    %38 = vector.multi_reduction <add>, %37, %cst_53 [0] : vector<256x128xf32> to vector<128xf32>
    %39 = vector.shape_cast %38 : vector<128xf32> to vector<1x128xf32>
    %c0_54 = arith.constant 0 : index
    %c0_55 = arith.constant 0 : index
    %c0_56 = arith.constant 0 : index
    %40 = vector.load %arg6[%c0_54, %c0_55, %c0_56] : memref<1x1x128xf32, #tpu.memory_space<vmem>>, vector<1x1x128xf32>
    %41 = vector.shape_cast %40 : vector<1x1x128xf32> to vector<1x128xf32>
    %42 = vector.shape_cast %39 : vector<1x128xf32> to vector<1x1x128xf32>
    tpu.vector_store %arg6[%c0_54, %c0_55, %c0_56], %42 {strides = array<i32>} : memref<1x1x128xf32, #tpu.memory_space<vmem>>, vector<1x1x128xf32>,
    %43 = arith.mulf %37, %37 : vector<256x128xf32>
    %cst_57 = arith.constant dense<0.000000e+00> : vector<128xf32>
    %44 = vector.multi_reduction <add>, %43, %cst_57 [0] : vector<256x128xf32> to vector<128xf32>
    %45 = vector.shape_cast %44 : vector<128xf32> to vector<1x128xf32>
    %c0_58 = arith.constant 0 : index
    %c0_59 = arith.constant 0 : index
    %c0_60 = arith.constant 0 : index
    %46 = vector.load %arg7[%c0_58, %c0_59, %c0_60] : memref<1x1x128xf32, #tpu.memory_space<vmem>>, vector<1x1x128xf32>
    %47 = vector.shape_cast %46 : vector<1x1x128xf32> to vector<1x128xf32>
    %48 = vector.shape_cast %45 : vector<1x128xf32> to vector<1x1x128xf32>
    tpu.vector_store %arg7[%c0_58, %c0_59, %c0_60], %48 {strides = array<i32>} : memref<1x1x128xf32, #tpu.memory_space<vmem>>, vector<1x1x128xf32>,
    %c0_61 = arith.constant 0 : index
    %c0_62 = arith.constant 0 : index
    %49 = vector.load %arg5[%c0_61, %c0_62] : memref<256x128xf32, #tpu.memory_space<vmem>>, vector<256x128xf32>
    tpu.vector_store %arg5[%c0_61, %c0_62], %37 {strides = array<i32>} : memref<256x128xf32, #tpu.memory_space<vmem>>, vector<256x128xf32>,
    return
  }
  func.func @transform_0(%arg0: i32) -> (i32, i32) {
    %c0_i32 = arith.constant 0 : i32
    %c0_i32_0 = arith.constant 0 : i32
    return %arg0, %c0_i32 : i32, i32
  }
  func.func @transform_1(%arg0: i32) -> (i32, i32) {
    %c0_i32 = arith.constant 0 : i32
    %c0_i32_0 = arith.constant 0 : i32
    %c0_i32_1 = arith.constant 0 : i32
    return %c0_i32, %c0_i32_0 : i32, i32
  }
  func.func @transform_2(%arg0: i32) -> (i32, i32) {
    %c0_i32 = arith.constant 0 : i32
    %c0_i32_0 = arith.constant 0 : i32
    %c0_i32_1 = arith.constant 0 : i32
    return %c0_i32, %c0_i32_0 : i32, i32
  }
  func.func @transform_3(%arg0: i32) -> (i32, i32, i32) {
    %c0_i32 = arith.constant 0 : i32
    %c0_i32_0 = arith.constant 0 : i32
    %c0_i32_1 = arith.constant 0 : i32
    %c0_i32_2 = arith.constant 0 : i32
    return %c0_i32, %c0_i32_0, %c0_i32_1 : i32, i32, i32
  }
  func.func @transform_4(%arg0: i32) -> (i32, i32) {
    %c0_i32 = arith.constant 0 : i32
    %c0_i32_0 = arith.constant 0 : i32
    return %arg0, %c0_i32 : i32, i32
  }
  func.func @transform_5(%arg0: i32) -> (i32, i32, i32) {
    %c0_i32 = arith.constant 0 : i32
    %c0_i32_0 = arith.constant 0 : i32
    %c0_i32_1 = arith.constant 0 : i32
    return %arg0, %c0_i32, %c0_i32_0 : i32, i32, i32
  }
  func.func @transform_6(%arg0: i32) -> (i32, i32, i32) {
    %c0_i32 = arith.constant 0 : i32
    %c0_i32_0 = arith.constant 0 : i32
    %c0_i32_1 = arith.constant 0 : i32
    return %arg0, %c0_i32, %c0_i32_0 : i32, i32, i32
  }
}

</mosaic_0001>

<bundles_post_ra>
// kernel: center_block_forward.5
= control target key start
LH: loop header
LB: loop body
LE: loop exit
PB: predicated region body
PF: predicated region fallthrough
CT: control target
= control target key end

     0   :  { %s447_s12 = smov 0   ;;  %s606_s0 = inlined_call_operand.vmem [shape: f32[512,128], index: 0, kind: input, shape index: {}]   ;;  %s607_s1 = inlined_call_operand.vmem [shape: f32[1,128], index: 1, kind: input, shape index: {}]   ;;  %s608_s2 = inlined_call_operand.vmem [shape: f32[1,128], index: 2, kind: input, shape index: {}]   ;;  %s609_s3 = inlined_call_operand.vmem [shape: f32[512,128], index: 3, kind: output, shape index: {}]  }
   0x1 LB: > { %s398_s13 = sadd.s32 4294967295, %s425_s12   ;;  %p402_p0 = scmp.ge.s32.totalorder %s425_s12, 1  ;;  %s425_s12 = sphi %s447_s12, %s13_s12  }
   0x2   : > { %p138_p1 = scmp.lt.s32.totalorder %s425_s12, 3 }
   0x4   : > { %p139_p2 = pnand %p402_p0, %p138_p1 }
   0x5   : > { %s403_s14 = sshll.u32 (!%p139_p2), %s398_s13, 5 }
   0x6   : > { %142 = sbr.rel (%p139_p2) target bundleno = 53 (0x35), region = 32  ;;  %p163_p3 = scmp.lt.s32.totalorder (!%p139_p2), %s403_s14, 63 }
   0xb   : > { %s611_s14 = smov (!%p163_p3, %s403_s14), 63  ;;  %v458_v0 = vld [vmem:[%s607_s1] ss:$0 sm:$0xff] }
   0xc   : > { %s404_s17 = sshll.u32 %s611_s14, 3  ;;  %v468_v1 = vld [vmem:[%s608_s2] ss:$0 sm:$0xff] }
   0xd   : > { %s463_s20 = scalar_lea.vmem %s606_s0, %s404_s17  ;;  %s491_s25 = scalar_lea.vmem %s609_s3, %s404_s17 }
   0xe   : > { %v174_v2 = vld [vmem:[%s463_s20] sm:$0xff]  ;;  %v175_v3 = vld [vmem:[%s463_s20 + $0x8] sm:$0xff]  ;;  %v176_v4 = vld [vmem:[%s463_s20 + $0x10] sm:$0xff] }
   0xf   : > { %v210_v5 = vmul.f32 %v458_v0, %v174_v2  ;;  %v211_v6 = vmul.f32 %v458_v0, %v175_v3  ;;  %v212_v7 = vmul.f32 %v458_v0, %v176_v4  ;;  %v177_v8 = vld [vmem:[%s463_s20 + $0x18] sm:$0xff]  ;;  %v178_v9 = vld [vmem:[%s463_s20 + $0x20] sm:$0xff]  ;;  %v179_v10 = vld [vmem:[%s463_s20 + $0x28] sm:$0xff] }
  0x10   : > { %v213_v11 = vmul.f32 %v458_v0, %v177_v8  ;;  %v214_v12 = vmul.f32 %v458_v0, %v178_v9  ;;  %v215_v13 = vmul.f32 %v458_v0, %v179_v10  ;;  %v180_v14 = vld [vmem:[%s463_s20 + $0x30] sm:$0xff]  ;;  %v181_v15 = vld [vmem:[%s463_s20 + $0x38] sm:$0xff]  ;;  %v182_v24 = vld [vmem:[%s463_s20 + $0x40] sm:$0xff] }
  0x11   : > { %v246_v16 = vadd.f32 %v468_v1, %v210_v5  ;;  %v247_v17 = vadd.f32 %v468_v1, %v211_v6  ;;  %v248_v18 = vadd.f32 %v468_v1, %v212_v7  ;;  %v216_v19 = vmul.f32 %v458_v0, %v180_v14  ;;  %v183_v25 = vld [vmem:[%s463_s20 + $0x48] sm:$0xff]  ;;  %v184_v26 = vld [vmem:[%s463_s20 + $0x50] sm:$0xff]  ;;  %v185_v31 = vld [vmem:[%s463_s20 + $0x58] sm:$0xff] }
  0x12   : > { %v249_v20 = vadd.f32 %v468_v1, %v213_v11  ;;  %v250_v21 = vadd.f32 %v468_v1, %v214_v12  ;;  %v251_v22 = vadd.f32 %v468_v1, %v215_v13  ;;  %v217_v23 = vmul.f32 %v458_v0, %v181_v15  ;;  %v186_v32 = vld [vmem:[%s463_s20 + $0x60] sm:$0xff]  ;;  %v187_v33 = vld [vmem:[%s463_s20 + $0x68] sm:$0xff]  ;;  %v188_v37 = vld [vmem:[%s463_s20 + $0x70] sm:$0xff] }
  0x13   : > { %v278_v27 = vmax.f32 %v246_v16, 0.0  ;;  %v279_v28 = vmax.f32 %v247_v17, 0.0  ;;  %v280_v29 = vmax.f32 %v248_v18, 0.0  ;;  %v252_v30 = vadd.f32 %v468_v1, %v216_v19  ;;  %v189_v42 = vld [vmem:[%s463_s20 + $0x78] sm:$0xff]  ;;  %v190_v54 = vld [vmem:[%s463_s20 + $0x80] sm:$0xff]  ;;  %v191_v55 = vld [vmem:[%s463_s20 + $0x88] sm:$0xff] }
  0x14   : > { %v281_v34 = vmax.f32 %v249_v20, 0.0  ;;  %v282_v35 = vmax.f32 %v250_v21, 0.0  ;;  %v253_v36 = vadd.f32 %v468_v1, %v217_v23  ;;  %v283_v38 = vmax.f32 %v251_v22, 0.0  ;;  %v192_v56 = vld [vmem:[%s463_s20 + $0x90] sm:$0xff]  ;;  %v193_v59 = vld [vmem:[%s463_s20 + $0x98] sm:$0xff]  ;;  %v194_v63 = vld [vmem:[%s463_s20 + $0xa0] sm:$0xff] }
  0x15   : > { %310 = vst [vmem:[%s491_s25] sm:$0xff] %v278_v27  ;;  %v218_v39 = vmul.f32 %v458_v0, %v182_v24  ;;  %v219_v40 = vmul.f32 %v458_v0, %v183_v25  ;;  %v220_v41 = vmul.f32 %v458_v0, %v184_v26  ;;  %v284_v43 = vmax.f32 %v252_v30, 0.0  ;;  %v195_v6 = vld [vmem:[%s463_s20 + $0xa8] sm:$0xff]  ;;  %v196_v10 = vld [vmem:[%s463_s20 + $0xb0] sm:$0xff]  ;;  %v197_v14 = vld [vmem:[%s463_s20 + $0xb8] sm:$0xff] }
  0x16   : > { %311 = vst [vmem:[%s491_s25 + $0x8] sm:$0xff] %v279_v28  ;;  %v221_v44 = vmul.f32 %v458_v0, %v185_v31  ;;  %v222_v45 = vmul.f32 %v458_v0, %v186_v32  ;;  %v223_v46 = vmul.f32 %v458_v0, %v187_v33  ;;  %v224_v50 = vmul.f32 %v458_v0, %v188_v37  ;;  %v198_v18 = vld [vmem:[%s463_s20 + $0xc0] sm:$0xff]  ;;  %v199_v22 = vld [vmem:[%s463_s20 + $0xc8] sm:$0xff]  ;;  %v200_v26 = vld [vmem:[%s463_s20 + $0xd0] sm:$0xff] }
  0x17   : > { %312 = vst [vmem:[%s491_s25 + $0x10] sm:$0xff] %v280_v29  ;;  %v254_v47 = vadd.f32 %v468_v1, %v218_v39  ;;  %v255_v48 = vadd.f32 %v468_v1, %v219_v40  ;;  %v256_v49 = vadd.f32 %v468_v1, %v220_v41  ;;  %v285_v51 = vmax.f32 %v253_v36, 0.0  ;;  %v201_v30 = vld [vmem:[%s463_s20 + $0xd8] sm:$0xff] }
  0x18   : > { %313 = vst [vmem:[%s491_s25 + $0x18] sm:$0xff] %v281_v34  ;;  %v257_v52 = vadd.f32 %v468_v1, %v221_v44  ;;  %v225_v53 = vmul.f32 %v458_v0, %v189_v42  ;;  %v258_v58 = vadd.f32 %v468_v1, %v222_v45  ;;  %v259_v62 = vadd.f32 %v468_v1, %v223_v46  ;;  %v202_v34 = vld [vmem:[%s463_s20 + $0xe0] sm:$0xff]  ;;  %v204_v42 = vld [vmem:[%s463_s20 + $0xf0] sm:$0xff]  ;;  %v205_v46 = vld [vmem:[%s463_s20 + $0xf8] sm:$0xff] }
  0x19   : > { %314 = vst [vmem:[%s491_s25 + $0x20] sm:$0xff] %v282_v35  ;;  %v286_v57 = vmax.f32 %v254_v47, 0.0  ;;  %v287_v60 = vmax.f32 %v255_v48, 0.0  ;;  %v288_v61 = vmax.f32 %v256_v49, 0.0  ;;  %v260_v2 = vadd.f32 %v468_v1, %v224_v50 }
  0x1a   : > { %315 = vst [vmem:[%s491_s25 + $0x28] sm:$0xff] %v283_v38  ;;  %v226_v3 = vmul.f32 %v458_v0, %v190_v54  ;;  %v227_v4 = vmul.f32 %v458_v0, %v191_v55  ;;  %v228_v5 = vmul.f32 %v458_v0, %v192_v56  ;;  %v289_v7 = vmax.f32 %v257_v52, 0.0  ;;  %v203_v38 = vld [vmem:[%s463_s20 + $0xe8] sm:$0xff] }
  0x1b   : > { %316 = vst [vmem:[%s491_s25 + $0x30] sm:$0xff] %v284_v43  ;;  %v261_v8 = vadd.f32 %v468_v1, %v225_v53  ;;  %v229_v9 = vmul.f32 %v458_v0, %v193_v59  ;;  %v290_v11 = vmax.f32 %v258_v58, 0.0  ;;  %v230_v13 = vmul.f32 %v458_v0, %v194_v63 }
  0x1c   : > { %317 = vst [vmem:[%s491_s25 + $0x38] sm:$0xff] %v285_v51  ;;  %v262_v12 = vadd.f32 %v468_v1, %v226_v3  ;;  %v291_v15 = vmax.f32 %v259_v62, 0.0  ;;  %v263_v16 = vadd.f32 %v468_v1, %v227_v4  ;;  %v231_v17 = vmul.f32 %v458_v0, %v195_v6 }
  0x1d   : > { %318 = vst [vmem:[%s491_s25 + $0x40] sm:$0xff] %v286_v57  ;;  %v292_v19 = vmax.f32 %v260_v2, 0.0  ;;  %v264_v20 = vadd.f32 %v468_v1, %v228_v5  ;;  %v232_v21 = vmul.f32 %v458_v0, %v196_v10  ;;  %v293_v23 = vmax.f32 %v261_v8, 0.0 }
  0x1e   : > { %319 = vst [vmem:[%s491_s25 + $0x48] sm:$0xff] %v287_v60  ;;  %v265_v24 = vadd.f32 %v468_v1, %v229_v9  ;;  %v233_v25 = vmul.f32 %v458_v0, %v197_v14  ;;  %v294_v27 = vmax.f32 %v262_v12, 0.0  ;;  %v266_v28 = vadd.f32 %v468_v1, %v230_v13 }
  0x1f   : > { %320 = vst [vmem:[%s491_s25 + $0x50] sm:$0xff] %v288_v61  ;;  %v234_v29 = vmul.f32 %v458_v0, %v198_v18  ;;  %v295_v31 = vmax.f32 %v263_v16, 0.0  ;;  %v267_v32 = vadd.f32 %v468_v1, %v231_v17  ;;  %v235_v33 = vmul.f32 %v458_v0, %v199_v22 }
  0x20   : > { %321 = vst [vmem:[%s491_s25 + $0x58] sm:$0xff] %v289_v7  ;;  %v296_v35 = vmax.f32 %v264_v20, 0.0  ;;  %v268_v36 = vadd.f32 %v468_v1, %v232_v21  ;;  %v236_v37 = vmul.f32 %v458_v0, %v200_v26  ;;  %v297_v39 = vmax.f32 %v265_v24, 0.0 }
  0x21   : > { %322 = vst [vmem:[%s491_s25 + $0x60] sm:$0xff] %v290_v11  ;;  %v269_v40 = vadd.f32 %v468_v1, %v233_v25  ;;  %v237_v41 = vmul.f32 %v458_v0, %v201_v30  ;;  %v298_v43 = vmax.f32 %v266_v28, 0.0  ;;  %v270_v44 = vadd.f32 %v468_v1, %v234_v29 }
  0x22   : > { %323 = vst [vmem:[%s491_s25 + $0x68] sm:$0xff] %v291_v15  ;;  %v238_v45 = vmul.f32 %v458_v0, %v202_v34  ;;  %v299_v47 = vmax.f32 %v267_v32, 0.0  ;;  %v271_v48 = vadd.f32 %v468_v1, %v235_v33  ;;  %v239_v49 = vmul.f32 %v458_v0, %v203_v38 }
  0x23   : > { %324 = vst [vmem:[%s491_s25 + $0x70] sm:$0xff] %v292_v19  ;;  %v300_v50 = vmax.f32 %v268_v36, 0.0  ;;  %v272_v51 = vadd.f32 %v468_v1, %v236_v37  ;;  %v240_v52 = vmul.f32 %v458_v0, %v204_v42  ;;  %v301_v53 = vmax.f32 %v269_v40, 0.0 }
  0x24   : > { %325 = vst [vmem:[%s491_s25 + $0x78] sm:$0xff] %v293_v23  ;;  %v273_v54 = vadd.f32 %v468_v1, %v237_v41  ;;  %v241_v55 = vmul.f32 %v458_v0, %v205_v46  ;;  %v302_v56 = vmax.f32 %v270_v44, 0.0  ;;  %v274_v57 = vadd.f32 %v468_v1, %v238_v45 }
  0x25   : > { %326 = vst [vmem:[%s491_s25 + $0x80] sm:$0xff] %v294_v27  ;;  %v303_v58 = vmax.f32 %v271_v48, 0.0  ;;  %v275_v59 = vadd.f32 %v468_v1, %v239_v49  ;;  %v304_v60 = vmax.f32 %v272_v51, 0.0  ;;  %v276_v61 = vadd.f32 %v468_v1, %v240_v52 }
  0x26   : > { %327 = vst [vmem:[%s491_s25 + $0x88] sm:$0xff] %v295_v31  ;;  %v305_v0 = vmax.f32 %v273_v54, 0.0  ;;  %v277_v62 = vadd.f32 %v468_v1, %v241_v55  ;;  %v306_v63 = vmax.f32 %v274_v57, 0.0 }
  0x27   : > { %328 = vst [vmem:[%s491_s25 + $0x90] sm:$0xff] %v296_v35  ;;  %v307_v2 = vmax.f32 %v275_v59, 0.0  ;;  %v308_v3 = vmax.f32 %v276_v61, 0.0 }
  0x28   : > { %329 = vst [vmem:[%s491_s25 + $0x98] sm:$0xff] %v297_v39  ;;  %v309_v4 = vmax.f32 %v277_v62, 0.0 }
  0x29   : > { %330 = vst [vmem:[%s491_s25 + $0xa0] sm:$0xff] %v298_v43 }
  0x2a   : > { %331 = vst [vmem:[%s491_s25 + $0xa8] sm:$0xff] %v299_v47 }
  0x2b   : > { %332 = vst [vmem:[%s491_s25 + $0xb0] sm:$0xff] %v300_v50 }
  0x2c   : > { %333 = vst [vmem:[%s491_s25 + $0xb8] sm:$0xff] %v301_v53 }
  0x2d   : > { %334 = vst [vmem:[%s491_s25 + $0xc0] sm:$0xff] %v302_v56 }
  0x2e   : > { %335 = vst [vmem:[%s491_s25 + $0xc8] sm:$0xff] %v303_v58 }
  0x2f   : > { %336 = vst [vmem:[%s491_s25 + $0xd0] sm:$0xff] %v304_v60 }
  0x30   : > { %337 = vst [vmem:[%s491_s25 + $0xd8] sm:$0xff] %v305_v0 }
  0x31   : > { %338 = vst [vmem:[%s491_s25 + $0xe0] sm:$0xff] %v306_v63 }
  0x32   : > { %339 = vst [vmem:[%s491_s25 + $0xe8] sm:$0xff] %v307_v2 }
  0x33   : > { %340 = vst [vmem:[%s491_s25 + $0xf0] sm:$0xff] %v308_v3 }
  0x34   : > { %341 = vst [vmem:[%s491_s25 + $0xf8] sm:$0xff] %v309_v4 }
  0x35 PF: > { %s13_s12 = sadd.s32 1, %s425_s12  }
  0x36   : > { %p10_p4 = scmp.ge.s32.totalorder %s13_s12, 4  }
  0x38   :  { %12 = sbr.rel (!%p10_p4) target bundleno = 1 (0x1), region = 62 }

// kernel: center_block_forward.3
= control target key start
LH: loop header
LB: loop body
LE: loop exit
PB: predicated region body
PF: predicated region fallthrough
CT: control target
= control target key end

     0   :  { %s2583_s21 = smov 0   ;;  %s3788_s0 = inlined_call_operand.vmem [shape: f32[512,128], index: 0, kind: input, shape index: {}]   ;;  %s3789_s1 = inlined_call_operand.vmem [shape: f32[1,128], index: 1, kind: input, shape index: {}]   ;;  %s3790_s2 = inlined_call_operand.vmem [shape: f32[1,128], index: 2, kind: input, shape index: {}]   ;;  %s3791_s3 = inlined_call_operand.vmem [shape: f32[3,384,128], index: 3, kind: input, shape index: {}]   ;;  %s3792_s4 = inlined_call_operand.vmem [shape: f32[512,128], index: 4, kind: output, shape index: {0}]   ;;  %s3793_s5 = inlined_call_operand.vmem [shape: f32[2,1,128], index: 5, kind: output, shape index: {1}]   ;;  %s3794_s6 = inlined_call_operand.vmem [shape: f32[2,1,128], index: 6, kind: output, shape index: {2}]  }
   0x1 LB: > { %s2589_s1 = sadd.s32 4294967295, %s2545_s21   ;;  %p2374_p0 = scmp.ge.s32.totalorder %s2545_s21, 1  ;;  %s2545_s21 = sphi %s2583_s21, %s17_s21  }
   0x2   : > { %p218_p1 = scmp.lt.s32.totalorder %s2545_s21, 3 }
   0x4   : > { %p219_p2 = pnand %p2374_p0, %p218_p1 }
   0x6   : > { %222 = sbr.rel (%p219_p2) target bundleno = 782 (0x30e), region = 36 }
   0xb   : > { %v2394_v0 = vld [vmem:[%s3791_s3 + $0x1f8] sm:$0xff]  ;;  %v2393_v1 = vld [vmem:[%s3791_s3 + $0x1f0] sm:$0xff]  ;;  %s2375_s25 = sshll.u32 %s2589_s1, 5  ;;  %v2547_v2 = vmov 0.0   ;;  %v2392_v3 = vld [vmem:[%s3791_s3 + $0x1e8] sm:$0xff]  ;;  %vm398_vm0 = vcmask 1040384  }
   0xc   : > { %2477 = vmatpush.msra.mxu1 %v2394_v0  ;;  %2478 = vmatpush.msra.mxu2 %v2394_v0  ;;  %p255_p3 = scmp.lt.s32.totalorder %s2375_s25, 63  ;;  %354 = vst [vmem:[#allocation2 + $0xf0] sm:$0x1] %v2547_v2  ;;  %v2391_v4 = vld [vmem:[%s3791_s3 + $0x1e0] sm:$0xff]  ;;  %v2390_v5 = vld [vmem:[%s3791_s3 + $0x1d8] sm:$0xff]  ;;  %v2389_v7 = vld [vmem:[%s3791_s3 + $0x1d0] sm:$0xff] }
   0xd   : > { %2479 = vmatpush.msra.mxu3 %v2394_v0  ;;  %929 = vmatpush.msra.mxu0 %v2394_v0  ;;  %304 = vst [vmem:[#allocation2] sm:$0xff] %v2547_v2  ;;  %v2388_v9 = vld [vmem:[%s3791_s3 + $0x1c8] sm:$0xff]  ;;  %v2387_v10 = vld [vmem:[%s3791_s3 + $0x1c0] sm:$0xff]  ;;  %v2386_v11 = vld [vmem:[%s3791_s3 + $0x1b8] sm:$0xff]  ;;  %vm527_vm1 = vcmask 1046528   ;;  %p266_p4 = scmp.lt.s32.totalorder %s2589_s1, 1 }
   0xe   : > { %2480 = vmatpush.msra.mxu1 %v2393_v1  ;;  %2481 = vmatpush.msra.mxu2 %v2393_v1  ;;  %s3800_s25 = smov (!%p255_p3, %s2375_s25), 63  ;;  %v2385_v12 = vld [vmem:[%s3791_s3 + $0x1b0] sm:$0xff]  ;;  %350 = vst [vmem:[#allocation2 + $0x30] sm:$0x1] %v2547_v2  ;;  %v2384_v13 = vld [vmem:[%s3791_s3 + $0x1a8] sm:$0xff]  ;;  %v2383_v14 = vld [vmem:[%s3791_s3 + $0x1a0] sm:$0xff] }
   0xf   : > { %2482 = vmatpush.msra.mxu3 %v2393_v1  ;;  %930 = vmatpush.msra.mxu0 %v2393_v1  ;;  %s2376_s30 = sshll.u32 %s3800_s25, 3  ;;  %351 = vst [vmem:[#allocation2 + $0x60] sm:$0x1] %v2547_v2  ;;  %v2382_v15 = vld [vmem:[%s3791_s3 + $0x198] sm:$0xff]  ;;  %v2381_v16 = vld [vmem:[%s3791_s3 + $0x190] sm:$0xff]  ;;  %v2380_v17 = vld [vmem:[%s3791_s3 + $0x188] sm:$0xff] }
  0x10   : > { %2483 = vmatpush.msra.mxu1 %v2392_v3  ;;  %2484 = vmatpush.msra.mxu2 %v2392_v3  ;;  %s2619_s11 = scalar_lea.vmem %s3788_s0, %s2376_s30  ;;  %352 = vst [vmem:[#allocation2 + $0x90] sm:$0x1] %v2547_v2  ;;  %v2379_v18 = vld [vmem:[%s3791_s3 + $0x180] sm:$0xff]  ;;  %v2426_v20 = vld [vmem:[%s3791_s3 + $0x2f8] sm:$0xff]  ;;  %v2425_v23 = vld [vmem:[%s3791_s3 + $0x2f0] sm:$0xff]  ;;  %s3652_s13 = scalar_lea.vmem %s3792_s4, %s2376_s30 }
  0x11   : > { %2485 = vmatpush.msra.mxu3 %v2392_v3  ;;  %931 = vmatpush.msra.mxu0 %v2392_v3  ;;  %v2622_v6 = vld [vmem:[%s2619_s11 + $0x40] sm:$0xff]  ;;  %353 = vst [vmem:[#allocation2 + $0xc0] sm:$0x1] %v2547_v2  ;;  %v751_v21 = vld [vmem:[%s3791_s3 + $0x78] sm:$0xff]  ;;  %v2683_v22 = vld [vmem:[%s2619_s11 + $0x48] sm:$0xff]  ;;  %s3802_s1 = smov (!%p266_p4, %s2589_s1), 1 }
  0x12   : > { %2486 = vmatpush.msra.mxu1 %v2391_v4  ;;  %2487 = vmatpush.msra.mxu2 %v2391_v4  ;;  %v411_v8 = vrot.slane %v2622_v6, 7  ;;  %326 = vst [vmem:[#allocation2 + $0xf8] sm:$0xff] %v2622_v6  ;;  %v750_v24 = vld [vmem:[%s3791_s3 + $0x70] sm:$0xff]  ;;  %v412_v25 = vrot.slane %v2683_v22, 7  ;;  %v2410_v26 = vld [vmem:[%s3791_s3 + $0x278] sm:$0xff]  ;;  %v2424_v27 = vld [vmem:[%s3791_s3 + $0x2e8] sm:$0xff]  ;;  %s268_s14 = scalar_lea.vmem %s3793_s5, %s3802_s1  ;;  %s271_s17 = scalar_lea.vmem %s3794_s6, %s3802_s1 }
  0x13   : > { %2488 = vmatpush.msra.mxu3 %v2391_v4  ;;  %932 = vmatpush.msra.mxu0 %v2391_v4  ;;  %355 = vst [vmem:[#allocation2 + $0x120] sm:$0x1] %v2547_v2  ;;  %v749_v28 = vld [vmem:[%s3791_s3 + $0x68] sm:$0xff]  ;;  %v767_v29 = vld [vmem:[%s3791_s3 + $0xf8] sm:$0xff]  ;;  %v2409_v30 = vld [vmem:[%s3791_s3 + $0x270] sm:$0xff] }
  0x14   : > { %2489 = vmatpush.msra.mxu1 %v2390_v5  ;;  %2490 = vmatpush.msra.mxu2 %v2390_v5  ;;  %487 = vst [vmem:[#allocation2 + $0xf0] sm:$0xfe] %v411_v8  ;;  %v766_v31 = vld [vmem:[%s3791_s3 + $0xf0] sm:$0xff]  ;;  %v2423_v32 = vld [vmem:[%s3791_s3 + $0x2e0] sm:$0xff]  ;;  %v2726_v34 = vsel %vm398_vm0, %v411_v8, %v412_v25  ;;  %v2408_v37 = vld [vmem:[%s3791_s3 + $0x268] sm:$0xff] }
  0x15   : > { %2491 = vmatpush.msra.mxu3 %v2390_v5  ;;  %933 = vmatpush.msra.mxu0 %v2390_v5  ;;  %356 = vst [vmem:[#allocation2 + $0x150] sm:$0x1] %v2547_v2  ;;  %v748_v33 = vld [vmem:[%s3791_s3 + $0x60] sm:$0xff]  ;;  %v2422_v38 = vld [vmem:[%s3791_s3 + $0x2d8] sm:$0xff]  ;;  %v765_v40 = vld [vmem:[%s3791_s3 + $0xe8] sm:$0xff] }
  0x16   : > { %2492 = vmatpush.msra.mxu1 %v2389_v7  ;;  %2493 = vmatpush.msra.mxu2 %v2389_v7  ;;  %357 = vst [vmem:[#allocation2 + $0x180] sm:$0x1] %v2547_v2  ;;  %v2732_v35 = vld [vmem:[%s2619_s11 + $0x80] sm:$0xff]  ;;  %v747_v39 = vld [vmem:[%s3791_s3 + $0x58] sm:$0xff]  ;;  %v2421_v42 = vld [vmem:[%s3791_s3 + $0x2d0] sm:$0xff] }
  0x17   : > { %2494 = vmatpush.msra.mxu3 %v2389_v7  ;;  %934 = vmatpush.msra.mxu0 %v2389_v7  ;;  %358 = vst [vmem:[#allocation2 + $0x1b0] sm:$0x1] %v2547_v2  ;;  %v2735_v36 = vld [vmem:[%s2619_s11 + $0xc0] sm:$0xff]  ;;  %v423_v43 = vrot.slane %v2732_v35, 7  ;;  %v746_v44 = vld [vmem:[%s3791_s3 + $0x50] sm:$0xff]  ;;  %v2775_v49 = vld [vmem:[%s2619_s11 + $0x88] sm:$0xff] }
  0x18   : > { %2495 = vmatpush.msra.mxu1 %v2388_v9  ;;  %2496 = vmatpush.msra.mxu2 %v2388_v9  ;;  %359 = vst [vmem:[#allocation2 + $0x1e0] sm:$0x1] %v2547_v2  ;;  %v2407_v41 = vld [vmem:[%s3791_s3 + $0x260] sm:$0xff]  ;;  %v435_v47 = vrot.slane %v2735_v36, 7  ;;  %v297_v50 = vld [vmem:[%s2619_s11 + $0xc8] sm:$0xff]  ;;  %v2406_v51 = vld [vmem:[%s3791_s3 + $0x258] sm:$0xff] }
  0x19   : > { %2497 = vmatpush.msra.mxu3 %v2388_v9  ;;  %935 = vmatpush.msra.mxu0 %v2388_v9  ;;  %360 = vst [vmem:[#allocation2 + $0x210] sm:$0x1] %v2547_v2  ;;  %v764_v45 = vld [vmem:[%s3791_s3 + $0xe0] sm:$0xff]  ;;  %v2420_v52 = vld [vmem:[%s3791_s3 + $0x2c8] sm:$0xff]  ;;  %v424_v54 = vrot.slane %v2775_v49, 7  ;;  %v763_v55 = vld [vmem:[%s3791_s3 + $0xd8] sm:$0xff] }
  0x1a   : > { %2498 = vmatpush.msra.mxu1 %v2387_v10  ;;  %2499 = vmatpush.msra.mxu2 %v2387_v10  ;;  %361 = vst [vmem:[#allocation2 + $0x240] sm:$0x1] %v2547_v2  ;;  %v2768_v46 = vld [vmem:[%s2619_s11] sm:$0xff]  ;;  %v745_v53 = vld [vmem:[%s3791_s3 + $0x48] sm:$0xff]  ;;  %v2405_v56 = vld [vmem:[%s3791_s3 + $0x250] sm:$0xff]  ;;  %v436_v61 = vrot.slane %v297_v50, 7 }
  0x1b   : > { %2500 = vmatpush.msra.mxu3 %v2387_v10  ;;  %936 = vmatpush.msra.mxu0 %v2387_v10  ;;  %362 = vst [vmem:[#allocation2 + $0x270] sm:$0x1] %v2547_v2  ;;  %v808_v19 = vld [vmem:[#allocation2 + $0xf0] sm:$0xff]  ;;  %v399_v48 = vrot.slane %v2768_v46, 7  ;;  %v2419_v57 = vld [vmem:[%s3791_s3 + $0x2c0] sm:$0xff]  ;;  %v2800_v58 = vld [vmem:[%s2619_s11 + $0x8] sm:$0xff]  ;;  %v425_v63 = vsel %vm398_vm0, %v423_v43, %v424_v54 }
  0x1c   : > { %2501 = vmatpush.msra.mxu1 %v2386_v11  ;;  %2502 = vmatpush.msra.mxu2 %v2386_v11  ;;  %363 = vst [vmem:[#allocation2 + $0x2a0] sm:$0x1] %v2547_v2  ;;  %v744_v59 = vld [vmem:[%s3791_s3 + $0x40] sm:$0xff]  ;;  %v762_v60 = vld [vmem:[%s3791_s3 + $0xd0] sm:$0xff]  ;;  %v400_v0 = vrot.slane %v2800_v58, 7  ;;  %v437_v4 = vsel %vm398_vm0, %v435_v47, %v436_v61  ;;  %v2404_v9 = vld [vmem:[%s3791_s3 + $0x248] sm:$0xff] }
  0x1d   : > { %2503 = vmatpush.msra.mxu3 %v2386_v11  ;;  %937 = vmatpush.msra.mxu0 %v2386_v11  ;;  %364 = vst [vmem:[#allocation2 + $0x2d0] sm:$0x1] %v2547_v2  ;;  %v2813_v1 = vld [vmem:[%s2619_s11 + $0x50] sm:$0xff]  ;;  %v2418_v10 = vld [vmem:[%s3791_s3 + $0x2b8] sm:$0xff]  ;;  %v2400_v54 = vld [vmem:[%s3791_s3 + $0x228] sm:$0xff] }
  0x1e   : > { %2504 = vmatpush.msra.mxu1 %v2385_v12  ;;  %2505 = vmatpush.msra.mxu2 %v2385_v12  ;;  %365 = vst [vmem:[#allocation2 + $0x300] sm:$0x1] %v2547_v2  ;;  %v2818_v5 = vld [vmem:[%s2619_s11 + $0x90] sm:$0xff]  ;;  %v414_v8 = vrot.slane %v2813_v1, 7  ;;  %v743_v11 = vld [vmem:[%s3791_s3 + $0x38] sm:$0xff]  ;;  %v2399_v61 = vld [vmem:[%s3791_s3 + $0x220] sm:$0xff] }
  0x1f   : > { %2506 = vmatpush.msra.mxu3 %v2385_v12  ;;  %938 = vmatpush.msra.mxu0 %v2385_v12  ;;  %511 = vst [vmem:[#allocation2 + $0x5f] sm:$0x1] %v2547_v2  ;;  %v2821_v7 = vld [vmem:[%s2619_s11 + $0xd0] sm:$0xff]  ;;  %v2865_v25 = vld [vmem:[%s2619_s11 + $0x98] sm:$0xff] }
  0x20   : > { %2507 = vmatpush.msra.mxu1 %v2384_v13  ;;  %2508 = vmatpush.msra.mxu2 %v2384_v13  ;;  %512 = vst [vmem:[#allocation2 + $0x8f] sm:$0x1] %v2547_v2 }
  0x21   : > { %2509 = vmatpush.msra.mxu3 %v2384_v13  ;;  %939 = vmatpush.msra.mxu0 %v2384_v13  ;;  %513 = vst [vmem:[#allocation2 + $0xbf] sm:$0x1] %v2547_v2  ;;  %v2836_v13 = vsel %vm398_vm0, %v399_v48, %v400_v0  ;;  %v738_v0 = vld [vmem:[%s3791_s3 + $0x10] sm:$0xff] }
  0x22   : > { %2510 = vmatpush.msra.mxu1 %v2383_v14  ;;  %2511 = vmatpush.msra.mxu2 %v2383_v14  ;;  %514 = vst [vmem:[#allocation2 + $0xef] sm:$0x1] %v2547_v2 }
  0x23   : > { %2512 = vmatpush.msra.mxu3 %v2383_v14  ;;  %940 = vmatpush.msra.mxu0 %v2383_v14  ;;  %515 = vst [vmem:[#allocation2 + $0x11f] sm:$0x1] %v2547_v2  ;;  %v761_v14 = vld [vmem:[%s3791_s3 + $0xc8] sm:$0xff] }
  0x24   : > { %2513 = vmatpush.msra.mxu1 %v2382_v15  ;;  %2514 = vmatpush.msra.mxu2 %v2382_v15  ;;  %516 = vst [vmem:[#allocation2 + $0x14f] sm:$0x1] %v2547_v2 }
  0x25   : > { %2515 = vmatpush.msra.mxu3 %v2382_v15  ;;  %941 = vmatpush.msra.mxu0 %v2382_v15  ;;  %517 = vst [vmem:[#allocation2 + $0x17f] sm:$0x1] %v2547_v2  ;;  %v2403_v15 = vld [vmem:[%s3791_s3 + $0x240] sm:$0xff] }
  0x26   : > { %2516 = vmatpush.msra.mxu1 %v2381_v16  ;;  %2517 = vmatpush.msra.mxu2 %v2381_v16  ;;  %518 = vst [vmem:[#allocation2 + $0x1af] sm:$0x1] %v2547_v2 }
  0x27   : > { %2518 = vmatpush.msra.mxu3 %v2381_v16  ;;  %942 = vmatpush.msra.mxu0 %v2381_v16  ;;  %519 = vst [vmem:[#allocation2 + $0x1df] sm:$0x1] %v2547_v2  ;;  %v426_v16 = vrot.slane %v2818_v5, 7 }
  0x28   : > { %2519 = vmatpush.msra.mxu1 %v2380_v17  ;;  %2520 = vmatpush.msra.mxu2 %v2380_v17  ;;  %520 = vst [vmem:[#allocation2 + $0x20f] sm:$0x1] %v2547_v2 }
  0x29   : > { %2521 = vmatpush.msra.mxu3 %v2380_v17  ;;  %943 = vmatpush.msra.mxu0 %v2380_v17  ;;  %521 = vst [vmem:[#allocation2 + $0x23f] sm:$0x1] %v2547_v2  ;;  %v2417_v17 = vld [vmem:[%s3791_s3 + $0x2b0] sm:$0xff] }
  0x2a   : > { %2522 = vmatpush.msra.mxu1 %v2379_v18  ;;  %2523 = vmatpush.msra.mxu2 %v2379_v18  ;;  %522 = vst [vmem:[#allocation2 + $0x26f] sm:$0x1] %v2547_v2 }
  0x2b   : > { %2524 = vmatpush.msra.mxu3 %v2379_v18  ;;  %969 = vmatmul.f32.vlgmr.msra.gmra.mxu1 %v808_v19  ;;  %523 = vst [vmem:[#allocation2 + $0x29f] sm:$0x1] %v2547_v2  ;;  %v760_v19 = vld [vmem:[%s3791_s3 + $0xc0] sm:$0xff] }
  0x2c   : > { %1155 = vmatpush.msrb.mxu2 %v2426_v20  ;;  %944 = vmatpush.msra.mxu0 %v2379_v18  ;;  %524 = vst [vmem:[#allocation2 + $0x2cf] sm:$0x1] %v2547_v2  ;;  %v742_v18 = vld [vmem:[%s3791_s3 + $0x30] sm:$0xff] }
  0x2d   : > { %1268 = vmatpush.msrb.mxu3 %v751_v21  ;;  %1042 = vmatpush.msrb.mxu1 %v2410_v26  ;;  %525 = vst [vmem:[#allocation2 + $0x2ff] sm:$0x1] %v2547_v2  ;;  %v2856_v20 = vld [vmem:[%s2619_s11 + $0x10] sm:$0xff]  ;;  %v438_v21 = vrot.slane %v2821_v7, 7 }
  0x2e   : > { %1156 = vmatpush.msrb.mxu2 %v2425_v23  ;;  %1381 = vmatpush.msrb.mxu0 %v767_v29  ;;  %526 = vst [vmem:[#allocation2 + $0x32f] sm:$0x1] %v2547_v2  ;;  %v2860_v23 = vld [vmem:[%s2619_s11 + $0x58] sm:$0xff]  ;;  %v2416_v29 = vld [vmem:[%s3791_s3 + $0x2a8] sm:$0xff] }
  0x2f   : > { %1269 = vmatpush.msrb.mxu3 %v750_v24  ;;  %1043 = vmatpush.msrb.mxu1 %v2409_v30  ;;  %495 = vst [vmem:[#allocation2 + $0x1b0] sm:$0xfe] %v423_v43  ;;  %v402_v24 = vrot.slane %v2856_v20, 7  ;;  %v415_v26 = vrot.slane %v2860_v23, 7  ;;  %v741_v30 = vld [vmem:[%s3791_s3 + $0x28] sm:$0xff] }
  0x30   : > { %1157 = vmatpush.msrb.mxu2 %v2424_v27  ;;  %1382 = vmatpush.msrb.mxu0 %v766_v31  ;;  %334 = vst [vmem:[#allocation2 + $0x1b8] sm:$0xff] %v2732_v35  ;;  %v2870_v27 = vld [vmem:[%s2619_s11 + $0xd8] sm:$0xff]  ;;  %v427_v31 = vrot.slane %v2865_v25, 7 }
  0x31   : > { %1270 = vmatpush.msrb.mxu3 %v749_v28  ;;  %1044 = vmatpush.msrb.mxu1 %v2408_v37  ;;  %503 = vst [vmem:[#allocation2 + $0x270] sm:$0xfe] %v435_v47  ;;  %v2402_v28 = vld [vmem:[%s3791_s3 + $0x238] sm:$0xff]  ;;  %v2915_v47 = vld [vmem:[%s2619_s11 + $0x60] sm:$0xff] }
  0x32   : > { %1158 = vmatpush.msrb.mxu2 %v2423_v32  ;;  %1383 = vmatpush.msrb.mxu0 %v765_v40  ;;  %342 = vst [vmem:[#allocation2 + $0x278] sm:$0xff] %v2735_v36  ;;  %v759_v32 = vld [vmem:[%s3791_s3 + $0xb8] sm:$0xff]  ;;  %v2415_v36 = vld [vmem:[%s3791_s3 + $0x2a0] sm:$0xff] }
  0x33   : > { %1271 = vmatpush.msrb.mxu3 %v748_v33  ;;  %972 = vmatmul.f32.gmra.mxu1 %v2726_v34  ;;  %479 = vst [vmem:[#allocation2 + $0x30] sm:$0xfe] %v399_v48  ;;  %v2401_v33 = vld [vmem:[%s3791_s3 + $0x230] sm:$0xff]  ;;  %v2894_v37 = vld [vmem:[%s2619_s11 + $0x18] sm:$0xff] }
  0x34   : > { %1159 = vmatpush.msrb.mxu2 %v2422_v38  ;;  %1045 = vmatpush.msrb.mxu1 %v2407_v41  ;;  %488 = vst [vmem:[#allocation2 + $0x108] sm:$0xff] %v2726_v34  ;;  %v740_v38 = vld [vmem:[%s3791_s3 + $0x20] sm:$0xff]  ;;  %v2906_v41 = vsel %vm398_vm0, %v414_v8, %v415_v26  ;;  %v3000_v26 = vld [vmem:[%s2619_s11 + $0x28] sm:$0xff] }
  0x35   : > { %1272 = vmatpush.msrb.mxu3 %v747_v39  ;;  %1384 = vmatpush.msrb.mxu0 %v764_v45  ;;  %327 = vst [vmem:[#allocation2 + $0x110] sm:$0xff] %v2683_v22  ;;  %v758_v39 = vld [vmem:[%s3791_s3 + $0xb0] sm:$0xff]  ;;  %v403_v45 = vrot.slane %v2894_v37, 7 }
  0x36   : > { %1160 = vmatpush.msrb.mxu2 %v2421_v42  ;;  %1046 = vmatpush.msrb.mxu1 %v2406_v51  ;;  %v832_v62 = vld [vmem:[#allocation2 + $0x1b0] sm:$0xff]  ;;  %496 = vst [vmem:[#allocation2 + $0x1c8] sm:$0xff] %v425_v63  ;;  %v439_v42 = vrot.slane %v2870_v27, 7  ;;  %v2920_v51 = vld [vmem:[%s2619_s11 + $0xa0] sm:$0xff] }
  0x37   : > { %1273 = vmatpush.msrb.mxu3 %v746_v44  ;;  %1385 = vmatpush.msrb.mxu0 %v763_v55  ;;  %335 = vst [vmem:[#allocation2 + $0x1d0] sm:$0xff] %v2775_v49  ;;  %v428_v44 = vsel %vm398_vm0, %v426_v16, %v427_v31  ;;  %v2414_v55 = vld [vmem:[%s3791_s3 + $0x298] sm:$0xff] }
  0x38   : > { %1161 = vmatpush.msrb.mxu2 %v2420_v52  ;;  %1047 = vmatpush.msrb.mxu1 %v2405_v56  ;;  %v856_v3 = vld [vmem:[#allocation2 + $0x270] sm:$0xff]  ;;  %504 = vst [vmem:[#allocation2 + $0x288] sm:$0xff] %v437_v4  ;;  %v2923_v52 = vld [vmem:[%s2619_s11 + $0xe0] sm:$0xff]  ;;  %v739_v56 = vld [vmem:[%s3791_s3 + $0x18] sm:$0xff] }
  0x39   : > { %1274 = vmatpush.msrb.mxu3 %v745_v53  ;;  %1386 = vmatpush.msrb.mxu0 %v762_v60  ;;  %343 = vst [vmem:[#allocation2 + $0x290] sm:$0xff] %v297_v50  ;;  %v440_v50 = vsel %vm398_vm0, %v438_v21, %v439_v42  ;;  %v417_v53 = vrot.slane %v2915_v47, 7  ;;  %v757_v60 = vld [vmem:[%s3791_s3 + $0xa8] sm:$0xff]  ;;  %v3024_v42 = vld [vmem:[%s2619_s11 + $0x70] sm:$0xff] }
  0x3a   : > { %1162 = vmatpush.msrb.mxu2 %v2419_v57  ;;  %1017 = vmatmul.f32.vlgmr.msra.gmra.mxu3 %v856_v3  ;;  %v2833_v12 = vld [vmem:[#allocation2 + $0x30] sm:$0xff]  ;;  %489 = vst [vmem:[#allocation2 + $0x120] sm:$0xfe] %v414_v8  ;;  %v756_v3 = vld [vmem:[%s3791_s3 + $0xa0] sm:$0xff]  ;;  %v2966_v8 = vld [vmem:[%s2619_s11 + $0x68] sm:$0xff] }
  0x3b   : > { %1275 = vmatpush.msrb.mxu3 %v744_v59  ;;  %993 = vmatmul.f32.vlgmr.msra.gmra.mxu2 %v832_v62  ;;  %328 = vst [vmem:[#allocation2 + $0x128] sm:$0xff] %v2813_v1  ;;  %v2939_v59 = vsel %vm398_vm0, %v402_v24, %v403_v45  ;;  %v429_v62 = vrot.slane %v2920_v51, 7 }
  0x3c   : > { %1048 = vmatpush.msrb.mxu1 %v2404_v9  ;;  %1163 = vmatpush.msrb.mxu2 %v2418_v10  ;;  %497 = vst [vmem:[#allocation2 + $0x1e0] sm:$0xfe] %v426_v16  ;;  %v2971_v10 = vld [vmem:[%s2619_s11 + $0xa8] sm:$0xff] }
  0x3d   : > { %945 = vmatmul.f32.vlgmr.msra.gmra.mxu0 %v2833_v12  ;;  %1276 = vmatpush.msrb.mxu3 %v743_v11  ;;  %336 = vst [vmem:[#allocation2 + $0x1e8] sm:$0xff] %v2818_v5  ;;  %v418_v11 = vrot.slane %v2966_v8, 7  ;;  %v2412_v16 = vld [vmem:[%s3791_s3 + $0x288] sm:$0xff] }
  0x3e   : > { %1387 = vmatpush.msrb.mxu0 %v761_v14  ;;  %1049 = vmatpush.msrb.mxu1 %v2403_v15  ;;  %505 = vst [vmem:[#allocation2 + $0x2a0] sm:$0xfe] %v438_v21  ;;  %v2976_v14 = vld [vmem:[%s2619_s11 + $0xe8] sm:$0xff]  ;;  %v2398_v15 = vld [vmem:[%s3791_s3 + $0x218] sm:$0xff]  ;;  %v2397_v21 = vld [vmem:[%s3791_s3 + $0x210] sm:$0xff] }
  0x3f   : > { %1164 = vmatpush.msrb.mxu2 %v2417_v17  ;;  %1277 = vmatpush.msrb.mxu3 %v742_v18  ;;  %344 = vst [vmem:[#allocation2 + $0x2a8] sm:$0xff] %v2821_v7  ;;  %v441_v7 = vrot.slane %v2923_v52, 7  ;;  %v737_v17 = vld [vmem:[%s3791_s3 + $0x8] sm:$0xff]  ;;  %v430_v18 = vrot.slane %v2971_v10, 7  ;;  %v3012_v31 = vsel %vm398_vm0, %v417_v53, %v418_v11  ;;  %v3071_v11 = vld [vmem:[%s2619_s11 + $0xb8] sm:$0xff] }
  0x40   : > { %1388 = vmatpush.msrb.mxu0 %v760_v19  ;;  %1050 = vmatpush.msrb.mxu1 %v2402_v28  ;;  %481 = vst [vmem:[#allocation2 + $0x60] sm:$0xfe] %v402_v24  ;;  %v755_v19 = vld [vmem:[%s3791_s3 + $0x98] sm:$0xff]  ;;  %v2411_v24 = vld [vmem:[%s3791_s3 + $0x280] sm:$0xff] }
  0x41   : > { %1165 = vmatpush.msrb.mxu2 %v2416_v29  ;;  %1278 = vmatpush.msrb.mxu3 %v741_v30  ;;  %v2902_v40 = vld [vmem:[#allocation2 + $0x120] sm:$0xff]  ;;  %320 = vst [vmem:[#allocation2 + $0x68] sm:$0xff] %v2856_v20  ;;  %v754_v29 = vld [vmem:[%s3791_s3 + $0x90] sm:$0xff] }
  0x42   : > { %1020 = vmatmul.f32.gmra.mxu3 %v437_v4  ;;  %1389 = vmatpush.msrb.mxu0 %v759_v32  ;;  %490 = vst [vmem:[#allocation2 + $0x138] sm:$0xff] %v2906_v41  ;;  %v2961_v4 = vld [vmem:[%s2619_s11 + $0x20] sm:$0xff]  ;;  %v442_v32 = vrot.slane %v2976_v14, 7 }
  0x43   : > { %996 = vmatmul.f32.gmra.mxu2 %v425_v63  ;;  %1051 = vmatpush.msrb.mxu1 %v2401_v33  ;;  %v838_v43 = vld [vmem:[#allocation2 + $0x1e0] sm:$0xff]  ;;  %329 = vst [vmem:[#allocation2 + $0x140] sm:$0xff] %v2860_v23  ;;  %v2413_v63 = vld [vmem:[%s3791_s3 + $0x290] sm:$0xff]  ;;  %v405_v9 = vrot.slane %v2961_v4, 7  ;;  %v2396_v33 = vld [vmem:[%s3791_s3 + $0x208] sm:$0xff] }
  0x44   : > { %975 = vmatmul.f32.gmra.mxu1 %v2902_v40  ;;  %1166 = vmatpush.msrb.mxu2 %v2415_v36  ;;  %498 = vst [vmem:[#allocation2 + $0x1f8] sm:$0xff] %v428_v44  ;;  %v736_v28 = vld [vmem:[%s3791_s3] sm:$0xff]  ;;  %v443_v45 = vsel %vm398_vm0, %v441_v7, %v442_v32 }
  0x45   : > { %948 = vmatmul.f32.gmra.mxu0 %v2836_v13  ;;  %1279 = vmatpush.msrb.mxu3 %v740_v38  ;;  %v862_v48 = vld [vmem:[#allocation2 + $0x2a0] sm:$0xff]  ;;  %337 = vst [vmem:[#allocation2 + $0x200] sm:$0xff] %v2865_v25  ;;  %v431_v38 = vsel %vm398_vm0, %v429_v62, %v430_v18  ;;  %v2474_v18 = vld [vmem:[%s3791_s3 + $0x478] sm:$0xff] }
  0x46   : > { %1390 = vmatpush.msrb.mxu0 %v758_v39  ;;  %506 = vst [vmem:[#allocation2 + $0x2b8] sm:$0xff] %v440_v50  ;;  %1052 = vmatpush.msrb.mxu1 %v2400_v54  ;;  %v406_v39 = vrot.slane %v3000_v26, 7  ;;  %v2442_v54 = vld [vmem:[%s3791_s3 + $0x378] sm:$0xff] }
  0x47   : > { %v2935_v57 = vld [vmem:[#allocation2 + $0x60] sm:$0xff]  ;;  %345 = vst [vmem:[#allocation2 + $0x2c0] sm:$0xff] %v2870_v27  ;;  %1167 = vmatpush.msrb.mxu2 %v2414_v55  ;;  %1280 = vmatpush.msrb.mxu3 %v739_v56  ;;  %v2458_v55 = vld [vmem:[%s3791_s3 + $0x3f8] sm:$0xff] }
  0x48   : > { %482 = vst [vmem:[#allocation2 + $0x78] sm:$0xff] %v2939_v59  ;;  %1391 = vmatpush.msrb.mxu0 %v757_v60  ;;  %1053 = vmatpush.msrb.mxu1 %v2399_v61  ;;  %v3048_v60 = vsel %vm398_vm0, %v405_v9, %v406_v39  ;;  %v3051_v61 = vld [vmem:[%s2619_s11 + $0xf0] sm:$0xff] }
  0x49   : > { %321 = vst [vmem:[#allocation2 + $0x80] sm:$0xff] %v2894_v37  ;;  %1168 = vmatpush.msrb.mxu2 %v2413_v63  ;;  %1281 = vmatpush.msrb.mxu3 %v738_v0  ;;  %v3061_v0 = vld [vmem:[%s2619_s11 + $0x30] sm:$0xff] }
  0x4a   : > { %1023 = vmatmul.f32.gmra.mxu3 %v862_v48  ;;  %491 = vst [vmem:[#allocation2 + $0x150] sm:$0xfe] %v417_v53  ;;  %1392 = vmatpush.msrb.mxu0 %v756_v3  ;;  %v3032_v48 = vld [vmem:[%s2619_s11 + $0xb0] sm:$0xff]  ;;  %v753_v53 = vld [vmem:[%s3791_s3 + $0x88] sm:$0xff]  ;;  %v444_v3 = vrot.slane %v3051_v61, 7 }
  0x4b   : > { %999 = vmatmul.f32.gmra.mxu2 %v838_v43  ;;  %330 = vst [vmem:[#allocation2 + $0x158] sm:$0xff] %v2915_v47  ;;  %1054 = vmatpush.msrb.mxu1 %v2398_v15  ;;  %v2395_v43 = vld [vmem:[%s3791_s3 + $0x200] sm:$0xff]  ;;  %v432_v63 = vrot.slane %v3032_v48, 7 }
  0x4c   : > { %978 = vmatmul.f32.gmra.mxu1 %v2906_v41  ;;  %499 = vst [vmem:[#allocation2 + $0x210] sm:$0xfe] %v429_v62  ;;  %1169 = vmatpush.msrb.mxu2 %v2412_v16  ;;  %v752_v62 = vld [vmem:[%s3791_s3 + $0x80] sm:$0xff]  ;;  %v3076_v16 = vld [vmem:[%s2619_s11 + $0xf8] sm:$0xff] }
  0x4d   : > { %951 = vmatmul.f32.gmra.mxu0 %v2935_v57  ;;  %338 = vst [vmem:[#allocation2 + $0x218] sm:$0xff] %v2920_v51  ;;  %1282 = vmatpush.msrb.mxu3 %v737_v17  ;;  %v783_v17 = vld [vmem:[%s3791_s3 + $0x178] sm:$0xff] }
  0x4e   : > { %507 = vst [vmem:[#allocation2 + $0x2d0] sm:$0xfe] %v441_v7  ;;  %1393 = vmatpush.msrb.mxu0 %v755_v19  ;;  %1055 = vmatpush.msrb.mxu1 %v2397_v21  ;;  %v3066_v7 = vld [vmem:[%s2619_s11 + $0x78] sm:$0xff]  ;;  %v433_v19 = vrot.slane %v3071_v11, 7 }
  0x4f   : > { %346 = vst [vmem:[#allocation2 + $0x2d8] sm:$0xff] %v2923_v52  ;;  %1170 = vmatpush.msrb.mxu2 %v2411_v24  ;;  %1283 = vmatpush.msrb.mxu3 %v736_v28  ;;  %v421_v15 = vrot.slane %v3066_v7, 7  ;;  %v3088_v21 = vld [vmem:[%s2619_s11 + $0x38] sm:$0xff] }
  0x50   : > { %483 = vst [vmem:[#allocation2 + $0x90] sm:$0xfe] %v405_v9  ;;  %1394 = vmatpush.msrb.mxu0 %v754_v29  ;;  %1056 = vmatpush.msrb.mxu1 %v2396_v33  ;;  %v408_v9 = vrot.slane %v3061_v0, 7  ;;  %v445_v29 = vrot.slane %v3076_v16, 7  ;;  %v434_v33 = vsel %vm398_vm0, %v432_v63, %v433_v19 }
  0x51   : > { %v3008_v30 = vld [vmem:[#allocation2 + $0x150] sm:$0xff]  ;;  %322 = vst [vmem:[#allocation2 + $0x98] sm:$0xff] %v2961_v4  ;;  %1753 = vmatpush.msra.mxu2 %v2442_v54  ;;  %1866 = vmatpush.msra.mxu3 %v2458_v55  ;;  %v531_v55 = vrot.slane %v2856_v20, 1 }
  0x52   : > { %1026 = vmatmul.f32.gmra.mxu3 %v440_v50  ;;  %492 = vst [vmem:[#allocation2 + $0x168] sm:$0xff] %v3012_v31  ;;  %v420_v50 = vrot.slane %v3024_v42, 7  ;;  %1057 = vmatpush.msrb.mxu1 %v2395_v43  ;;  %v446_v39 = vsel %vm398_vm0, %v444_v3, %v445_v29  ;;  %v528_v43 = vrot.slane %v2768_v46, 1  ;;  %v2440_v29 = vld [vmem:[%s3791_s3 + $0x368] sm:$0xff] }
  0x53   : > { %1002 = vmatmul.f32.gmra.mxu2 %v428_v44  ;;  %v844_v36 = vld [vmem:[#allocation2 + $0x210] sm:$0xff]  ;;  %331 = vst [vmem:[#allocation2 + $0x170] sm:$0xff] %v2966_v8  ;;  %1395 = vmatpush.msrb.mxu0 %v753_v53 }
  0x54   : > { %981 = vmatmul.f32.gmra.mxu1 %v3008_v30  ;;  %500 = vst [vmem:[#allocation2 + $0x228] sm:$0xff] %v431_v38  ;;  %v3094_v28 = vsel %vm398_vm0, %v420_v50, %v421_v15  ;;  %v2473_v15 = vld [vmem:[%s3791_s3 + $0x470] sm:$0xff] }
  0x55   : > { %954 = vmatmul.f32.gmra.mxu0 %v2939_v59  ;;  %v868_v44 = vld [vmem:[#allocation2 + $0x2d0] sm:$0xff]  ;;  %339 = vst [vmem:[#allocation2 + $0x230] sm:$0xff] %v2971_v10  ;;  %1494 = vmatpush.msra.mxu1 %v783_v17  ;;  %v534_v17 = vrot.slane %v2961_v4, 1 }
  0x56   : > { %508 = vst [vmem:[#allocation2 + $0x2e8] sm:$0xff] %v443_v45  ;;  %1396 = vmatpush.msrb.mxu0 %v752_v62  ;;  %v532_v62 = vrot.slane %v2894_v37, 1 }
  0x57   : > { %v3044_v56 = vld [vmem:[#allocation2 + $0x90] sm:$0xff]  ;;  %347 = vst [vmem:[#allocation2 + $0x2f0] sm:$0xff] %v2976_v14 }
  0x58   : > { %484 = vst [vmem:[#allocation2 + $0xa8] sm:$0xff] %v3048_v60  ;;  %1979 = vmatpush.msra.mxu0 %v2474_v18  ;;  %v535_v18 = vrot.slane %v3000_v26, 1 }
  0x59   : > { %323 = vst [vmem:[#allocation2 + $0xb0] sm:$0xff] %v3000_v26 }
  0x5a   : > { %1029 = vmatmul.f32.gmra.mxu3 %v868_v44  ;;  %493 = vst [vmem:[#allocation2 + $0x180] sm:$0xfe] %v420_v50  ;;  %v529_v44 = vrot.slane %v2800_v58, 1  ;;  %v2457_v50 = vld [vmem:[%s3791_s3 + $0x3f0] sm:$0xff]  ;;  %1980 = vmatpush.msra.mxu0 %v2473_v15  ;;  %v536_v19 = vsel %vm527_vm1, %v534_v17, %v535_v18  ;;  %v544_v15 = vrot.slane %v2860_v23, 1 }
  0x5b   : > { %1005 = vmatmul.f32.gmra.mxu2 %v844_v36  ;;  %332 = vst [vmem:[#allocation2 + $0x188] sm:$0xff] %v3024_v42  ;;  %v409_v36 = vrot.slane %v3088_v21, 7  ;;  %1867 = vmatpush.msra.mxu3 %v2457_v50  ;;  %v2437_v17 = vld [vmem:[%s3791_s3 + $0x350] sm:$0xff] }
  0x5c   : > { %984 = vmatmul.f32.gmra.mxu1 %v3012_v31  ;;  %501 = vst [vmem:[#allocation2 + $0x240] sm:$0xfe] %v432_v63  ;;  %v530_v63 = vsel %vm527_vm1, %v528_v43, %v529_v44  ;;  %v538_v43 = vrot.slane %v3088_v21, 1 }
  0x5d   : > { %957 = vmatmul.f32.gmra.mxu0 %v3044_v56  ;;  %340 = vst [vmem:[#allocation2 + $0x248] sm:$0xff] %v3032_v48  ;;  %v3116_v54 = vsel %vm398_vm0, %v408_v9, %v409_v36  ;;  %v781_v36 = vld [vmem:[%s3791_s3 + $0x168] sm:$0xff] }
  0x5e   : > { %509 = vst [vmem:[#allocation2 + $0x300] sm:$0xfe] %v444_v3  ;;  %v533_v3 = vsel %vm527_vm1, %v531_v55, %v532_v62  ;;  %v2471_v55 = vld [vmem:[%s3791_s3 + $0x460] sm:$0xff] }
  0x5f   : > { %348 = vst [vmem:[#allocation2 + $0x308] sm:$0xff] %v3051_v61 }
  0x60   : > { %485 = vst [vmem:[#allocation2 + $0xc0] sm:$0xfe] %v408_v9  ;;  %v782_v9 = vld [vmem:[%s3791_s3 + $0x170] sm:$0xff] }
  0x61   : > { %v3090_v24 = vld [vmem:[#allocation2 + $0x180] sm:$0xff]  ;;  %324 = vst [vmem:[#allocation2 + $0xc8] sm:$0xff] %v3061_v0  ;;  %1495 = vmatpush.msra.mxu1 %v782_v9  ;;  %v2470_v9 = vld [vmem:[%s3791_s3 + $0x458] sm:$0xff] }
  0x62   : > { %1032 = vmatmul.f32.gmra.mxu3 %v443_v45  ;;  %494 = vst [vmem:[#allocation2 + $0x198] sm:$0xff] %v3094_v28  ;;  %v2441_v45 = vld [vmem:[%s3791_s3 + $0x370] sm:$0xff] }
  0x63   : > { %1008 = vmatmul.f32.gmra.mxu2 %v431_v38  ;;  %v850_v32 = vld [vmem:[#allocation2 + $0x240] sm:$0xff]  ;;  %333 = vst [vmem:[#allocation2 + $0x1a0] sm:$0xff] %v3066_v7  ;;  %1496 = vmatpush.msra.mxu1 %v781_v36 }
  0x64   : > { %987 = vmatmul.f32.gmra.mxu1 %v3090_v24  ;;  %502 = vst [vmem:[#allocation2 + $0x258] sm:$0xff] %v434_v33  ;;  %1754 = vmatpush.msra.mxu2 %v2441_v45  ;;  %v2439_v45 = vld [vmem:[%s3791_s3 + $0x360] sm:$0xff] }
  0x65   : > { %960 = vmatmul.f32.gmra.mxu0 %v3048_v60  ;;  %v874_v38 = vld [vmem:[#allocation2 + $0x300] sm:$0xff]  ;;  %341 = vst [vmem:[#allocation2 + $0x260] sm:$0xff] %v3071_v11 }
  0x66   : > { %510 = vst [vmem:[#allocation2 + $0x318] sm:$0xff] %v446_v39  ;;  %1755 = vmatpush.msra.mxu2 %v2440_v29  ;;  %v2469_v29 = vld [vmem:[%s3791_s3 + $0x450] sm:$0xff] }
  0x67   : > { %v3112_v53 = vld [vmem:[#allocation2 + $0xc0] sm:$0xff]  ;;  %349 = vst [vmem:[#allocation2 + $0x320] sm:$0xff] %v3076_v16 }
  0x68   : > { %486 = vst [vmem:[#allocation2 + $0xd8] sm:$0xff] %v3116_v54  ;;  %1756 = vmatpush.msra.mxu2 %v2439_v45  ;;  %v2468_v45 = vld [vmem:[%s3791_s3 + $0x448] sm:$0xff] }
  0x69   : > { %325 = vst [vmem:[#allocation2 + $0xe0] sm:$0xff] %v3088_v21 }
  0x6a   : > { %1035 = vmatmul.f32.gmra.mxu3 %v874_v38  ;;  %608 = vst [vmem:[#allocation2 + $0x40] sm:$0xff] %v530_v63  ;;  %v2472_v38 = vld [vmem:[%s3791_s3 + $0x468] sm:$0xff] }
  0x6b   : > { %1011 = vmatmul.f32.gmra.mxu2 %v850_v32  ;;  %609 = vst [vmem:[#allocation2 + $0x58] sm:$0x7f] %v529_v44  ;;  %v2456_v32 = vld [vmem:[%s3791_s3 + $0x3e8] sm:$0xff]  ;;  %1981 = vmatpush.msra.mxu0 %v2472_v38 }
  0x6c   : > { %990 = vmatmul.f32.gmra.mxu1 %v3094_v28  ;;  %610 = vst [vmem:[#allocation2 + $0x70] sm:$0xff] %v533_v3  ;;  %1868 = vmatpush.msra.mxu3 %v2456_v32  ;;  %v547_v32 = vrot.slane %v2966_v8, 1 }
  0x6d   : > { %963 = vmatmul.f32.gmra.mxu0 %v3112_v53  ;;  %611 = vst [vmem:[#allocation2 + $0x88] sm:$0x7f] %v532_v62  ;;  %v541_v62 = vrot.slane %v2683_v22, 1 }
  0x6e   : > { %613 = vst [vmem:[#allocation2 + $0xb8] sm:$0x7f] %v535_v18  ;;  %1982 = vmatpush.msra.mxu0 %v2471_v55  ;;  %v670_v55 = vld [vmem:[#allocation2 + $0xf0] sm:$0xff] }
  0x6f   : > { %612 = vst [vmem:[#allocation2 + $0xa0] sm:$0xff] %v536_v19 }
  0x70   : > { %615 = vst [vmem:[#allocation2 + $0xe8] sm:$0x7f] %v538_v43  ;;  %1983 = vmatpush.msra.mxu0 %v2470_v9 }
  0x71   : > { %617 = vst [vmem:[#allocation2 + $0x118] sm:$0x7f] %v541_v62 }
  0x72   : > { %1038 = vmatmul.f32.gmra.mxu3 %v446_v39  ;;  %v537_v39 = vrot.slane %v3061_v0, 1  ;;  %619 = vst [vmem:[#allocation2 + $0x148] sm:$0x7f] %v544_v15  ;;  %1984 = vmatpush.msra.mxu0 %v2469_v29 }
  0x73   : > { %1014 = vmatmul.f32.gmra.mxu2 %v434_v33  ;;  %v789_v33 = vld [vmem:[#allocation2 + $0x58] sm:$0xff]  ;;  %621 = vst [vmem:[#allocation2 + $0x178] sm:$0x7f] %v547_v32 }
  0x74   : > { %1058 = vmatmul.f32.vlgmr.msrb.gmra.mxu1 %v2768_v46  ;;  %v539_v44 = vsel %vm527_vm1, %v537_v39, %v538_v43  ;;  %v795_v50 = vld [vmem:[#allocation2 + $0x88] sm:$0xff]  ;;  %1985 = vmatpush.msra.mxu0 %v2468_v45 }
  0x75   : > { %966 = vmatmul.f32.gmra.mxu0 %v3116_v54  ;;  %614 = vst [vmem:[#allocation2 + $0xd0] sm:$0xff] %v539_v44 }
  0x77   : > { %v807_v18 = vld [vmem:[#allocation2 + $0xe8] sm:$0xff] }
  0x78   : > { %v813_v43 = vld [vmem:[#allocation2 + $0x118] sm:$0xff] }
  0x79   : > { %v819_v9 = vld [vmem:[#allocation2 + $0x148] sm:$0xff] }
  0x7a   : > { %1284 = vmatmul.f32.vlgmr.msrb.gmra.mxu3 %v2547_v2 }
  0x7b   : > { %1171 = vmatmul.f32.vlgmr.msrb.gmra.mxu2 %v530_v63  ;;  %v2438_v63 = vld [vmem:[%s3791_s3 + $0x358] sm:$0xff] }
  0x7c   : > { %1061 = vmatmul.f32.gmra.mxu1 %v2800_v58  ;;  %1757 = vmatpush.msra.mxu2 %v2438_v63  ;;  %v2451_v63 = vld [vmem:[%s3791_s3 + $0x3c0] sm:$0xff] }
  0x7d   : > { %1397 = vmatmul.f32.vlgmr.msrb.gmra.mxu0 %v2547_v2 }
  0x7e   : > { %1758 = vmatpush.msra.mxu2 %v2437_v17 }
  0x82   : > { %1287 = vmatmul.f32.gmra.mxu3 %v2547_v2 }
  0x83   : > { %1174 = vmatmul.f32.gmra.mxu2 %v789_v33 }
  0x84   : > { %1064 = vmatmul.f32.gmra.mxu1 %v2856_v20 }
  0x85   : > { %1400 = vmatmul.f32.gmra.mxu0 %v2547_v2  ;;  %v2455_v2 = vld [vmem:[%s3791_s3 + $0x3e0] sm:$0xff] }
  0x86   : > { %1869 = vmatpush.msra.mxu3 %v2455_v2 }
  0x8a   : > { %1290 = vmatmul.f32.gmra.mxu3 %v2833_v12  ;;  %v780_v12 = vld [vmem:[%s3791_s3 + $0x160] sm:$0xff] }
  0x8b   : > { %1177 = vmatmul.f32.gmra.mxu2 %v533_v3  ;;  %1497 = vmatpush.msra.mxu1 %v780_v12  ;;  %v801_v3 = vld [vmem:[#allocation2 + $0xb8] sm:$0xff]  ;;  %v550_v12 = vrot.slane %v3066_v7, 1 }
  0x8c   : > { %1067 = vmatmul.f32.gmra.mxu1 %v2894_v37 }
  0x8d   : > { %1403 = vmatmul.f32.gmra.mxu0 %v2768_v46  ;;  %v540_v46 = vrot.slane %v2622_v6, 1  ;;  %623 = vst [vmem:[#allocation2 + $0x1a8] sm:$0x7f] %v550_v12 }
  0x92   : > { %1293 = vmatmul.f32.gmra.mxu3 %v2836_v13  ;;  %v542_v13 = vsel %vm527_vm1, %v540_v46, %v541_v62 }
  0x93   : > { %1180 = vmatmul.f32.gmra.mxu2 %v795_v50  ;;  %616 = vst [vmem:[#allocation2 + $0x100] sm:$0xff] %v542_v13 }
  0x94   : > { %1070 = vmatmul.f32.gmra.mxu1 %v2961_v4 }
  0x95   : > { %1406 = vmatmul.f32.gmra.mxu0 %v2800_v58  ;;  %v2454_v58 = vld [vmem:[%s3791_s3 + $0x3d8] sm:$0xff] }
  0x96   : > { %1870 = vmatpush.msra.mxu3 %v2454_v58 }
  0x9a   : > { %1296 = vmatmul.f32.gmra.mxu3 %v2935_v57  ;;  %v779_v57 = vld [vmem:[%s3791_s3 + $0x158] sm:$0xff] }
  0x9b   : > { %1183 = vmatmul.f32.gmra.mxu2 %v536_v19  ;;  %1498 = vmatpush.msra.mxu1 %v779_v57 }
  0x9c   : > { %1073 = vmatmul.f32.gmra.mxu1 %v3000_v26 }
  0x9d   : > { %1409 = vmatmul.f32.gmra.mxu0 %v2856_v20  ;;  %v543_v20 = vrot.slane %v2813_v1, 1 }
  0xa2   : > { %1299 = vmatmul.f32.gmra.mxu3 %v2939_v59  ;;  %v545_v59 = vsel %vm527_vm1, %v543_v20, %v544_v15  ;;  %v776_v15 = vld [vmem:[%s3791_s3 + $0x140] sm:$0xff] }
  0xa3   : > { %1186 = vmatmul.f32.gmra.mxu2 %v801_v3  ;;  %618 = vst [vmem:[#allocation2 + $0x130] sm:$0xff] %v545_v59 }
  0xa4   : > { %1076 = vmatmul.f32.gmra.mxu1 %v3061_v0 }
  0xa5   : > { %1412 = vmatmul.f32.gmra.mxu0 %v2894_v37  ;;  %v2453_v37 = vld [vmem:[%s3791_s3 + $0x3d0] sm:$0xff] }
  0xa6   : > { %1871 = vmatpush.msra.mxu3 %v2453_v37 }
  0xa8   : > { %v3209_v19 = vpop.f32.mrf.mxu1 }
  0xaa   : > { %1302 = vmatmul.f32.gmra.mxu3 %v3044_v56  ;;  %v778_v56 = vld [vmem:[%s3791_s3 + $0x150] sm:$0xff] }
  0xab   : > { %1189 = vmatmul.f32.gmra.mxu2 %v539_v44  ;;  %1499 = vmatpush.msra.mxu1 %v778_v56  ;;  %v777_v44 = vld [vmem:[%s3791_s3 + $0x148] sm:$0xff]  ;;  %v553_v56 = vrot.slane %v2775_v49, 1 }
  0xac   : > { %1079 = vmatmul.f32.gmra.mxu1 %v3088_v21 }
  0xad   : > { %1415 = vmatmul.f32.gmra.mxu0 %v2961_v4  ;;  %v546_v4 = vrot.slane %v2915_v47, 1  ;;  %1500 = vmatpush.msra.mxu1 %v777_v44  ;;  %625 = vst [vmem:[#allocation2 + $0x1d8] sm:$0x7f] %v553_v56 }
  0xaf   : > { %1501 = vmatpush.msra.mxu1 %v776_v15 }
  0xb0   : > { %v3225_v36 = vpop.f32.mrf.mxu1 }
  0xb2   : > { %1305 = vmatmul.f32.gmra.mxu3 %v3048_v60  ;;  %v548_v60 = vsel %vm527_vm1, %v546_v4, %v547_v32  ;;  %v2450_v32 = vld [vmem:[%s3791_s3 + $0x3b8] sm:$0xff] }
  0xb3   : > { %1192 = vmatmul.f32.gmra.mxu2 %v807_v18  ;;  %620 = vst [vmem:[#allocation2 + $0x160] sm:$0xff] %v548_v60 }
  0xb4   : > { %1082 = vmatmul.f32.gmra.mxu1 %v2622_v6  ;;  %v2452_v6 = vld [vmem:[%s3791_s3 + $0x3c8] sm:$0xff] }
  0xb5   : > { %1418 = vmatmul.f32.gmra.mxu0 %v3000_v26  ;;  %v2436_v26 = vld [vmem:[%s3791_s3 + $0x348] sm:$0xff]  ;;  %1872 = vmatpush.msra.mxu3 %v2452_v6  ;;  %v775_v6 = vld [vmem:[%s3791_s3 + $0x138] sm:$0xff] }
  0xb6   : > { %1759 = vmatpush.msra.mxu2 %v2436_v26  ;;  %v825_v26 = vld [vmem:[#allocation2 + $0x178] sm:$0xff]  ;;  %1502 = vmatpush.msra.mxu1 %v775_v6 }
  0xb7   : > { %1873 = vmatpush.msra.mxu3 %v2451_v63  ;;  %v774_v63 = vld [vmem:[%s3791_s3 + $0x130] sm:$0xff] }
  0xb8   : > { %1503 = vmatpush.msra.mxu1 %v774_v63  ;;  %v773_v63 = vld [vmem:[%s3791_s3 + $0x128] sm:$0xff] }
  0xb9   : > { %1874 = vmatpush.msra.mxu3 %v2450_v32 }
  0xba   : > { %v3223_v33 = vpop.f32.mrf.mxu0  ;;  %1308 = vmatmul.f32.gmra.mxu3 %v3112_v53  ;;  %1504 = vmatpush.msra.mxu1 %v773_v63 }
  0xbb   : > { %1195 = vmatmul.f32.gmra.mxu2 %v542_v13  ;;  %v671_v13 = vld [vmem:[#allocation2 + $0xf8] sm:$0xff] }
  0xbc   : > { %1085 = vmatmul.f32.gmra.mxu1 %v2683_v22 }
  0xbd   : > { %1421 = vmatmul.f32.gmra.mxu0 %v3061_v0  ;;  %v3237_v39 = vpop.f32.mrf.mxu3 }
  0xbe   : > { %v3234_v38 = vpop.f32.mrf.mxu2 }
  0xc1   : > { %v3251_v0 = vpop.f32.mrf.mxu1 }
  0xc2   : > { %v3240_v53 = vpop.f32.mrf.mxu0  ;;  %1311 = vmatmul.f32.gmra.mxu3 %v3116_v54  ;;  %v549_v54 = vrot.slane %v3024_v42, 1 }
  0xc3   : > { %1198 = vmatmul.f32.gmra.mxu2 %v813_v43  ;;  %v2466_v43 = vld [vmem:[%s3791_s3 + $0x438] sm:$0xff] }
  0xc4   : > { %1088 = vmatmul.f32.gmra.mxu1 %v2813_v1  ;;  %v551_v46 = vsel %vm527_vm1, %v549_v54, %v550_v12  ;;  %v556_v54 = vrot.slane %v2865_v25, 1 }
  0xc5   : > { %1424 = vmatmul.f32.gmra.mxu0 %v3088_v21  ;;  %v3254_v50 = vpop.f32.mrf.mxu3  ;;  %622 = vst [vmem:[#allocation2 + $0x190] sm:$0xff] %v551_v46  ;;  %v2435_v21 = vld [vmem:[%s3791_s3 + $0x340] sm:$0xff] }
  0xc6   : > { %v3249_v2 = vpop.f32.mrf.mxu2  ;;  %1760 = vmatpush.msra.mxu2 %v2435_v21  ;;  %627 = vst [vmem:[#allocation2 + $0x208] sm:$0x7f] %v556_v54 }
  0xc9   : > { %v3270_v3 = vpop.f32.mrf.mxu1 }
  0xca   : > { %v3260_v62 = vpop.f32.mrf.mxu0  ;;  %1314 = vmatmul.f32.gmra.mxu3 %v670_v55 }
  0xcb   : > { %1201 = vmatmul.f32.gmra.mxu2 %v545_v59  ;;  %v2467_v59 = vld [vmem:[%s3791_s3 + $0x440] sm:$0xff] }
  0xcc   : > { %1091 = vmatmul.f32.gmra.mxu1 %v2860_v23  ;;  %1986 = vmatpush.msra.mxu0 %v2467_v59  ;;  %v3363_v59 = vld [vmem:[#allocation2 + $0x1b8] sm:$0xff] }
  0xcd   : > { %1427 = vmatmul.f32.gmra.mxu0 %v671_v13  ;;  %v3272_v57 = vpop.f32.mrf.mxu3 }
  0xce   : > { %v3268_v58 = vpop.f32.mrf.mxu2  ;;  %1987 = vmatpush.msra.mxu0 %v2466_v43  ;;  %v3383_v43 = vld [vmem:[#allocation2 + $0x1d0] sm:$0xff] }
  0xd1   : > { %v3286_v37 = vpop.f32.mrf.mxu1 }
  0xd2   : > { %v3275_v20 = vpop.f32.mrf.mxu0  ;;  %1317 = vmatmul.f32.gmra.mxu3 %v2726_v34  ;;  %v552_v34 = vrot.slane %v2732_v35, 1 }
  0xd3   : > { %1204 = vmatmul.f32.gmra.mxu2 %v819_v9  ;;  %v2465_v9 = vld [vmem:[%s3791_s3 + $0x430] sm:$0xff] }
  0xd4   : > { %1094 = vmatmul.f32.gmra.mxu1 %v2915_v47  ;;  %v554_v29 = vsel %vm527_vm1, %v552_v34, %v553_v56  ;;  %1988 = vmatpush.msra.mxu0 %v2465_v9  ;;  %v559_v56 = vrot.slane %v2971_v10, 1 }
  0xd5   : > { %1430 = vmatmul.f32.gmra.mxu0 %v2683_v22  ;;  %v3289_v18 = vpop.f32.mrf.mxu3  ;;  %624 = vst [vmem:[#allocation2 + $0x1c0] sm:$0xff] %v554_v29  ;;  %v2434_v22 = vld [vmem:[%s3791_s3 + $0x338] sm:$0xff] }
  0xd6   : > { %v3284_v17 = vpop.f32.mrf.mxu2  ;;  %1761 = vmatpush.msra.mxu2 %v2434_v22  ;;  %629 = vst [vmem:[#allocation2 + $0x238] sm:$0x7f] %v559_v56 }
  0xd9   : > { %v3306_v49 = vpop.f32.mrf.mxu1 }
  0xda   : > { %v3295_v4 = vpop.f32.mrf.mxu0  ;;  %1320 = vmatmul.f32.gmra.mxu3 %v2902_v40 }
  0xdb   : > { %1207 = vmatmul.f32.gmra.mxu2 %v548_v60 }
  0xdc   : > { %1097 = vmatmul.f32.gmra.mxu1 %v2966_v8 }
  0xdd   : > { %1433 = vmatmul.f32.gmra.mxu0 %v2813_v1  ;;  %v3309_v60 = vpop.f32.mrf.mxu3 }
  0xde   : > { %v3304_v35 = vpop.f32.mrf.mxu2 }
  0xe1   : > { %v3323_v1 = vpop.f32.mrf.mxu1 }
  0xe2   : > { %v3312_v40 = vpop.f32.mrf.mxu0  ;;  %1323 = vmatmul.f32.gmra.mxu3 %v2906_v41  ;;  %v555_v41 = vrot.slane %v2818_v5, 1  ;;  %v2449_v5 = vld [vmem:[%s3791_s3 + $0x3b0] sm:$0xff] }
  0xe3   : > { %1210 = vmatmul.f32.gmra.mxu2 %v825_v26  ;;  %1875 = vmatpush.msra.mxu3 %v2449_v5 }
  0xe4   : > { %1100 = vmatmul.f32.gmra.mxu1 %v3024_v42  ;;  %v3334_v55 = vsel %vm527_vm1, %v555_v41, %v556_v54 }
  0xe5   : > { %1436 = vmatmul.f32.gmra.mxu0 %v2860_v23  ;;  %v3326_v45 = vpop.f32.mrf.mxu3  ;;  %626 = vst [vmem:[#allocation2 + $0x1f0] sm:$0xff] %v3334_v55  ;;  %v2433_v23 = vld [vmem:[%s3791_s3 + $0x330] sm:$0xff] }
  0xe6   : > { %v3321_v44 = vpop.f32.mrf.mxu2  ;;  %1762 = vmatpush.msra.mxu2 %v2433_v23 }
  0xea   : > { %v3331_v12 = vpop.f32.mrf.mxu0  ;;  %1326 = vmatmul.f32.gmra.mxu3 %v3008_v30  ;;  %v831_v30 = vld [vmem:[#allocation2 + $0x1a8] sm:$0xff] }
  0xeb   : > { %1213 = vmatmul.f32.gmra.mxu2 %v551_v46  ;;  %v3346_v46 = vpop.f32.mrf.mxu1 }
  0xec   : > { %1103 = vmatmul.f32.gmra.mxu1 %v3066_v7 }
  0xed   : > { %1439 = vmatmul.f32.gmra.mxu0 %v2915_v47  ;;  %v3349_v13 = vpop.f32.mrf.mxu3 }
  0xee   : > { %v3344_v25 = vpop.f32.mrf.mxu2 }
  0xf2   : > { %v3352_v21 = vpop.f32.mrf.mxu0  ;;  %1329 = vmatmul.f32.gmra.mxu3 %v3012_v31  ;;  %v558_v31 = vrot.slane %v2920_v51, 1  ;;  %v2448_v51 = vld [vmem:[%s3791_s3 + $0x3a8] sm:$0xff] }
  0xf3   : > { %1216 = vmatmul.f32.gmra.mxu2 %v831_v30  ;;  %v1059_v47 = vpop.f32.mrf.mxu1  ;;  %1876 = vmatpush.msra.mxu3 %v2448_v51 }
  0xf4   : > { %1106 = vmatmul.f32.gmra.mxu1 %v3363_v59  ;;  %v3372_v32 = vsel %vm527_vm1, %v558_v31, %v559_v56  ;;  %v1060_v26 = vadd.f32 %v1059_v47, %v3223_v33  ;;  %v837_v33 = vld [vmem:[#allocation2 + $0x1d8] sm:$0xff]  ;;  %v3397_v31 = vld [vmem:[#allocation2 + $0x1e8] sm:$0xff] }
  0xf5   : > { %1442 = vmatmul.f32.gmra.mxu0 %v2966_v8  ;;  %v3366_v34 = vpop.f32.mrf.mxu3  ;;  %628 = vst [vmem:[#allocation2 + $0x220] sm:$0xff] %v3372_v32  ;;  %v2432_v8 = vld [vmem:[%s3791_s3 + $0x328] sm:$0xff] }
  0xf6   : > { %v3361_v15 = vpop.f32.mrf.mxu2  ;;  %1763 = vmatpush.msra.mxu2 %v2432_v8  ;;  %v562_v8 = vrot.slane %v3071_v11, 1 }
  0xf8   : > { %631 = vst [vmem:[#allocation2 + $0x268] sm:$0x7f] %v562_v8 }
  0xfa   : > { %v1398_v22 = vpop.f32.mrf.mxu0  ;;  %1332 = vmatmul.f32.gmra.mxu3 %v3090_v24 }
  0xfb   : > { %1219 = vmatmul.f32.gmra.mxu2 %v554_v29  ;;  %v1062_v6 = vpop.f32.mrf.mxu1 }
  0xfc   : > { %1109 = vmatmul.f32.gmra.mxu1 %v3383_v43  ;;  %v1063_v30 = vadd.f32 %v1062_v6, %v3240_v53 }
  0xfd   : > { %1445 = vmatmul.f32.gmra.mxu0 %v3024_v42  ;;  %v1285_v24 = vpop.f32.mrf.mxu3  ;;  %v2464_v42 = vld [vmem:[%s3791_s3 + $0x428] sm:$0xff] }
  0xfe   : > { %v1172_v29 = vpop.f32.mrf.mxu2  ;;  %1989 = vmatpush.msra.mxu0 %v2464_v42  ;;  %v697_v42 = vld [vmem:[#allocation2 + $0x1c8] sm:$0xff] }
  0xff   : > { %v1173_v41 = vadd.f32 %v1172_v29, %v1060_v26  ;;  %v561_v26 = vrot.slane %v3032_v48, 1 }
 0x101   : > { %v1286_v54 = vadd.f32 %v1285_v24, %v1173_v41  ;;  %v3407_v6 = vsel %vm527_vm1, %v561_v26, %v562_v8  ;;  %v2431_v41 = vld [vmem:[%s3791_s3 + $0x320] sm:$0xff]  ;;  %v3430_v26 = vld [vmem:[#allocation2 + $0x218] sm:$0xff] }
 0x102   : > { %v1401_v5 = vpop.f32.mrf.mxu0  ;;  %1335 = vmatmul.f32.gmra.mxu3 %v3094_v28  ;;  %v694_v28 = vld [vmem:[#allocation2 + $0x1b0] sm:$0xff]  ;;  %630 = vst [vmem:[#allocation2 + $0x250] sm:$0xff] %v3407_v6  ;;  %v2447_v24 = vld [vmem:[%s3791_s3 + $0x3a0] sm:$0xff]  ;;  %1764 = vmatpush.msra.mxu2 %v2431_v41  ;;  %v2534_v41 = vld [vmem:[#allocation2 + $0x278] sm:$0xff] }
 0x103   : > { %v3387_v23 = vadd.f32 %v1398_v22, %v1286_v54  ;;  %1222 = vmatmul.f32.gmra.mxu2 %v837_v33  ;;  %v1065_v47 = vpop.f32.mrf.mxu1  ;;  %v3417_v54 = vld [vmem:[#allocation2 + $0x200] sm:$0xff]  ;;  %1877 = vmatpush.msra.mxu3 %v2447_v24  ;;  %v564_v24 = vrot.slane %v2534_v41, 1 }
 0x104   : > { %1112 = vmatmul.f32.gmra.mxu1 %v3397_v31 }
 0x105   : > { %1448 = vmatmul.f32.gmra.mxu0 %v3066_v7  ;;  %v1288_v53 = vpop.f32.mrf.mxu3  ;;  %v1066_v7 = vadd.f32 %v1065_v47, %v3260_v62 }
 0x106   : > { %v1175_v9 = vpop.f32.mrf.mxu2 }
 0x107   : > { %v1176_v56 = vadd.f32 %v1175_v9, %v1063_v30  ;;  %v843_v30 = vld [vmem:[#allocation2 + $0x208] sm:$0xff] }
 0x109   : > { %v1289_v22 = vadd.f32 %v1288_v53, %v1176_v56  ;;  %v772_v53 = vld [vmem:[%s3791_s3 + $0x120] sm:$0xff] }
 0x10a   : > { %v1404_v29 = vpop.f32.mrf.mxu0  ;;  %1338 = vmatmul.f32.gmra.mxu3 %v694_v28  ;;  %1505 = vmatpush.msra.mxu1 %v772_v53 }
 0x10b   : > { %v3403_v51 = vadd.f32 %v1401_v5, %v1289_v22  ;;  %1225 = vmatmul.f32.gmra.mxu2 %v3334_v55  ;;  %v1068_v55 = vpop.f32.mrf.mxu1 }
 0x10c   : > { %1115 = vmatmul.f32.gmra.mxu1 %v3417_v54  ;;  %v1069_v56 = vadd.f32 %v1068_v55, %v3275_v20 }
 0x10d   : > { %1451 = vmatmul.f32.gmra.mxu0 %v3363_v59  ;;  %v1291_v62 = vpop.f32.mrf.mxu3  ;;  %v2463_v59 = vld [vmem:[%s3791_s3 + $0x420] sm:$0xff] }
 0x10e   : > { %v1178_v33 = vpop.f32.mrf.mxu2  ;;  %1990 = vmatpush.msra.mxu0 %v2463_v59 }
 0x10f   : > { %v1179_v5 = vadd.f32 %v1178_v33, %v1066_v7  ;;  %v700_v7 = vld [vmem:[#allocation2 + $0x1e0] sm:$0xff]  ;;  %v2535_v33 = vld [vmem:[#allocation2 + $0x290] sm:$0xff] }
 0x110   : > { %v565_v55 = vrot.slane %v2535_v33, 1 }
 0x111   : > { %v1292_v63 = vadd.f32 %v1291_v62, %v1179_v5 }
 0x112   : > { %v1407_v47 = vpop.f32.mrf.mxu0  ;;  %1341 = vmatmul.f32.gmra.mxu3 %v697_v42  ;;  %633 = vst [vmem:[#allocation2 + $0x298] sm:$0x7f] %v565_v55  ;;  %v2446_v42 = vld [vmem:[%s3791_s3 + $0x398] sm:$0xff] }
 0x113   : > { %v3421_v9 = vadd.f32 %v1404_v29, %v1292_v63  ;;  %1228 = vmatmul.f32.gmra.mxu2 %v843_v30  ;;  %v1071_v28 = vpop.f32.mrf.mxu1  ;;  %v3438_v30 = vsel %vm527_vm1, %v564_v24, %v565_v55  ;;  %v2430_v63 = vld [vmem:[%s3791_s3 + $0x318] sm:$0xff]  ;;  %1878 = vmatpush.msra.mxu3 %v2446_v42  ;;  %v2536_v55 = vld [vmem:[#allocation2 + $0x2a8] sm:$0xff] }
 0x114   : > { %1118 = vmatmul.f32.gmra.mxu1 %v3430_v26  ;;  %632 = vst [vmem:[#allocation2 + $0x280] sm:$0xff] %v3438_v30  ;;  %1765 = vmatpush.msra.mxu2 %v2430_v63 }
 0x115   : > { %1454 = vmatmul.f32.gmra.mxu0 %v3383_v43  ;;  %v1294_v29 = vpop.f32.mrf.mxu3  ;;  %v1072_v43 = vadd.f32 %v1071_v28, %v3295_v4  ;;  %v849_v4 = vld [vmem:[#allocation2 + $0x238] sm:$0xff] }
 0x116   : > { %v1181_v22 = vpop.f32.mrf.mxu2 }
 0x117   : > { %v1182_v8 = vadd.f32 %v1181_v22, %v1069_v56  ;;  %v703_v22 = vld [vmem:[#allocation2 + $0x1f8] sm:$0xff] }
 0x119   : > { %v1295_v20 = vadd.f32 %v1294_v29, %v1182_v8 }
 0x11a   : > { %v1410_v62 = vpop.f32.mrf.mxu0  ;;  %1344 = vmatmul.f32.gmra.mxu3 %v700_v7 }
 0x11b   : > { %v3434_v5 = vadd.f32 %v1407_v47, %v1295_v20  ;;  %1231 = vmatmul.f32.gmra.mxu2 %v3372_v32  ;;  %v1074_v32 = vpop.f32.mrf.mxu1  ;;  %v771_v20 = vld [vmem:[%s3791_s3 + $0x118] sm:$0xff] }
 0x11c   : > { %1121 = vmatmul.f32.gmra.mxu1 %v2971_v10  ;;  %v1075_v29 = vadd.f32 %v1074_v32, %v3312_v40  ;;  %v706_v40 = vld [vmem:[#allocation2 + $0x210] sm:$0xff] }
 0x11d   : > { %1457 = vmatmul.f32.gmra.mxu0 %v3397_v31  ;;  %v1297_v53 = vpop.f32.mrf.mxu3  ;;  %v2462_v31 = vld [vmem:[%s3791_s3 + $0x418] sm:$0xff]  ;;  %1506 = vmatpush.msra.mxu1 %v771_v20 }
 0x11e   : > { %v1184_v47 = vpop.f32.mrf.mxu2  ;;  %1991 = vmatpush.msra.mxu0 %v2462_v31  ;;  %v770_v31 = vld [vmem:[%s3791_s3 + $0x110] sm:$0xff] }
 0x11f   : > { %v1185_v56 = vadd.f32 %v1184_v47, %v1072_v43  ;;  %v568_v43 = vrot.slane %v2870_v27, 1  ;;  %v2445_v27 = vld [vmem:[%s3791_s3 + $0x390] sm:$0xff]  ;;  %1507 = vmatpush.msra.mxu1 %v770_v31  ;;  %v769_v31 = vld [vmem:[%s3791_s3 + $0x108] sm:$0xff] }
 0x120   : > { %1879 = vmatpush.msra.mxu3 %v2445_v27 }
 0x121   : > { %v1298_v59 = vadd.f32 %v1297_v53, %v1185_v56  ;;  %635 = vst [vmem:[#allocation2 + $0x2c8] sm:$0x7f] %v568_v43  ;;  %1508 = vmatpush.msra.mxu1 %v769_v31 }
 0x122   : > { %v1413_v8 = vpop.f32.mrf.mxu0  ;;  %1347 = vmatmul.f32.gmra.mxu3 %v703_v22 }
 0x123   : > { %v3450_v28 = vadd.f32 %v1410_v62, %v1298_v59  ;;  %1234 = vmatmul.f32.gmra.mxu2 %v849_v4  ;;  %v1077_v41 = vpop.f32.mrf.mxu1  ;;  %v567_v62 = vrot.slane %v2536_v55, 1  ;;  %v709_v59 = vld [vmem:[#allocation2 + $0x228] sm:$0xff]  ;;  %v571_v55 = vrot.slane %v2976_v14, 1 }
 0x124   : > { %1124 = vmatmul.f32.gmra.mxu1 %v3032_v48  ;;  %v2429_v48 = vld [vmem:[%s3791_s3 + $0x310] sm:$0xff]  ;;  %v2444_v14 = vld [vmem:[%s3791_s3 + $0x388] sm:$0xff] }
 0x125   : > { %1460 = vmatmul.f32.gmra.mxu0 %v3417_v54  ;;  %v1300_v24 = vpop.f32.mrf.mxu3  ;;  %v3466_v47 = vsel %vm527_vm1, %v567_v62, %v568_v43  ;;  %v1078_v54 = vadd.f32 %v1077_v41, %v3331_v12  ;;  %1766 = vmatpush.msra.mxu2 %v2429_v48  ;;  %v855_v12 = vld [vmem:[#allocation2 + $0x268] sm:$0xff]  ;;  %v3489_v41 = vld [vmem:[#allocation2 + $0x278] sm:$0xff]  ;;  %637 = vst [vmem:[#allocation2 + $0x2f8] sm:$0x7f] %v571_v55 }
 0x126   : > { %v1187_v7 = vpop.f32.mrf.mxu2  ;;  %634 = vst [vmem:[#allocation2 + $0x2b0] sm:$0xff] %v3466_v47  ;;  %1880 = vmatpush.msra.mxu3 %v2444_v14 }
 0x127   : > { %v1188_v10 = vadd.f32 %v1187_v7, %v1075_v29  ;;  %v3480_v29 = vld [vmem:[#allocation2 + $0x230] sm:$0xff] }
 0x129   : > { %v1301_v33 = vadd.f32 %v1300_v24, %v1188_v10 }
 0x12a   : > { %v1416_v42 = vpop.f32.mrf.mxu0  ;;  %1350 = vmatmul.f32.gmra.mxu3 %v706_v40  ;;  %v570_v40 = vrot.slane %v2923_v52, 1  ;;  %v2428_v52 = vld [vmem:[%s3791_s3 + $0x308] sm:$0xff] }
 0x12b   : > { %v3462_v63 = vadd.f32 %v1413_v8, %v1301_v33  ;;  %1237 = vmatmul.f32.gmra.mxu2 %v3407_v6  ;;  %v1080_v6 = vpop.f32.mrf.mxu1  ;;  %v3493_v33 = vld [vmem:[#allocation2 + $0x240] sm:$0xff] }
 0x12c   : > { %1127 = vmatmul.f32.gmra.mxu1 %v3071_v11  ;;  %v1081_v20 = vadd.f32 %v1080_v6, %v3352_v21  ;;  %1767 = vmatpush.msra.mxu2 %v2428_v52 }
 0x12d   : > { %1463 = vmatmul.f32.gmra.mxu0 %v3430_v26  ;;  %v1303_v53 = vpop.f32.mrf.mxu3  ;;  %v2461_v26 = vld [vmem:[%s3791_s3 + $0x410] sm:$0xff] }
 0x12e   : > { %v1190_v32 = vpop.f32.mrf.mxu2  ;;  %1992 = vmatpush.msra.mxu0 %v2461_v26  ;;  %v2460_v26 = vld [vmem:[%s3791_s3 + $0x408] sm:$0xff] }
 0x12f   : > { %v1191_v56 = vadd.f32 %v1190_v32, %v1078_v54  ;;  %v3503_v54 = vsel %vm527_vm1, %v570_v40, %v571_v55  ;;  %v3514_v32 = vld [vmem:[#allocation2 + $0x290] sm:$0xff]  ;;  %v573_v55 = vrot.slane %v3051_v61, 1  ;;  %v2427_v61 = vld [vmem:[%s3791_s3 + $0x300] sm:$0xff] }
 0x130   : > { %636 = vst [vmem:[#allocation2 + $0x2e0] sm:$0xff] %v3503_v54  ;;  %1993 = vmatpush.msra.mxu0 %v2460_v26  ;;  %v3533_v40 = vld [vmem:[#allocation2 + $0x270] sm:$0xff]  ;;  %1768 = vmatpush.msra.mxu2 %v2427_v61 }
 0x131   : > { %v1304_v4 = vadd.f32 %v1303_v53, %v1191_v56  ;;  %v861_v56 = vld [vmem:[#allocation2 + $0x298] sm:$0xff] }
 0x132   : > { %v1419_v8 = vpop.f32.mrf.mxu0  ;;  %1353 = vmatmul.f32.gmra.mxu3 %v709_v59 }
 0x133   : > { %v3478_v22 = vadd.f32 %v1416_v42, %v1304_v4  ;;  %1240 = vmatmul.f32.gmra.mxu2 %v855_v12  ;;  %v1083_v11 = vpop.f32.mrf.mxu1  ;;  %v3500_v42 = vld [vmem:[#allocation2 + $0x248] sm:$0xff]  ;;  %v3518_v12 = vld [vmem:[#allocation2 + $0x258] sm:$0xff] }
 0x134   : > { %1130 = vmatmul.f32.gmra.mxu1 %v3489_v41  ;;  %v1084_v48 = vadd.f32 %v1083_v11, %v3209_v19 }
 0x135   : > { %1466 = vmatmul.f32.gmra.mxu0 %v3480_v29  ;;  %v1306_v24 = vpop.f32.mrf.mxu3 }
 0x136   : > { %v1193_v7 = vpop.f32.mrf.mxu2 }
 0x137   : > { %v1194_v10 = vadd.f32 %v1193_v7, %v1081_v20 }
 0x139   : > { %v1307_v21 = vadd.f32 %v1306_v24, %v1194_v10  ;;  %v863_v10 = vld [vmem:[#allocation2 + $0x2a8] sm:$0xff] }
 0x13a   : > { %v1422_v43 = vpop.f32.mrf.mxu0  ;;  %1356 = vmatmul.f32.gmra.mxu3 %v3493_v33 }
 0x13b   : > { %v3497_v62 = vadd.f32 %v1419_v8, %v1307_v21  ;;  %1243 = vmatmul.f32.gmra.mxu2 %v3438_v30  ;;  %v1086_v27 = vpop.f32.mrf.mxu1  ;;  %v3522_v8 = vld [vmem:[#allocation2 + $0x260] sm:$0xff] }
 0x13c   : > { %1133 = vmatmul.f32.gmra.mxu1 %v3514_v32  ;;  %v1087_v20 = vadd.f32 %v1086_v27, %v3225_v36 }
 0x13d   : > { %1469 = vmatmul.f32.gmra.mxu0 %v3500_v42  ;;  %v1309_v19 = vpop.f32.mrf.mxu3 }
 0x13e   : > { %v1196_v30 = vpop.f32.mrf.mxu2 }
 0x13f   : > { %v1197_v6 = vadd.f32 %v1196_v30, %v1084_v48 }
 0x141   : > { %v1310_v53 = vadd.f32 %v1309_v19, %v1197_v6  ;;  %v866_v6 = vld [vmem:[#allocation2 + $0x2c0] sm:$0xff] }
 0x142   : > { %v1425_v59 = vpop.f32.mrf.mxu0  ;;  %1359 = vmatmul.f32.gmra.mxu3 %v3518_v12 }
 0x143   : > { %v3520_v4 = vadd.f32 %v1422_v43, %v1310_v53  ;;  %1246 = vmatmul.f32.gmra.mxu2 %v861_v56  ;;  %v1089_v11 = vpop.f32.mrf.mxu1  ;;  %v574_v43 = vrot.slane %v3076_v16, 1  ;;  %v2443_v16 = vld [vmem:[%s3791_s3 + $0x380] sm:$0xff]  ;;  %v867_v56 = vld [vmem:[#allocation2 + $0x2c8] sm:$0xff] }
 0x144   : > { %1136 = vmatmul.f32.gmra.mxu1 %v863_v10  ;;  %v1090_v30 = vadd.f32 %v1089_v11, %v3251_v0  ;;  %1881 = vmatpush.msra.mxu3 %v2443_v16 }
 0x145   : > { %1472 = vmatmul.f32.gmra.mxu0 %v3522_v8  ;;  %v1312_v21 = vpop.f32.mrf.mxu3  ;;  %v3541_v14 = vsel %vm527_vm1, %v573_v55, %v574_v43  ;;  %639 = vst [vmem:[#allocation2 + $0x328] sm:$0x7f] %v574_v43  ;;  %v3566_v43 = vld [vmem:[#allocation2 + $0x2a0] sm:$0xff] }
 0x146   : > { %v1199_v7 = vpop.f32.mrf.mxu2  ;;  %638 = vst [vmem:[#allocation2 + $0x310] sm:$0xff] %v3541_v14 }
 0x147   : > { %v1200_v24 = vadd.f32 %v1199_v7, %v1087_v20  ;;  %v768_v7 = vld [vmem:[%s3791_s3 + $0x100] sm:$0xff] }
 0x148   : > { %1509 = vmatpush.msra.mxu1 %v768_v7 }
 0x149   : > { %v1313_v36 = vadd.f32 %v1312_v21, %v1200_v24  ;;  %v869_v21 = vld [vmem:[#allocation2 + $0x2d8] sm:$0xff] }
 0x14a   : > { %v1428_v52 = vpop.f32.mrf.mxu0  ;;  %1362 = vmatmul.f32.gmra.mxu3 %v3533_v40 }
 0x14b   : > { %v3537_v48 = vadd.f32 %v1425_v59, %v1313_v36  ;;  %1249 = vmatmul.f32.gmra.mxu2 %v3466_v47  ;;  %v1092_v27 = vpop.f32.mrf.mxu1  ;;  %v3553_v59 = vld [vmem:[#allocation2 + $0x288] sm:$0xff] }
 0x14c   : > { %1139 = vmatmul.f32.gmra.mxu1 %v866_v6  ;;  %v1093_v26 = vadd.f32 %v1092_v27, %v3270_v3  ;;  %v872_v27 = vld [vmem:[#allocation2 + $0x2f0] sm:$0xff] }
 0x14d   : > { %1475 = vmatmul.f32.gmra.mxu0 %v3489_v41  ;;  %v1315_v0 = vpop.f32.mrf.mxu3  ;;  %v2459_v41 = vld [vmem:[%s3791_s3 + $0x400] sm:$0xff] }
 0x14e   : > { %v1202_v47 = vpop.f32.mrf.mxu2  ;;  %1994 = vmatpush.msra.mxu0 %v2459_v41  ;;  %v875_v41 = vld [vmem:[#allocation2 + $0x308] sm:$0xff] }
 0x14f   : > { %v1203_v19 = vadd.f32 %v1202_v47, %v1090_v30 }
 0x151   : > { %v1316_v53 = vadd.f32 %v1315_v0, %v1203_v19  ;;  %v873_v0 = vld [vmem:[#allocation2 + $0x2f8] sm:$0xff] }
 0x152   : > { %v1431_v31 = vpop.f32.mrf.mxu0  ;;  %1365 = vmatmul.f32.gmra.mxu3 %v3553_v59 }
 0x153   : > { %v3555_v20 = vadd.f32 %v1428_v52, %v1316_v53  ;;  %1252 = vmatmul.f32.gmra.mxu2 %v867_v56  ;;  %v1095_v24 = vpop.f32.mrf.mxu1  ;;  %v3573_v53 = vld [vmem:[#allocation2 + $0x2b8] sm:$0xff] }
 0x154   : > { %1142 = vmatmul.f32.gmra.mxu1 %v869_v21  ;;  %v1096_v61 = vadd.f32 %v1095_v24, %v3286_v37 }
 0x155   : > { %1478 = vmatmul.f32.gmra.mxu0 %v3514_v32  ;;  %v1318_v55 = vpop.f32.mrf.mxu3 }
 0x156   : > { %v1205_v11 = vpop.f32.mrf.mxu2 }
 0x157   : > { %v1206_v36 = vadd.f32 %v1205_v11, %v1093_v26 }
 0x159   : > { %v1319_v3 = vadd.f32 %v1318_v55, %v1206_v36  ;;  %v3579_v36 = vld [vmem:[#allocation2 + $0x2d0] sm:$0xff] }
 0x15a   : > { %v1434_v30 = vpop.f32.mrf.mxu0  ;;  %1368 = vmatmul.f32.gmra.mxu3 %v3566_v43 }
 0x15b   : > { %v3568_v52 = vadd.f32 %v1431_v31, %v1319_v3  ;;  %1255 = vmatmul.f32.gmra.mxu2 %v3503_v54  ;;  %v1098_v47 = vpop.f32.mrf.mxu1 }
 0x15c   : > { %1145 = vmatmul.f32.gmra.mxu1 %v872_v27  ;;  %v1099_v26 = vadd.f32 %v1098_v47, %v3306_v49 }
 0x15d   : > { %1481 = vmatmul.f32.gmra.mxu0 %v863_v10  ;;  %v1321_v32 = vpop.f32.mrf.mxu3 }
 0x15e   : > { %v1208_v16 = vpop.f32.mrf.mxu2 }
 0x15f   : > { %v1209_v19 = vadd.f32 %v1208_v16, %v1096_v61  ;;  %v878_v16 = vld [vmem:[#allocation2 + $0x320] sm:$0xff] }
 0x161   : > { %v1322_v56 = vadd.f32 %v1321_v32, %v1209_v19  ;;  %v879_v19 = vld [vmem:[#allocation2 + $0x328] sm:$0xff] }
 0x162   : > { %v1437_v54 = vpop.f32.mrf.mxu0  ;;  %1371 = vmatmul.f32.gmra.mxu3 %v3573_v53 }
 0x163   : > { %v3575_v31 = vadd.f32 %v1434_v30, %v1322_v56  ;;  %1258 = vmatmul.f32.gmra.mxu2 %v873_v0  ;;  %v1101_v7 = vpop.f32.mrf.mxu1  ;;  %v3586_v0 = vld [vmem:[#allocation2 + $0x2e8] sm:$0xff] }
 0x164   : > { %1148 = vmatmul.f32.gmra.mxu1 %v875_v41  ;;  %v1102_v30 = vadd.f32 %v1101_v7, %v3323_v1 }
 0x165   : > { %1484 = vmatmul.f32.gmra.mxu0 %v866_v6  ;;  %v1324_v10 = vpop.f32.mrf.mxu3 }
 0x166   : > { %v1211_v37 = vpop.f32.mrf.mxu2 }
 0x167   : > { %v1212_v11 = vadd.f32 %v1211_v37, %v1099_v26 }
 0x169   : > { %v1325_v24 = vadd.f32 %v1324_v10, %v1212_v11  ;;  %v3592_v11 = vld [vmem:[#allocation2] sm:$0xff]  ;;  %v1609_v10 = vld [vmem:[#allocation2 + $0x68] sm:$0xff] }
 0x16a   : > { %v1440_v3 = vpop.f32.mrf.mxu0  ;;  %1374 = vmatmul.f32.gmra.mxu3 %v3579_v36 }
 0x16b   : > { %v3581_v55 = vadd.f32 %v1437_v54, %v1325_v24  ;;  %1261 = vmatmul.f32.gmra.mxu2 %v3541_v14  ;;  %v1104_v61 = vpop.f32.mrf.mxu1 }
 0x16c   : > { %1151 = vmatmul.f32.gmra.mxu1 %v878_v16  ;;  %v1105_v54 = vadd.f32 %v1104_v61, %v3346_v46 }
 0x16d   : > { %1487 = vmatmul.f32.gmra.mxu0 %v869_v21  ;;  %v1327_v6 = vpop.f32.mrf.mxu3  ;;  %v1608_v21 = vld [vmem:[#allocation2 + $0x60] sm:$0xff] }
 0x16e   : > { %v1214_v49 = vpop.f32.mrf.mxu2 }
 0x16f   : > { %v1215_v47 = vadd.f32 %v1214_v49, %v1102_v30  ;;  %v1610_v30 = vld [vmem:[#allocation2 + $0x70] sm:$0xff] }
 0x171   : > { %v1328_v32 = vadd.f32 %v1327_v6, %v1215_v47  ;;  %v1611_v47 = vld [vmem:[#allocation2 + $0x78] sm:$0xff] }
 0x172   : > { %v1443_v14 = vpop.f32.mrf.mxu0  ;;  %1377 = vmatmul.f32.gmra.mxu3 %v3586_v0 }
 0x173   : > { %v3588_v56 = vadd.f32 %v1440_v3, %v1328_v32  ;;  %1264 = vmatmul.f32.gmra.mxu2 %v879_v19  ;;  %v1107_v26 = vpop.f32.mrf.mxu1  ;;  %v1612_v19 = vld [vmem:[#allocation2 + $0x80] sm:$0xff] }
 0x174   : > { %1510 = vmatmul.f32.vlgmr.msra.gmra.mxu1 %v3592_v11  ;;  %v1108_v46 = vadd.f32 %v1107_v26, %v3234_v38 }
 0x175   : > { %1490 = vmatmul.f32.gmra.mxu0 %v872_v27  ;;  %v1330_v7 = vpop.f32.mrf.mxu3 }
 0x176   : > { %v1217_v1 = vpop.f32.mrf.mxu2 }
 0x177   : > { %v1218_v37 = vadd.f32 %v1217_v1, %v1105_v54  ;;  %v1613_v54 = vld [vmem:[#allocation2 + $0x88] sm:$0xff] }
 0x179   : > { %v1331_v41 = vadd.f32 %v1330_v7, %v1218_v37  ;;  %v648_v37 = vld [vmem:[#allocation2 + $0x40] sm:$0xff] }
 0x17a   : > { %v1446_v3 = vpop.f32.mrf.mxu0  ;;  %1882 = vmatmul.f32.vlgmr.msra.gmra.mxu3 %v1609_v10 }
 0x17b   : > { %v3595_v24 = vadd.f32 %v1443_v14, %v1331_v41  ;;  %1769 = vmatmul.f32.vlgmr.msra.gmra.mxu2 %v1608_v21  ;;  %v1110_v61 = vpop.f32.mrf.mxu1  ;;  %v1614_v41 = vld [vmem:[#allocation2 + $0x90] sm:$0xff] }
 0x17c   : > { %1513 = vmatmul.f32.gmra.mxu1 %v3592_v11  ;;  %v1111_v1 = vadd.f32 %v1110_v61, %v3249_v2 }
 0x17d   : > { %1995 = vmatmul.f32.vlgmr.msra.gmra.mxu0 %v1610_v30  ;;  %v1333_v27 = vpop.f32.mrf.mxu3 }
 0x17e   : > { %v1220_v49 = vpop.f32.mrf.mxu2 }
 0x17f   : > { %v1221_v16 = vadd.f32 %v1220_v49, %v1108_v46  ;;  %v1615_v46 = vld [vmem:[#allocation2 + $0x98] sm:$0xff] }
 0x181   : > { %v1334_v6 = vadd.f32 %v1333_v27, %v1221_v16  ;;  %v1616_v16 = vld [vmem:[#allocation2 + $0xa0] sm:$0xff] }
 0x182   : > { %v1449_v14 = vpop.f32.mrf.mxu0  ;;  %1885 = vmatmul.f32.gmra.mxu3 %v1612_v19 }
 0x183   : > { %v3599_v32 = vadd.f32 %v1446_v3, %v1334_v6  ;;  %1772 = vmatmul.f32.gmra.mxu2 %v1611_v47  ;;  %v1113_v26 = vpop.f32.mrf.mxu1  ;;  %v651_v47 = vld [vmem:[#allocation2 + $0x58] sm:$0xff] }
 0x184   : > { %1516 = vmatmul.f32.gmra.mxu1 %v648_v37  ;;  %v1114_v27 = vadd.f32 %v1113_v26, %v3268_v58 }
 0x185   : > { %1998 = vmatmul.f32.gmra.mxu0 %v1613_v54  ;;  %v1336_v21 = vpop.f32.mrf.mxu3 }
 0x186   : > { %v1223_v38 = vpop.f32.mrf.mxu2 }
 0x187   : > { %v1224_v7 = vadd.f32 %v1223_v38, %v1111_v1  ;;  %v1617_v1 = vld [vmem:[#allocation2 + $0xa8] sm:$0xff] }
 0x189   : > { %v1337_v10 = vadd.f32 %v1336_v21, %v1224_v7  ;;  %v1618_v7 = vld [vmem:[#allocation2 + $0xb0] sm:$0xff]  ;;  %v1619_v21 = vld [vmem:[#allocation2 + $0xb8] sm:$0xff] }
 0x18a   : > { %v1452_v3 = vpop.f32.mrf.mxu0  ;;  %1888 = vmatmul.f32.gmra.mxu3 %v1615_v46 }
 0x18b   : > { %v3602_v49 = vadd.f32 %v1449_v14, %v1337_v10  ;;  %1775 = vmatmul.f32.gmra.mxu2 %v1614_v41  ;;  %v1116_v61 = vpop.f32.mrf.mxu1 }
 0x18c   : > { %1519 = vmatmul.f32.gmra.mxu1 %v651_v47  ;;  %v1117_v41 = vadd.f32 %v1116_v61, %v3284_v17  ;;  %v1622_v47 = vld [vmem:[#allocation2 + $0xd0] sm:$0xff] }
 0x18d   : > { %3795 = vst [vmem:[#allocation3_spill] sm:$0xff] %v3602_v49  ;;  %2001 = vmatmul.f32.gmra.mxu0 %v1616_v16  ;;  %v1339_v19 = vpop.f32.mrf.mxu3  ;;  %v1621_v49 = vld [vmem:[#allocation2 + $0xc8] sm:$0xff] }
 0x18e   : > { %v1226_v2 = vpop.f32.mrf.mxu2 }
 0x18f   : > { %v1227_v6 = vadd.f32 %v1226_v2, %v1114_v27  ;;  %v1620_v27 = vld [vmem:[#allocation2 + $0xc0] sm:$0xff] }
 0x191   : > { %v1340_v38 = vadd.f32 %v1339_v19, %v1227_v6 }
 0x192   : > { %v1455_v14 = vpop.f32.mrf.mxu0  ;;  %1891 = vmatmul.f32.gmra.mxu3 %v1618_v7  ;;  %v1623_v7 = vld [vmem:[#allocation2 + $0xd8] sm:$0xff] }
 0x193   : > { %v3605_v37 = vadd.f32 %v1452_v3, %v1340_v38  ;;  %1778 = vmatmul.f32.gmra.mxu2 %v1617_v1  ;;  %v1119_v26 = vpop.f32.mrf.mxu1 }
 0x194   : > { %1522 = vmatmul.f32.gmra.mxu1 %v1610_v30  ;;  %v1120_v19 = vadd.f32 %v1119_v26, %v3304_v35 }
 0x195   : > { %2004 = vmatmul.f32.gmra.mxu0 %v1619_v21  ;;  %v1342_v46 = vpop.f32.mrf.mxu3 }
 0x196   : > { %v1229_v58 = vpop.f32.mrf.mxu2 }
 0x197   : > { %v1230_v10 = vadd.f32 %v1229_v58, %v1117_v41  ;;  %v1624_v58 = vld [vmem:[#allocation2 + $0xe0] sm:$0xff] }
 0x199   : > { %v1343_v2 = vadd.f32 %v1342_v46, %v1230_v10 }
 0x19a   : > { %v1458_v3 = vpop.f32.mrf.mxu0  ;;  %1894 = vmatmul.f32.gmra.mxu3 %v1621_v49 }
 0x19b   : > { %v3608_v6 = vadd.f32 %v1455_v14, %v1343_v2  ;;  %1781 = vmatmul.f32.gmra.mxu2 %v1620_v27  ;;  %v1122_v17 = vpop.f32.mrf.mxu1  ;;  %v1625_v14 = vld [vmem:[#allocation2 + $0xe8] sm:$0xff]  ;;  %v1626_v2 = vld [vmem:[#allocation2 + $0xf0] sm:$0xff] }
 0x19c   : > { %1525 = vmatmul.f32.gmra.mxu1 %v1613_v54  ;;  %v1123_v46 = vadd.f32 %v1122_v17, %v3321_v44 }
 0x19d   : > { %2007 = vmatmul.f32.gmra.mxu0 %v1622_v47  ;;  %v1345_v38 = vpop.f32.mrf.mxu3 }
 0x19e   : > { %v1232_v1 = vpop.f32.mrf.mxu2 }
 0x19f   : > { %v1233_v61 = vadd.f32 %v1232_v1, %v1120_v19  ;;  %v1627_v1 = vld [vmem:[#allocation2 + $0xf8] sm:$0xff] }
 0x1a1   : > { %v1346_v41 = vadd.f32 %v1345_v38, %v1233_v61 }
 0x1a2   : > { %v1461_v30 = vpop.f32.mrf.mxu0  ;;  %1897 = vmatmul.f32.gmra.mxu3 %v1624_v58  ;;  %v1629_v58 = vld [vmem:[#allocation2 + $0x108] sm:$0xff] }
 0x1a3   : > { %v3611_v10 = vadd.f32 %v1458_v3, %v1346_v41  ;;  %1784 = vmatmul.f32.gmra.mxu2 %v1623_v7  ;;  %v1125_v35 = vpop.f32.mrf.mxu1  ;;  %v1628_v3 = vld [vmem:[#allocation2 + $0x100] sm:$0xff] }
 0x1a4   : > { %1528 = vmatmul.f32.gmra.mxu1 %v1616_v16  ;;  %v1126_v38 = vadd.f32 %v1125_v35, %v3344_v25 }
 0x1a5   : > { %2010 = vmatmul.f32.gmra.mxu0 %v1625_v14  ;;  %v1348_v26 = vpop.f32.mrf.mxu3 }
 0x1a6   : > { %v1235_v27 = vpop.f32.mrf.mxu2 }
 0x1a7   : > { %v1236_v49 = vadd.f32 %v1235_v27, %v1123_v46  ;;  %v1630_v27 = vld [vmem:[#allocation2 + $0x110] sm:$0xff] }
 0x1a9   : > { %v1349_v19 = vadd.f32 %v1348_v26, %v1236_v49 }
 0x1aa   : > { %v1464_v54 = vpop.f32.mrf.mxu0  ;;  %1900 = vmatmul.f32.gmra.mxu3 %v1627_v1  ;;  %v1632_v1 = vld [vmem:[#allocation2 + $0x120] sm:$0xff] }
 0x1ab   : > { %v3614_v61 = vadd.f32 %v1461_v30, %v1349_v19  ;;  %1787 = vmatmul.f32.gmra.mxu2 %v1626_v2  ;;  %v1128_v44 = vpop.f32.mrf.mxu1  ;;  %v1631_v30 = vld [vmem:[#allocation2 + $0x118] sm:$0xff] }
 0x1ac   : > { %1531 = vmatmul.f32.gmra.mxu1 %v1619_v21  ;;  %v1129_v26 = vadd.f32 %v1128_v44, %v3361_v15 }
 0x1ad   : > { %2013 = vmatmul.f32.gmra.mxu0 %v1628_v3  ;;  %v1351_v41 = vpop.f32.mrf.mxu3 }
 0x1ae   : > { %v1238_v7 = vpop.f32.mrf.mxu2 }
 0x1af   : > { %v1239_v17 = vadd.f32 %v1238_v7, %v1126_v38  ;;  %v1633_v7 = vld [vmem:[#allocation2 + $0x128] sm:$0xff] }
 0x1b1   : > { %v1352_v46 = vadd.f32 %v1351_v41, %v1239_v17 }
 0x1b2   : > { %v1467_v16 = vpop.f32.mrf.mxu0  ;;  %1903 = vmatmul.f32.gmra.mxu3 %v1630_v27  ;;  %v1635_v27 = vld [vmem:[#allocation2 + $0x138] sm:$0xff] }
 0x1b3   : > { %v3617_v49 = vadd.f32 %v1464_v54, %v1352_v46  ;;  %1790 = vmatmul.f32.gmra.mxu2 %v1629_v58  ;;  %v1131_v25 = vpop.f32.mrf.mxu1  ;;  %v1634_v54 = vld [vmem:[#allocation2 + $0x130] sm:$0xff] }
 0x1b4   : > { %1534 = vmatmul.f32.gmra.mxu1 %v1622_v47  ;;  %v1132_v41 = vadd.f32 %v1131_v25, %v3237_v39 }
 0x1b5   : > { %2016 = vmatmul.f32.gmra.mxu0 %v1631_v30  ;;  %v1354_v19 = vpop.f32.mrf.mxu3 }
 0x1b6   : > { %v1241_v2 = vpop.f32.mrf.mxu2 }
 0x1b7   : > { %v1242_v35 = vadd.f32 %v1241_v2, %v1129_v26  ;;  %v1636_v2 = vld [vmem:[#allocation2 + $0x140] sm:$0xff] }
 0x1b9   : > { %v1355_v38 = vadd.f32 %v1354_v19, %v1242_v35 }
 0x1ba   : > { %v1470_v21 = vpop.f32.mrf.mxu0  ;;  %1906 = vmatmul.f32.gmra.mxu3 %v1633_v7  ;;  %v1638_v7 = vld [vmem:[#allocation2 + $0x150] sm:$0xff] }
 0x1bb   : > { %v3620_v17 = vadd.f32 %v1467_v16, %v1355_v38  ;;  %1793 = vmatmul.f32.gmra.mxu2 %v1632_v1  ;;  %v1134_v15 = vpop.f32.mrf.mxu1  ;;  %v1637_v16 = vld [vmem:[#allocation2 + $0x148] sm:$0xff] }
 0x1bc   : > { %1537 = vmatmul.f32.gmra.mxu1 %v1625_v14  ;;  %v1135_v19 = vadd.f32 %v1134_v15, %v3254_v50 }
 0x1bd   : > { %2019 = vmatmul.f32.gmra.mxu0 %v1634_v54  ;;  %v1357_v46 = vpop.f32.mrf.mxu3 }
 0x1be   : > { %v1244_v58 = vpop.f32.mrf.mxu2 }
 0x1bf   : > { %v1245_v44 = vadd.f32 %v1244_v58, %v1132_v41  ;;  %v1639_v58 = vld [vmem:[#allocation2 + $0x158] sm:$0xff] }
 0x1c1   : > { %v1358_v26 = vadd.f32 %v1357_v46, %v1245_v44 }
 0x1c2   : > { %v1473_v47 = vpop.f32.mrf.mxu0  ;;  %1909 = vmatmul.f32.gmra.mxu3 %v1636_v2  ;;  %v1641_v2 = vld [vmem:[#allocation2 + $0x168] sm:$0xff] }
 0x1c3   : > { %v3623_v35 = vadd.f32 %v1470_v21, %v1358_v26  ;;  %1796 = vmatmul.f32.gmra.mxu2 %v1635_v27  ;;  %v1137_v39 = vpop.f32.mrf.mxu1  ;;  %v1640_v21 = vld [vmem:[#allocation2 + $0x160] sm:$0xff] }
 0x1c4   : > { %1540 = vmatmul.f32.gmra.mxu1 %v1628_v3  ;;  %v1138_v46 = vadd.f32 %v1137_v39, %v3272_v57 }
 0x1c5   : > { %2022 = vmatmul.f32.gmra.mxu0 %v1637_v16  ;;  %v1360_v38 = vpop.f32.mrf.mxu3 }
 0x1c6   : > { %v1247_v1 = vpop.f32.mrf.mxu2 }
 0x1c7   : > { %v1248_v25 = vadd.f32 %v1247_v1, %v1135_v19  ;;  %v1642_v1 = vld [vmem:[#allocation2 + $0x170] sm:$0xff] }
 0x1c9   : > { %v1361_v41 = vadd.f32 %v1360_v38, %v1248_v25 }
 0x1ca   : > { %v1476_v14 = vpop.f32.mrf.mxu0  ;;  %1912 = vmatmul.f32.gmra.mxu3 %v1639_v58  ;;  %v1644_v58 = vld [vmem:[#allocation2 + $0x180] sm:$0xff] }
 0x1cb   : > { %v3626_v44 = vadd.f32 %v1473_v47, %v1361_v41  ;;  %1799 = vmatmul.f32.gmra.mxu2 %v1638_v7  ;;  %v1140_v50 = vpop.f32.mrf.mxu1  ;;  %v1643_v47 = vld [vmem:[#allocation2 + $0x178] sm:$0xff] }
 0x1cc   : > { %1543 = vmatmul.f32.gmra.mxu1 %v1631_v30  ;;  %v1141_v38 = vadd.f32 %v1140_v50, %v3289_v18 }
 0x1cd   : > { %2025 = vmatmul.f32.gmra.mxu0 %v1640_v21  ;;  %v1363_v26 = vpop.f32.mrf.mxu3 }
 0x1ce   : > { %v1250_v27 = vpop.f32.mrf.mxu2 }
 0x1cf   : > { %v1251_v15 = vadd.f32 %v1250_v27, %v1138_v46  ;;  %v1645_v27 = vld [vmem:[#allocation2 + $0x188] sm:$0xff] }
 0x1d1   : > { %v1364_v19 = vadd.f32 %v1363_v26, %v1251_v15 }
 0x1d2   : > { %v1479_v3 = vpop.f32.mrf.mxu0  ;;  %1915 = vmatmul.f32.gmra.mxu3 %v1642_v1  ;;  %v1647_v1 = vld [vmem:[#allocation2 + $0x198] sm:$0xff] }
 0x1d3   : > { %v3629_v25 = vadd.f32 %v1476_v14, %v1364_v19  ;;  %1802 = vmatmul.f32.gmra.mxu2 %v1641_v2  ;;  %v1143_v57 = vpop.f32.mrf.mxu1  ;;  %v1646_v14 = vld [vmem:[#allocation2 + $0x190] sm:$0xff] }
 0x1d4   : > { %1546 = vmatmul.f32.gmra.mxu1 %v1634_v54  ;;  %v1144_v26 = vadd.f32 %v1143_v57, %v3309_v60 }
 0x1d5   : > { %2028 = vmatmul.f32.gmra.mxu0 %v1643_v47  ;;  %v1366_v41 = vpop.f32.mrf.mxu3 }
 0x1d6   : > { %v1253_v7 = vpop.f32.mrf.mxu2 }
 0x1d7   : > { %v1254_v39 = vadd.f32 %v1253_v7, %v1141_v38  ;;  %v1648_v7 = vld [vmem:[#allocation2 + $0x1a0] sm:$0xff] }
 0x1d9   : > { %v1367_v46 = vadd.f32 %v1366_v41, %v1254_v39 }
 0x1da   : > { %v1482_v30 = vpop.f32.mrf.mxu0  ;;  %1918 = vmatmul.f32.gmra.mxu3 %v1645_v27  ;;  %v1650_v27 = vld [vmem:[#allocation2 + $0x1b0] sm:$0xff] }
 0x1db   : > { %v3632_v15 = vadd.f32 %v1479_v3, %v1367_v46  ;;  %1805 = vmatmul.f32.gmra.mxu2 %v1644_v58  ;;  %v1146_v18 = vpop.f32.mrf.mxu1  ;;  %v1649_v3 = vld [vmem:[#allocation2 + $0x1a8] sm:$0xff] }
 0x1dc   : > { %1549 = vmatmul.f32.gmra.mxu1 %v1637_v16  ;;  %v1147_v41 = vadd.f32 %v1146_v18, %v3326_v45 }
 0x1dd   : > { %2031 = vmatmul.f32.gmra.mxu0 %v1646_v14  ;;  %v1369_v19 = vpop.f32.mrf.mxu3 }
 0x1de   : > { %v1256_v2 = vpop.f32.mrf.mxu2 }
 0x1df   : > { %v1257_v50 = vadd.f32 %v1256_v2, %v1144_v26  ;;  %v1651_v2 = vld [vmem:[#allocation2 + $0x1b8] sm:$0xff] }
 0x1e1   : > { %v1370_v38 = vadd.f32 %v1369_v19, %v1257_v50 }
 0x1e2   : > { %v1485_v54 = vpop.f32.mrf.mxu0  ;;  %1921 = vmatmul.f32.gmra.mxu3 %v1648_v7  ;;  %v1653_v7 = vld [vmem:[#allocation2 + $0x1c8] sm:$0xff] }
 0x1e3   : > { %v3635_v39 = vadd.f32 %v1482_v30, %v1370_v38  ;;  %1808 = vmatmul.f32.gmra.mxu2 %v1647_v1  ;;  %v1149_v60 = vpop.f32.mrf.mxu1  ;;  %v1652_v30 = vld [vmem:[#allocation2 + $0x1c0] sm:$0xff] }
 0x1e4   : > { %1552 = vmatmul.f32.gmra.mxu1 %v1640_v21  ;;  %v1150_v19 = vadd.f32 %v1149_v60, %v3349_v13 }
 0x1e5   : > { %2034 = vmatmul.f32.gmra.mxu0 %v1649_v3  ;;  %v1372_v46 = vpop.f32.mrf.mxu3 }
 0x1e6   : > { %v1259_v58 = vpop.f32.mrf.mxu2 }
 0x1e7   : > { %v1260_v57 = vadd.f32 %v1259_v58, %v1147_v41  ;;  %v1654_v58 = vld [vmem:[#allocation2 + $0x1d0] sm:$0xff] }
 0x1e9   : > { %v1373_v26 = vadd.f32 %v1372_v46, %v1260_v57 }
 0x1ea   : > { %v1488_v16 = vpop.f32.mrf.mxu0  ;;  %1924 = vmatmul.f32.gmra.mxu3 %v1651_v2  ;;  %v1656_v2 = vld [vmem:[#allocation2 + $0x1e0] sm:$0xff] }
 0x1eb   : > { %v3638_v50 = vadd.f32 %v1485_v54, %v1373_v26  ;;  %1811 = vmatmul.f32.gmra.mxu2 %v1650_v27  ;;  %v1152_v45 = vpop.f32.mrf.mxu1  ;;  %v1655_v54 = vld [vmem:[#allocation2 + $0x1d8] sm:$0xff] }
 0x1ec   : > { %1555 = vmatmul.f32.gmra.mxu1 %v1643_v47  ;;  %v1153_v46 = vadd.f32 %v1152_v45, %v3366_v34  ;;  %v1659_v45 = vld [vmem:[#allocation2 + $0x1f8] sm:$0xff] }
 0x1ed   : > { %2037 = vmatmul.f32.gmra.mxu0 %v1652_v30  ;;  %v1375_v38 = vpop.f32.mrf.mxu3 }
 0x1ee   : > { %v1262_v1 = vpop.f32.mrf.mxu2 }
 0x1ef   : > { %v1263_v18 = vadd.f32 %v1262_v1, %v1150_v19  ;;  %v1657_v1 = vld [vmem:[#allocation2 + $0x1e8] sm:$0xff] }
 0x1f1   : > { %v1376_v41 = vadd.f32 %v1375_v38, %v1263_v18 }
 0x1f2   : > { %v1491_v21 = vpop.f32.mrf.mxu0  ;;  %1927 = vmatmul.f32.gmra.mxu3 %v1654_v58  ;;  %v1660_v58 = vld [vmem:[#allocation2 + $0x200] sm:$0xff] }
 0x1f3   : > { %v3641_v57 = vadd.f32 %v1488_v16, %v1376_v41  ;;  %1814 = vmatmul.f32.gmra.mxu2 %v1653_v7  ;;  %v1511_v13 = vpop.f32.mrf.mxu1  ;;  %v1658_v16 = vld [vmem:[#allocation2 + $0x1f0] sm:$0xff] }
 0x1f4   : > { %1558 = vmatmul.f32.gmra.mxu1 %v1646_v14 }
 0x1f5   : > { %2040 = vmatmul.f32.gmra.mxu0 %v1655_v54  ;;  %v1378_v26 = vpop.f32.mrf.mxu3 }
 0x1f6   : > { %v1265_v27 = vpop.f32.mrf.mxu2 }
 0x1f7   : > { %v1266_v60 = vadd.f32 %v1265_v27, %v1153_v46  ;;  %v1512_v46 = vadd.f32 %v1511_v13, %v3387_v23 }
 0x1f9   : > { %v1379_v19 = vadd.f32 %v1378_v26, %v1266_v60 }
 0x1fa   : > { %v1996_v47 = vpop.f32.mrf.mxu0  ;;  %1930 = vmatmul.f32.gmra.mxu3 %v1657_v1 }
 0x1fb   : > { %v3644_v18 = vadd.f32 %v1491_v21, %v1379_v19  ;;  %1817 = vmatmul.f32.gmra.mxu2 %v1656_v2  ;;  %v1514_v7 = vpop.f32.mrf.mxu1  ;;  %v3654_v21 = vld [vmem:[#allocation2 + $0x208] sm:$0xff]  ;;  %v1663_v19 = vld [vmem:[#allocation2 + $0x218] sm:$0xff] }
 0x1fc   : > { %1561 = vmatmul.f32.gmra.mxu1 %v1649_v3  ;;  %v1662_v3 = vld [vmem:[#allocation2 + $0x210] sm:$0xff]  ;;  %v1515_v1 = vadd.f32 %v1514_v7, %v3403_v51 }
 0x1fd   : > { %3796 = vst [vmem:[#allocation4_spill] sm:$0xff] %v3644_v18  ;;  %2043 = vmatmul.f32.gmra.mxu0 %v1658_v16  ;;  %v1883_v34 = vpop.f32.mrf.mxu3 }
 0x1fe   : > { %v1770_v38 = vpop.f32.mrf.mxu2 }
 0x1ff   : > { %v1884_v41 = vadd.f32 %v1883_v34, %v1770_v38  ;;  %v3659_v34 = vld [vmem:[#allocation2 + $0x220] sm:$0xff] }
 0x201   : > { %v1997_v27 = vadd.f32 %v1996_v47, %v1884_v41 }
 0x202   : > { %v1999_v14 = vpop.f32.mrf.mxu0  ;;  %1933 = vmatmul.f32.gmra.mxu3 %v1660_v58 }
 0x203   : > { %1820 = vmatmul.f32.gmra.mxu2 %v1659_v45  ;;  %v2092_v60 = vadd.f32 %v1997_v27, %v1512_v46  ;;  %v1517_v2 = vpop.f32.mrf.mxu1 }
 0x204   : > { %1564 = vmatmul.f32.gmra.mxu1 %v1652_v30  ;;  %v1665_v30 = vld [vmem:[#allocation2 + $0x228] sm:$0xff]  ;;  %v1518_v7 = vadd.f32 %v1517_v2, %v3421_v9 }
 0x205   : > { %2232 = vst [vmem:[%s3652_s13] sm:$0xff] %v2092_v60  ;;  %2046 = vmatmul.f32.gmra.mxu0 %v3654_v21  ;;  %v1886_v23 = vpop.f32.mrf.mxu3  ;;  %v2162_v46 = vmul.f32 %v2092_v60, %v2092_v60 }
 0x206   : > { %v1773_v26 = vpop.f32.mrf.mxu2 }
 0x207   : > { %v1887_v13 = vadd.f32 %v1886_v23, %v1773_v26 }
 0x209   : > { %v2000_v47 = vadd.f32 %v1999_v14, %v1887_v13  ;;  %v3664_v13 = vld [vmem:[#allocation2 + $0x238] sm:$0xff] }
 0x20a   : > { %v2002_v38 = vpop.f32.mrf.mxu0  ;;  %1936 = vmatmul.f32.gmra.mxu3 %v1663_v19 }
 0x20b   : > { %1823 = vmatmul.f32.gmra.mxu2 %v1662_v3  ;;  %v2093_v45 = vadd.f32 %v2000_v47, %v1515_v1  ;;  %v1520_v58 = vpop.f32.mrf.mxu1 }
 0x20c   : > { %1567 = vmatmul.f32.gmra.mxu1 %v1655_v54  ;;  %v1521_v9 = vadd.f32 %v1520_v58, %v3434_v5 }
 0x20d   : > { %v2124_v27 = vadd.f32 %v2093_v45, %v2092_v60  ;;  %v2163_v18 = vmul.f32 %v2093_v45, %v2093_v45  ;;  %2233 = vst [vmem:[%s3652_s13 + $0x8] sm:$0xff] %v2093_v45  ;;  %2049 = vmatmul.f32.gmra.mxu0 %v3659_v34  ;;  %v1889_v26 = vpop.f32.mrf.mxu3 }
 0x20e   : > { %v1776_v41 = vpop.f32.mrf.mxu2 }
 0x20f   : > { %v2194_v23 = vadd.f32 %v2163_v18, %v2162_v46  ;;  %v1890_v51 = vadd.f32 %v1889_v26, %v1776_v41  ;;  %v3671_v46 = vld [vmem:[#allocation2 + $0x250] sm:$0xff] }
 0x211   : > { %v2003_v14 = vadd.f32 %v2002_v38, %v1890_v51 }
 0x212   : > { %v2005_v3 = vpop.f32.mrf.mxu0  ;;  %1939 = vmatmul.f32.gmra.mxu3 %v3480_v29 }
 0x213   : > { %1826 = vmatmul.f32.gmra.mxu2 %v1665_v30  ;;  %v2094_v19 = vadd.f32 %v2003_v14, %v1518_v7  ;;  %v1523_v1 = vpop.f32.mrf.mxu1 }
 0x214   : > { %1570 = vmatmul.f32.gmra.mxu1 %v1658_v16 }
 0x215   : > { %v2125_v47 = vadd.f32 %v2124_v27, %v2094_v19  ;;  %v2164_v45 = vmul.f32 %v2094_v19, %v2094_v19  ;;  %2234 = vst [vmem:[%s3652_s13 + $0x10] sm:$0xff] %v2094_v19  ;;  %2052 = vmatmul.f32.gmra.mxu0 %v3664_v13  ;;  %v1892_v18 = vpop.f32.mrf.mxu3 }
 0x216   : > { %v1779_v60 = vpop.f32.mrf.mxu2 }
 0x217   : > { %v2195_v54 = vadd.f32 %v2194_v23, %v2164_v45  ;;  %v1893_v41 = vadd.f32 %v1892_v18, %v1779_v60 }
 0x219   : > { %v2006_v2 = vadd.f32 %v2005_v3, %v1893_v41 }
 0x21a   : > { %v2008_v38 = vpop.f32.mrf.mxu0  ;;  %1942 = vmatmul.f32.gmra.mxu3 %v3500_v42  ;;  %v3679_v42 = vld [vmem:[#allocation2 + $0x268] sm:$0xff] }
 0x21b   : > { %1829 = vmatmul.f32.gmra.mxu2 %v3493_v33  ;;  %v2095_v29 = vadd.f32 %v2006_v2, %v1521_v9  ;;  %v1526_v26 = vpop.f32.mrf.mxu1  ;;  %v1524_v33 = vadd.f32 %v1523_v1, %v3450_v28 }
 0x21c   : > { %1573 = vmatmul.f32.gmra.mxu1 %v3654_v21  ;;  %v1527_v1 = vadd.f32 %v1526_v26, %v3462_v63  ;;  %v1678_v63 = vld [vmem:[#allocation2 + $0x290] sm:$0xff] }
 0x21d   : > { %v2126_v30 = vadd.f32 %v2125_v47, %v2095_v29  ;;  %v2165_v51 = vmul.f32 %v2095_v29, %v2095_v29  ;;  %2235 = vst [vmem:[%s3652_s13 + $0x18] sm:$0xff] %v2095_v29  ;;  %2055 = vmatmul.f32.gmra.mxu0 %v3671_v46  ;;  %v1895_v16 = vpop.f32.mrf.mxu3 }
 0x21e   : > { %v1782_v27 = vpop.f32.mrf.mxu2 }
 0x21f   : > { %v2196_v23 = vadd.f32 %v2195_v54, %v2165_v51  ;;  %v1896_v5 = vadd.f32 %v1895_v16, %v1782_v27  ;;  %v3687_v54 = vld [vmem:[#allocation2 + $0x280] sm:$0xff]  ;;  %v3694_v16 = vld [vmem:[#allocation2 + $0x298] sm:$0xff] }
 0x221   : > { %v2009_v58 = vadd.f32 %v2008_v38, %v1896_v5 }
 0x222   : > { %v2011_v7 = vpop.f32.mrf.mxu0  ;;  %1945 = vmatmul.f32.gmra.mxu3 %v3522_v8 }
 0x223   : > { %1832 = vmatmul.f32.gmra.mxu2 %v3518_v12  ;;  %v2096_v14 = vadd.f32 %v2009_v58, %v1524_v33  ;;  %v1529_v19 = vpop.f32.mrf.mxu1  ;;  %v1675_v12 = vld [vmem:[#allocation2 + $0x278] sm:$0xff] }
 0x224   : > { %1576 = vmatmul.f32.gmra.mxu1 %v3659_v34 }
 0x225   : > { %v2127_v60 = vadd.f32 %v2126_v30, %v2096_v14  ;;  %v2166_v47 = vmul.f32 %v2096_v14, %v2096_v14  ;;  %2236 = vst [vmem:[%s3652_s13 + $0x20] sm:$0xff] %v2096_v14  ;;  %2058 = vmatmul.f32.gmra.mxu0 %v3679_v42  ;;  %v1898_v45 = vpop.f32.mrf.mxu3 }
 0x226   : > { %v1785_v3 = vpop.f32.mrf.mxu2 }
 0x227   : > { %v2197_v21 = vadd.f32 %v2196_v23, %v2166_v47  ;;  %v1899_v28 = vadd.f32 %v1898_v45, %v1785_v3  ;;  %v3701_v47 = vld [vmem:[#allocation2 + $0x2b0] sm:$0xff] }
 0x229   : > { %v2012_v18 = vadd.f32 %v2011_v7, %v1899_v28 }
 0x22a   : > { %v2014_v8 = vpop.f32.mrf.mxu0  ;;  %1948 = vmatmul.f32.gmra.mxu3 %v1675_v12 }
 0x22b   : > { %1835 = vmatmul.f32.gmra.mxu2 %v3533_v40  ;;  %v2097_v41 = vadd.f32 %v2012_v18, %v1527_v1  ;;  %v1532_v2 = vpop.f32.mrf.mxu1  ;;  %v1530_v40 = vadd.f32 %v1529_v19, %v3478_v22  ;;  %v1681_v22 = vld [vmem:[#allocation2 + $0x2a8] sm:$0xff] }
 0x22c   : > { %1579 = vmatmul.f32.gmra.mxu1 %v3664_v13 }
 0x22d   : > { %v2128_v38 = vadd.f32 %v2127_v60, %v2097_v41  ;;  %v2167_v29 = vmul.f32 %v2097_v41, %v2097_v41  ;;  %2237 = vst [vmem:[%s3652_s13 + $0x28] sm:$0xff] %v2097_v41  ;;  %2061 = vmatmul.f32.gmra.mxu0 %v3687_v54  ;;  %v1901_v27 = vpop.f32.mrf.mxu3 }
 0x22e   : > { %v1788_v9 = vpop.f32.mrf.mxu2 }
 0x22f   : > { %v2198_v34 = vadd.f32 %v2197_v21, %v2167_v29  ;;  %v1902_v30 = vadd.f32 %v1901_v27, %v1788_v9 }
 0x231   : > { %v2015_v26 = vadd.f32 %v2014_v8, %v1902_v30 }
 0x232   : > { %v2017_v51 = vpop.f32.mrf.mxu0  ;;  %1951 = vmatmul.f32.gmra.mxu3 %v1678_v63 }
 0x233   : > { %1838 = vmatmul.f32.gmra.mxu2 %v3553_v59  ;;  %v2098_v23 = vadd.f32 %v2015_v26, %v1530_v40  ;;  %v1535_v33 = vpop.f32.mrf.mxu1  ;;  %v1533_v59 = vadd.f32 %v1532_v2, %v3497_v62  ;;  %v1684_v62 = vld [vmem:[#allocation2 + $0x2c0] sm:$0xff]  ;;  %v3708_v2 = vld [vmem:[#allocation2 + $0x2c8] sm:$0xff] }
 0x234   : > { %1582 = vmatmul.f32.gmra.mxu1 %v3671_v46 }
 0x235   : > { %v2129_v58 = vadd.f32 %v2128_v38, %v2098_v23  ;;  %v2168_v7 = vmul.f32 %v2098_v23, %v2098_v23  ;;  %2238 = vst [vmem:[%s3652_s13 + $0x30] sm:$0xff] %v2098_v23  ;;  %2064 = vmatmul.f32.gmra.mxu0 %v3694_v16  ;;  %v1904_v14 = vpop.f32.mrf.mxu3  ;;  %v3715_v23 = vld [vmem:[#allocation2 + $0x2e0] sm:$0xff] }
 0x236   : > { %v1791_v5 = vpop.f32.mrf.mxu2 }
 0x237   : > { %v2199_v13 = vadd.f32 %v2198_v34, %v2168_v7  ;;  %v1905_v3 = vadd.f32 %v1904_v14, %v1791_v5 }
 0x239   : > { %v2018_v19 = vadd.f32 %v2017_v51, %v1905_v3 }
 0x23a   : > { %v2020_v60 = vpop.f32.mrf.mxu0  ;;  %1954 = vmatmul.f32.gmra.mxu3 %v1681_v22 }
 0x23b   : > { %1841 = vmatmul.f32.gmra.mxu2 %v3566_v43  ;;  %v2099_v45 = vadd.f32 %v2018_v19, %v1533_v59  ;;  %v1538_v28 = vpop.f32.mrf.mxu1  ;;  %v1536_v43 = vadd.f32 %v1535_v33, %v3520_v4  ;;  %v1687_v4 = vld [vmem:[#allocation2 + $0x2d8] sm:$0xff] }
 0x23c   : > { %1585 = vmatmul.f32.gmra.mxu1 %v3679_v42  ;;  %v3722_v19 = vld [vmem:[#allocation2 + $0x2f8] sm:$0xff] }
 0x23d   : > { %v2130_v12 = vadd.f32 %v2129_v58, %v2099_v45  ;;  %v2169_v1 = vmul.f32 %v2099_v45, %v2099_v45  ;;  %2239 = vst [vmem:[%s3652_s13 + $0x38] sm:$0xff] %v2099_v45  ;;  %2067 = vmatmul.f32.gmra.mxu0 %v3701_v47  ;;  %v1907_v18 = vpop.f32.mrf.mxu3 }
 0x23e   : > { %v1794_v21 = vpop.f32.mrf.mxu2 }
 0x23f   : > { %v2200_v46 = vadd.f32 %v2199_v13, %v2169_v1  ;;  %v1908_v8 = vadd.f32 %v1907_v18, %v1794_v21 }
 0x241   : > { %v2021_v41 = vadd.f32 %v2020_v60, %v1908_v8 }
 0x242   : > { %v2023_v9 = vpop.f32.mrf.mxu0  ;;  %1957 = vmatmul.f32.gmra.mxu3 %v1684_v62 }
 0x243   : > { %1844 = vmatmul.f32.gmra.mxu2 %v3573_v53  ;;  %v2100_v38 = vadd.f32 %v2021_v41, %v1536_v43  ;;  %v1541_v27 = vpop.f32.mrf.mxu1  ;;  %v1539_v53 = vadd.f32 %v1538_v28, %v3537_v48  ;;  %v1690_v48 = vld [vmem:[#allocation2 + $0x2f0] sm:$0xff] }
 0x244   : > { %1588 = vmatmul.f32.gmra.mxu1 %v3687_v54  ;;  %v1694_v43 = vld [vmem:[#allocation2 + $0x310] sm:$0xff] }
 0x245   : > { %v2131_v34 = vadd.f32 %v2130_v12, %v2100_v38  ;;  %v2170_v30 = vmul.f32 %v2100_v38, %v2100_v38  ;;  %2240 = vst [vmem:[%s3652_s13 + $0x40] sm:$0xff] %v2100_v38  ;;  %2070 = vmatmul.f32.gmra.mxu0 %v3708_v2  ;;  %v1910_v63 = vpop.f32.mrf.mxu3 }
 0x246   : > { %v1797_v29 = vpop.f32.mrf.mxu2 }
 0x247   : > { %v2201_v42 = vadd.f32 %v2200_v46, %v2170_v30  ;;  %v1911_v40 = vadd.f32 %v1910_v63, %v1797_v29  ;;  %v1695_v30 = vld [vmem:[#allocation2 + $0x318] sm:$0xff] }
 0x249   : > { %v2024_v26 = vadd.f32 %v2023_v9, %v1911_v40 }
 0x24a   : > { %v2026_v51 = vpop.f32.mrf.mxu0  ;;  %1960 = vmatmul.f32.gmra.mxu3 %v1687_v4 }
 0x24b   : > { %1847 = vmatmul.f32.gmra.mxu2 %v3579_v36  ;;  %v2101_v5 = vadd.f32 %v2024_v26, %v1539_v53  ;;  %v1544_v58 = vpop.f32.mrf.mxu1  ;;  %v1542_v36 = vadd.f32 %v1541_v27, %v3555_v20  ;;  %v1697_v53 = vld [vmem:[#allocation2 + $0x328] sm:$0xff] }
 0x24c   : > { %1591 = vmatmul.f32.gmra.mxu1 %v3694_v16  ;;  %v1692_v16 = vld [vmem:[#allocation2 + $0x300] sm:$0xff]  ;;  %v1545_v46 = vadd.f32 %v1544_v58, %v3568_v52 }
 0x24d   : > { %v2132_v7 = vadd.f32 %v2131_v34, %v2101_v5  ;;  %v2171_v14 = vmul.f32 %v2101_v5, %v2101_v5  ;;  %2241 = vst [vmem:[%s3652_s13 + $0x48] sm:$0xff] %v2101_v5  ;;  %2073 = vmatmul.f32.gmra.mxu0 %v3715_v23  ;;  %v1913_v13 = vpop.f32.mrf.mxu3  ;;  %v1696_v52 = vld [vmem:[#allocation2 + $0x320] sm:$0xff] }
 0x24e   : > { %v1800_v33 = vpop.f32.mrf.mxu2 }
 0x24f   : > { %v2202_v54 = vadd.f32 %v2201_v42, %v2171_v14  ;;  %v1914_v3 = vadd.f32 %v1913_v13, %v1800_v33 }
 0x251   : > { %v2027_v22 = vadd.f32 %v2026_v51, %v1914_v3 }
 0x252   : > { %v2029_v59 = vpop.f32.mrf.mxu0  ;;  %1963 = vmatmul.f32.gmra.mxu3 %v1690_v48 }
 0x253   : > { %1850 = vmatmul.f32.gmra.mxu2 %v3586_v0  ;;  %v2102_v60 = vadd.f32 %v2027_v22, %v1542_v36  ;;  %v1547_v21 = vpop.f32.mrf.mxu1  ;;  %v1693_v0 = vld [vmem:[#allocation2 + $0x308] sm:$0xff] }
 0x254   : > { %1594 = vmatmul.f32.gmra.mxu1 %v3701_v47  ;;  %v1548_v42 = vadd.f32 %v1547_v21, %v3575_v31 }
 0x255   : > { %v2133_v28 = vadd.f32 %v2132_v7, %v2102_v60  ;;  %v2172_v12 = vmul.f32 %v2102_v60, %v2102_v60  ;;  %2242 = vst [vmem:[%s3652_s13 + $0x50] sm:$0xff] %v2102_v60  ;;  %2076 = vmatmul.f32.gmra.mxu0 %v3722_v19  ;;  %v1916_v1 = vpop.f32.mrf.mxu3 }
 0x256   : > { %v1803_v45 = vpop.f32.mrf.mxu2 }
 0x257   : > { %v2203_v18 = vadd.f32 %v2202_v54, %v2172_v12  ;;  %v1917_v20 = vadd.f32 %v1916_v1, %v1803_v45 }
 0x259   : > { %v2030_v8 = vadd.f32 %v2029_v59, %v1917_v20 }
 0x25a   : > { %v2032_v62 = vpop.f32.mrf.mxu0  ;;  %1966 = vmatmul.f32.gmra.mxu3 %v1693_v0  ;;  %v2538_v0 = vld [vmem:[#allocation2] sm:$0xff] }
 0x25b   : > { %1853 = vmatmul.f32.gmra.mxu2 %v1692_v16  ;;  %v2103_v41 = vadd.f32 %v2030_v8, %v1545_v46  ;;  %v1550_v38 = vpop.f32.mrf.mxu1 }
 0x25c   : > { %1597 = vmatmul.f32.gmra.mxu1 %v3708_v2  ;;  %v1551_v31 = vadd.f32 %v1550_v38, %v3581_v55 }
 0x25d   : > { %v2134_v29 = vadd.f32 %v2133_v28, %v2103_v41  ;;  %v2173_v27 = vmul.f32 %v2103_v41, %v2103_v41  ;;  %2243 = vst [vmem:[%s3652_s13 + $0x58] sm:$0xff] %v2103_v41  ;;  %2079 = vmatmul.f32.gmra.mxu0 %v1694_v43  ;;  %v1919_v34 = vpop.f32.mrf.mxu3 }
 0x25e   : > { %v1806_v9 = vpop.f32.mrf.mxu2 }
 0x25f   : > { %v2204_v63 = vadd.f32 %v2203_v18, %v2173_v27  ;;  %v1920_v47 = vadd.f32 %v1919_v34, %v1806_v9 }
 0x261   : > { %v2033_v40 = vadd.f32 %v2032_v62, %v1920_v47 }
 0x262   : > { %v2035_v4 = vpop.f32.mrf.mxu0  ;;  %1969 = vmatmul.f32.gmra.mxu3 %v1696_v52 }
 0x263   : > { %1856 = vmatmul.f32.gmra.mxu2 %v1695_v30  ;;  %v2104_v26 = vadd.f32 %v2033_v40, %v1548_v42  ;;  %v1553_v5 = vpop.f32.mrf.mxu1 }
 0x264   : > { %1600 = vmatmul.f32.gmra.mxu1 %v3715_v23  ;;  %v1554_v55 = vadd.f32 %v1553_v5, %v3588_v56 }
 0x265   : > { %v2135_v33 = vadd.f32 %v2134_v29, %v2104_v26  ;;  %v2174_v58 = vmul.f32 %v2104_v26, %v2104_v26  ;;  %2244 = vst [vmem:[%s3652_s13 + $0x60] sm:$0xff] %v2104_v26  ;;  %2082 = vmatmul.f32.gmra.mxu0 %v1697_v53  ;;  %v1922_v7 = vpop.f32.mrf.mxu3 }
 0x266   : > { %v1809_v51 = vpop.f32.mrf.mxu2 }
 0x267   : > { %v2205_v14 = vadd.f32 %v2204_v63, %v2174_v58  ;;  %v1923_v13 = vadd.f32 %v1922_v7, %v1809_v51 }
 0x269   : > { %v2036_v2 = vadd.f32 %v2035_v4, %v1923_v13 }
 0x26a   : > { %v2038_v54 = vpop.f32.mrf.mxu0  ;;  %1972 = vmatmul.f32.gmra.mxu3 %v3592_v11 }
 0x26b   : > { %1859 = vmatmul.f32.gmra.mxu2 %v3592_v11  ;;  %v2105_v3 = vadd.f32 %v2036_v2, %v1551_v31  ;;  %v1556_v36 = vpop.f32.mrf.mxu1 }
 0x26c   : > { %1603 = vmatmul.f32.gmra.mxu1 %v3722_v19  ;;  %v1557_v56 = vadd.f32 %v1556_v36, %v3595_v24 }
 0x26d   : > { %v2136_v22 = vadd.f32 %v2135_v33, %v2105_v3  ;;  %v2175_v59 = vmul.f32 %v2105_v3, %v2105_v3  ;;  %2245 = vst [vmem:[%s3652_s13 + $0x68] sm:$0xff] %v2105_v3  ;;  %2085 = vmatmul.f32.gmra.mxu0 %v3592_v11  ;;  %v1925_v60 = vpop.f32.mrf.mxu3  ;;  %v3797_v33 = vld [vmem:[#allocation3_spill] sm:$0xff] }
 0x26e   : > { %v1812_v48 = vpop.f32.mrf.mxu2 }
 0x26f   : > { %v2206_v45 = vadd.f32 %v2205_v14, %v2175_v59  ;;  %v1926_v23 = vadd.f32 %v1925_v60, %v1812_v48 }
 0x271   : > { %v2039_v21 = vadd.f32 %v2038_v54, %v1926_v23 }
 0x272   : > { %v2041_v28 = vpop.f32.mrf.mxu0  ;;  %1975 = vmatmul.f32.gmra.mxu3 %v3592_v11 }
 0x273   : > { %1862 = vmatmul.f32.gmra.mxu2 %v3592_v11  ;;  %v2106_v12 = vadd.f32 %v2039_v21, %v1554_v55  ;;  %v1559_v16 = vpop.f32.mrf.mxu1 }
 0x274   : > { %v1560_v63 = vadd.f32 %v1559_v16, %v3599_v32 }
 0x275   : > { %v2137_v18 = vadd.f32 %v2136_v22, %v2106_v12  ;;  %v2176_v20 = vmul.f32 %v2106_v12, %v2106_v12  ;;  %2246 = vst [vmem:[%s3652_s13 + $0x70] sm:$0xff] %v2106_v12  ;;  %2088 = vmatmul.f32.gmra.mxu0 %v2538_v0  ;;  %v1928_v46 = vpop.f32.mrf.mxu3 }
 0x276   : > { %v1815_v1 = vpop.f32.mrf.mxu2 }
 0x277   : > { %v2207_v8 = vadd.f32 %v2206_v45, %v2176_v20  ;;  %v1929_v19 = vadd.f32 %v1928_v46, %v1815_v1 }
 0x279   : > { %v2042_v62 = vadd.f32 %v2041_v28, %v1929_v19 }
 0x27a   : > { %v2044_v43 = vpop.f32.mrf.mxu0 }
 0x27b   : > { %v2107_v41 = vadd.f32 %v2042_v62, %v1557_v56  ;;  %v1562_v38 = vpop.f32.mrf.mxu1 }
 0x27c   : > { %v1563_v58 = vadd.f32 %v1562_v38, %v3797_v33 }
 0x27d   : > { %v2138_v11 = vadd.f32 %v2137_v18, %v2107_v41  ;;  %v2177_v29 = vmul.f32 %v2107_v41, %v2107_v41  ;;  %2247 = vst [vmem:[%s3652_s13 + $0x78] sm:$0xff] %v2107_v41  ;;  %v1931_v27 = vpop.f32.mrf.mxu3 }
 0x27e   : > { %v1818_v9 = vpop.f32.mrf.mxu2 }
 0x27f   : > { %v2208_v34 = vadd.f32 %v2207_v8, %v2177_v29  ;;  %v1932_v30 = vadd.f32 %v1931_v27, %v1818_v9 }
 0x281   : > { %v2045_v47 = vadd.f32 %v2044_v43, %v1932_v30 }
 0x282   : > { %v2047_v52 = vpop.f32.mrf.mxu0 }
 0x283   : > { %v2108_v42 = vadd.f32 %v2045_v47, %v1560_v63  ;;  %v1565_v24 = vpop.f32.mrf.mxu1 }
 0x284   : > { %v1566_v22 = vadd.f32 %v1565_v24, %v3605_v37 }
 0x285   : > { %v2139_v4 = vadd.f32 %v2138_v11, %v2108_v42  ;;  %v2178_v53 = vmul.f32 %v2108_v42, %v2108_v42  ;;  %2248 = vst [vmem:[%s3652_s13 + $0x80] sm:$0xff] %v2108_v42  ;;  %v1934_v26 = vpop.f32.mrf.mxu3 }
 0x286   : > { %v1821_v40 = vpop.f32.mrf.mxu2 }
 0x287   : > { %v2209_v51 = vadd.f32 %v2208_v34, %v2178_v53  ;;  %v1935_v5 = vadd.f32 %v1934_v26, %v1821_v40 }
 0x289   : > { %v2048_v7 = vadd.f32 %v2047_v52, %v1935_v5 }
 0x28a   : > { %v2050_v14 = vpop.f32.mrf.mxu0 }
 0x28b   : > { %v2109_v13 = vadd.f32 %v2048_v7, %v1563_v58  ;;  %v1568_v32 = vpop.f32.mrf.mxu1 }
 0x28c   : > { %v1569_v18 = vadd.f32 %v1568_v32, %v3608_v6 }
 0x28d   : > { %v2140_v2 = vadd.f32 %v2139_v4, %v2109_v13  ;;  %v2179_v54 = vmul.f32 %v2109_v13, %v2109_v13  ;;  %2249 = vst [vmem:[%s3652_s13 + $0x88] sm:$0xff] %v2109_v13  ;;  %v1937_v3 = vpop.f32.mrf.mxu3 }
 0x28e   : > { %v1824_v31 = vpop.f32.mrf.mxu2 }
 0x28f   : > { %v2210_v48 = vadd.f32 %v2209_v51, %v2179_v54  ;;  %v1938_v36 = vadd.f32 %v1937_v3, %v1824_v31 }
 0x291   : > { %v2051_v59 = vadd.f32 %v2050_v14, %v1938_v36 }
 0x292   : > { %v2053_v60 = vpop.f32.mrf.mxu0 }
 0x293   : > { %v2110_v45 = vadd.f32 %v2051_v59, %v1566_v22  ;;  %v1571_v55 = vpop.f32.mrf.mxu1 }
 0x294   : > { %v1572_v9 = vadd.f32 %v1571_v55, %v3611_v10 }
 0x295   : > { %v2141_v21 = vadd.f32 %v2140_v2, %v2110_v45  ;;  %v2180_v28 = vmul.f32 %v2110_v45, %v2110_v45  ;;  %2250 = vst [vmem:[%s3652_s13 + $0x90] sm:$0xff] %v2110_v45  ;;  %v1940_v12 = vpop.f32.mrf.mxu3 }
 0x296   : > { %v1827_v23 = vpop.f32.mrf.mxu2 }
 0x297   : > { %v2211_v1 = vadd.f32 %v2210_v48, %v2180_v28  ;;  %v1941_v16 = vadd.f32 %v1940_v12, %v1827_v23 }
 0x299   : > { %v2054_v20 = vadd.f32 %v2053_v60, %v1941_v16 }
 0x29a   : > { %v2056_v0 = vpop.f32.mrf.mxu0 }
 0x29b   : > { %v2111_v46 = vadd.f32 %v2054_v20, %v1569_v18  ;;  %v1574_v37 = vpop.f32.mrf.mxu1 }
 0x29c   : > { %v1575_v42 = vadd.f32 %v1574_v37, %v3614_v61 }
 0x29d   : > { %v2142_v19 = vadd.f32 %v2141_v21, %v2111_v46  ;;  %v2181_v56 = vmul.f32 %v2111_v46, %v2111_v46  ;;  %2251 = vst [vmem:[%s3652_s13 + $0x98] sm:$0xff] %v2111_v46  ;;  %v1943_v62 = vpop.f32.mrf.mxu3 }
 0x29e   : > { %v1830_v8 = vpop.f32.mrf.mxu2 }
 0x29f   : > { %v2212_v43 = vadd.f32 %v2211_v1, %v2181_v56  ;;  %v1944_v41 = vadd.f32 %v1943_v62, %v1830_v8 }
 0x2a1   : > { %v2057_v38 = vadd.f32 %v2056_v0, %v1944_v41 }
 0x2a2   : > { %v2059_v11 = vpop.f32.mrf.mxu0 }
 0x2a3   : > { %v2112_v29 = vadd.f32 %v2057_v38, %v1572_v9  ;;  %v1577_v6 = vpop.f32.mrf.mxu1 }
 0x2a4   : > { %v1578_v7 = vadd.f32 %v1577_v6, %v3617_v49 }
 0x2a5   : > { %v2143_v34 = vadd.f32 %v2142_v19, %v2112_v29  ;;  %v2182_v30 = vmul.f32 %v2112_v29, %v2112_v29  ;;  %2252 = vst [vmem:[%s3652_s13 + $0xa0] sm:$0xff] %v2112_v29  ;;  %v1946_v63 = vpop.f32.mrf.mxu3 }
 0x2a6   : > { %v1833_v27 = vpop.f32.mrf.mxu2 }
 0x2a7   : > { %v2213_v47 = vadd.f32 %v2212_v43, %v2182_v30  ;;  %v1947_v52 = vadd.f32 %v1946_v63, %v1833_v27 }
 0x2a9   : > { %v2060_v40 = vadd.f32 %v2059_v11, %v1947_v52 }
 0x2aa   : > { %v2062_v24 = vpop.f32.mrf.mxu0 }
 0x2ab   : > { %v2113_v4 = vadd.f32 %v2060_v40, %v1575_v42  ;;  %v1580_v10 = vpop.f32.mrf.mxu1 }
 0x2ac   : > { %v1581_v22 = vadd.f32 %v1580_v10, %v3620_v17 }
 0x2ad   : > { %v2144_v26 = vadd.f32 %v2143_v34, %v2113_v4  ;;  %v2183_v51 = vmul.f32 %v2113_v4, %v2113_v4  ;;  %2253 = vst [vmem:[%s3652_s13 + $0xa8] sm:$0xff] %v2113_v4  ;;  %v1949_v5 = vpop.f32.mrf.mxu3 }
 0x2ae   : > { %v1836_v53 = vpop.f32.mrf.mxu2 }
 0x2af   : > { %v2214_v33 = vadd.f32 %v2213_v47, %v2183_v51  ;;  %v1950_v58 = vadd.f32 %v1949_v5, %v1836_v53 }
 0x2b1   : > { %v2063_v14 = vadd.f32 %v2062_v24, %v1950_v58 }
 0x2b2   : > { %v2065_v13 = vpop.f32.mrf.mxu0 }
 0x2b3   : > { %v2114_v31 = vadd.f32 %v2063_v14, %v1578_v7  ;;  %v1583_v61 = vpop.f32.mrf.mxu1 }
 0x2b4   : > { %v1584_v16 = vadd.f32 %v1583_v61, %v3623_v35 }
 0x2b5   : > { %v2145_v2 = vadd.f32 %v2144_v26, %v2114_v31  ;;  %v2184_v54 = vmul.f32 %v2114_v31, %v2114_v31  ;;  %2254 = vst [vmem:[%s3652_s13 + $0xb0] sm:$0xff] %v2114_v31  ;;  %v1952_v3 = vpop.f32.mrf.mxu3 }
 0x2b6   : > { %v1839_v32 = vpop.f32.mrf.mxu2 }
 0x2b7   : > { %v2215_v48 = vadd.f32 %v2214_v33, %v2184_v54  ;;  %v1953_v36 = vadd.f32 %v1952_v3, %v1839_v32 }
 0x2b9   : > { %v2066_v59 = vadd.f32 %v2065_v13, %v1953_v36 }
 0x2ba   : > { %v2068_v60 = vpop.f32.mrf.mxu0 }
 0x2bb   : > { %v2115_v45 = vadd.f32 %v2066_v59, %v1581_v22  ;;  %v1586_v49 = vpop.f32.mrf.mxu1 }
 0x2bc   : > { %v1587_v43 = vadd.f32 %v1586_v49, %v3626_v44 }
 0x2bd   : > { %v2146_v55 = vadd.f32 %v2145_v2, %v2115_v45  ;;  %v2185_v21 = vmul.f32 %v2115_v45, %v2115_v45  ;;  %2255 = vst [vmem:[%s3652_s13 + $0xb8] sm:$0xff] %v2115_v45  ;;  %v1955_v28 = vpop.f32.mrf.mxu3 }
 0x2be   : > { %v1842_v23 = vpop.f32.mrf.mxu2 }
 0x2bf   : > { %v2216_v12 = vadd.f32 %v2215_v48, %v2185_v21  ;;  %v1956_v1 = vadd.f32 %v1955_v28, %v1842_v23 }
 0x2c1   : > { %v2069_v18 = vadd.f32 %v2068_v60, %v1956_v1 }
 0x2c2   : > { %v2071_v20 = vpop.f32.mrf.mxu0 }
 0x2c3   : > { %v2116_v0 = vadd.f32 %v2069_v18, %v1584_v16  ;;  %v1589_v17 = vpop.f32.mrf.mxu1 }
 0x2c4   : > { %v1590_v63 = vadd.f32 %v1589_v17, %v3629_v25 }
 0x2c5   : > { %v2147_v8 = vadd.f32 %v2146_v55, %v2116_v0  ;;  %v2186_v37 = vmul.f32 %v2116_v0, %v2116_v0  ;;  %2256 = vst [vmem:[%s3652_s13 + $0xc0] sm:$0xff] %v2116_v0  ;;  %v1958_v19 = vpop.f32.mrf.mxu3 }
 0x2c6   : > { %v1845_v46 = vpop.f32.mrf.mxu2 }
 0x2c7   : > { %v2217_v56 = vadd.f32 %v2216_v12, %v2186_v37  ;;  %v1959_v62 = vadd.f32 %v1958_v19, %v1845_v46 }
 0x2c9   : > { %v2072_v41 = vadd.f32 %v2071_v20, %v1959_v62 }
 0x2ca   : > { %v2074_v9 = vpop.f32.mrf.mxu0 }
 0x2cb   : > { %v2117_v38 = vadd.f32 %v2072_v41, %v1587_v43  ;;  %v1592_v27 = vpop.f32.mrf.mxu1 }
 0x2cc   : > { %v1593_v51 = vadd.f32 %v1592_v27, %v3632_v15 }
 0x2cd   : > { %v2148_v35 = vadd.f32 %v2147_v8, %v2117_v38  ;;  %v2187_v29 = vmul.f32 %v2117_v38, %v2117_v38  ;;  %2257 = vst [vmem:[%s3652_s13 + $0xc8] sm:$0xff] %v2117_v38  ;;  %v1961_v6 = vpop.f32.mrf.mxu3 }
 0x2ce   : > { %v1848_v11 = vpop.f32.mrf.mxu2 }
 0x2cf   : > { %v2218_v34 = vadd.f32 %v2217_v56, %v2187_v29  ;;  %v1962_v30 = vadd.f32 %v1961_v6, %v1848_v11 }
 0x2d1   : > { %v2075_v47 = vadd.f32 %v2074_v9, %v1962_v30  ;;  %v3798_v9 = vld [vmem:[#allocation4_spill] sm:$0xff] }
 0x2d2   : > { %v2077_v52 = vpop.f32.mrf.mxu0 }
 0x2d3   : > { %v2118_v42 = vadd.f32 %v2075_v47, %v1590_v63  ;;  %v1595_v26 = vpop.f32.mrf.mxu1 }
 0x2d4   : > { %v1596_v61 = vadd.f32 %v1595_v26, %v3635_v39 }
 0x2d5   : > { %v2149_v44 = vadd.f32 %v2148_v35, %v2118_v42  ;;  %v2188_v24 = vmul.f32 %v2118_v42, %v2118_v42  ;;  %2258 = vst [vmem:[%s3652_s13 + $0xd0] sm:$0xff] %v2118_v42  ;;  %v1964_v4 = vpop.f32.mrf.mxu3 }
 0x2d6   : > { %v1851_v40 = vpop.f32.mrf.mxu2 }
 0x2d7   : > { %v2219_v53 = vadd.f32 %v2218_v34, %v2188_v24  ;;  %v1965_v10 = vadd.f32 %v1964_v4, %v1851_v40 }
 0x2d9   : > { %v2078_v5 = vadd.f32 %v2077_v52, %v1965_v10 }
 0x2da   : > { %v2080_v33 = vpop.f32.mrf.mxu0 }
 0x2db   : > { %v2119_v58 = vadd.f32 %v2078_v5, %v1593_v51  ;;  %v1598_v2 = vpop.f32.mrf.mxu1 }
 0x2dc   : > { %v1599_v23 = vadd.f32 %v1598_v2, %v3638_v50 }
 0x2dd   : > { %v2150_v25 = vadd.f32 %v2149_v44, %v2119_v58  ;;  %v2189_v14 = vmul.f32 %v2119_v58, %v2119_v58  ;;  %2259 = vst [vmem:[%s3652_s13 + $0xd8] sm:$0xff] %v2119_v58  ;;  %v1967_v13 = vpop.f32.mrf.mxu3 }
 0x2de   : > { %v1854_v7 = vpop.f32.mrf.mxu2 }
 0x2df   : > { %v2220_v31 = vadd.f32 %v2219_v53, %v2189_v14  ;;  %v1968_v32 = vadd.f32 %v1967_v13, %v1854_v7 }
 0x2e1   : > { %v2081_v54 = vadd.f32 %v2080_v33, %v1968_v32 }
 0x2e2   : > { %v2083_v3 = vpop.f32.mrf.mxu0 }
 0x2e3   : > { %v2120_v48 = vadd.f32 %v2081_v54, %v1596_v61  ;;  %v1601_v55 = vpop.f32.mrf.mxu1 }
 0x2e4   : > { %v1602_v0 = vadd.f32 %v1601_v55, %v3641_v57 }
 0x2e5   : > { %v2151_v15 = vadd.f32 %v2150_v25, %v2120_v48  ;;  %v2190_v22 = vmul.f32 %v2120_v48, %v2120_v48  ;;  %2260 = vst [vmem:[%s3652_s13 + $0xe0] sm:$0xff] %v2120_v48  ;;  %v1970_v59 = vpop.f32.mrf.mxu3 }
 0x2e6   : > { %v1857_v36 = vpop.f32.mrf.mxu2 }
 0x2e7   : > { %v2221_v60 = vadd.f32 %v2220_v31, %v2190_v22  ;;  %v1971_v45 = vadd.f32 %v1970_v59, %v1857_v36 }
 0x2e9   : > { %v2084_v49 = vadd.f32 %v2083_v3, %v1971_v45 }
 0x2ea   : > { %v2086_v39 = vpop.f32.mrf.mxu0 }
 0x2eb   : > { %v2121_v21 = vadd.f32 %v2084_v49, %v1599_v23  ;;  %v1604_v37 = vpop.f32.mrf.mxu1 }
 0x2ec   : > { %v1605_v38 = vadd.f32 %v1604_v37, %v3798_v9 }
 0x2ed   : > { %v2152_v12 = vadd.f32 %v2151_v15, %v2121_v21  ;;  %v2191_v1 = vmul.f32 %v2121_v21, %v2121_v21  ;;  %2261 = vst [vmem:[%s3652_s13 + $0xe8] sm:$0xff] %v2121_v21  ;;  %v1973_v16 = vpop.f32.mrf.mxu3 }
 0x2ee   : > { %v1860_v28 = vpop.f32.mrf.mxu2 }
 0x2ef   : > { %v2222_v18 = vadd.f32 %v2221_v60, %v2191_v1  ;;  %v1974_v20 = vadd.f32 %v1973_v16, %v1860_v28 }
 0x2f1   : > { %v2087_v46 = vadd.f32 %v2086_v39, %v1974_v20 }
 0x2f2   : > { %v2089_v62 = vpop.f32.mrf.mxu0 }
 0x2f3   : > { %v2122_v17 = vadd.f32 %v2087_v46, %v1602_v0 }
 0x2f5   : > { %v2153_v50 = vadd.f32 %v2152_v12, %v2122_v17  ;;  %v2192_v19 = vmul.f32 %v2122_v17, %v2122_v17  ;;  %2262 = vst [vmem:[%s3652_s13 + $0xf0] sm:$0xff] %v2122_v17  ;;  %v1976_v56 = vpop.f32.mrf.mxu3 }
 0x2f6   : > { %v1863_v8 = vpop.f32.mrf.mxu2 }
 0x2f7   : > { %v2223_v43 = vadd.f32 %v2222_v18, %v2192_v19  ;;  %v1977_v41 = vadd.f32 %v1976_v56, %v1863_v8 }
 0x2f9   : > { %v2090_v11 = vadd.f32 %v2089_v62, %v1977_v41 }
 0x2fb   : > { %v2123_v35 = vadd.f32 %v2090_v11, %v1605_v38 }
 0x2fd   : > { %v2154_v29 = vadd.f32 %v2153_v50, %v2123_v35  ;;  %v2193_v57 = vmul.f32 %v2123_v35, %v2123_v35  ;;  %2263 = vst [vmem:[%s3652_s13 + $0xf8] sm:$0xff] %v2123_v35 }
 0x2ff   : > { %v2155_v27 = vrot.slane %v2154_v29, 4  ;;  %v2224_v6 = vadd.f32 %v2223_v43, %v2193_v57 }
 0x301   : > { %v2156_v34 = vadd.f32 %v2155_v27, %v2154_v29  ;;  %v2225_v30 = vrot.slane %v2224_v6, 4 }
 0x303   : > { %v2157_v63 = vrot.slane %v2156_v34, 2  ;;  %v2226_v47 = vadd.f32 %v2225_v30, %v2224_v6 }
 0x305   : > { %v2158_v52 = vadd.f32 %v2157_v63, %v2156_v34  ;;  %v2227_v42 = vrot.slane %v2226_v47, 2 }
 0x307   : > { %v2159_v40 = vrot.slane %v2158_v52, 1  ;;  %v2228_v44 = vadd.f32 %v2227_v42, %v2226_v47 }
 0x309   : > { %v2160_v24 = vadd.f32 %v2159_v40, %v2158_v52  ;;  %v2229_v4 = vrot.slane %v2228_v44, 1 }
 0x30b   : > { %2161 = vst [vmem:[%s268_s14] sm:$0x1] %v2160_v24  ;;  %v2230_v53 = vadd.f32 %v2229_v4, %v2228_v44 }
 0x30d   : > { %2231 = vst [vmem:[%s271_s17] sm:$0x1] %v2230_v53 }
 0x30e PF: > { %s17_s21 = sadd.s32 1, %s2545_s21  }
 0x30f   : > { %p14_p5 = scmp.ge.s32.totalorder %s17_s21, 4  }
 0x311   :  { %16 = sbr.rel (!%p14_p5) target bundleno = 1 (0x1), region = 95 }

// kernel: center_block_forward.4
= control target key start
LH: loop header
LB: loop body
LE: loop exit
PB: predicated region body
PF: predicated region fallthrough
CT: control target
= control target key end

     0   :  { %s2693_s21 = smov 0   ;;  %s3993_s0 = inlined_call_operand.vmem [shape: f32[512,128], index: 0, kind: input, shape index: {}]   ;;  %s3994_s1 = inlined_call_operand.vmem [shape: f32[1,128], index: 1, kind: input, shape index: {}]   ;;  %s3995_s2 = inlined_call_operand.vmem [shape: f32[1,128], index: 2, kind: input, shape index: {}]   ;;  %s3996_s3 = inlined_call_operand.vmem [shape: f32[3,384,128], index: 3, kind: input, shape index: {}]   ;;  %s3997_s4 = inlined_call_operand.vmem [shape: f32[512,128], index: 4, kind: output, shape index: {0}]   ;;  %s3998_s5 = inlined_call_operand.vmem [shape: f32[2,1,128], index: 5, kind: output, shape index: {1}]   ;;  %s3999_s6 = inlined_call_operand.vmem [shape: f32[2,1,128], index: 6, kind: output, shape index: {2}]  }
   0x1 LB: > { %s2699_s22 = sadd.s32 4294967295, %s2655_s21   ;;  %p2478_p0 = scmp.ge.s32.totalorder %s2655_s21, 1  ;;  %s2655_s21 = sphi %s2693_s21, %s17_s21  }
   0x2   : > { %p218_p1 = scmp.lt.s32.totalorder %s2655_s21, 3 }
   0x4   : > { %p219_p2 = pnand %p2478_p0, %p218_p1 }
   0x6   : > { %222 = sbr.rel (%p219_p2) target bundleno = 782 (0x30e), region = 36 }
   0xb   : > { %v2498_v0 = vld [vmem:[%s3996_s3 + $0x1f8] sm:$0xff]  ;;  %v2497_v1 = vld [vmem:[%s3996_s3 + $0x1f0] sm:$0xff]  ;;  %s2479_s27 = sshll.u32 %s2699_s22, 5  ;;  %v2657_v2 = vmov 0.0   ;;  %v2496_v3 = vld [vmem:[%s3996_s3 + $0x1e8] sm:$0xff]  ;;  %vm502_vm0 = vcmask 1040384  }
   0xc   : > { %2581 = vmatpush.msra.mxu1 %v2498_v0  ;;  %2582 = vmatpush.msra.mxu2 %v2498_v0  ;;  %p255_p3 = scmp.lt.s32.totalorder %s2479_s27, 63  ;;  %458 = vst [vmem:[#allocation2 + $0xf0] sm:$0x1] %v2657_v2  ;;  %v2495_v4 = vld [vmem:[%s3996_s3 + $0x1e0] sm:$0xff]  ;;  %v2494_v6 = vld [vmem:[%s3996_s3 + $0x1d8] sm:$0xff]  ;;  %v2493_v9 = vld [vmem:[%s3996_s3 + $0x1d0] sm:$0xff] }
   0xd   : > { %2583 = vmatpush.msra.mxu3 %v2498_v0  ;;  %1033 = vmatpush.msra.mxu0 %v2498_v0  ;;  %408 = vst [vmem:[#allocation2] sm:$0xff] %v2657_v2  ;;  %v2724_v5 = vld [vmem:[%s3994_s1] ss:$0 sm:$0xff]  ;;  %v2492_v11 = vld [vmem:[%s3996_s3 + $0x1c8] sm:$0xff]  ;;  %v2490_v15 = vld [vmem:[%s3996_s3 + $0x1b8] sm:$0xff]  ;;  %vm631_vm1 = vcmask 1046528  }
   0xe   : > { %2584 = vmatpush.msra.mxu1 %v2497_v1  ;;  %2585 = vmatpush.msra.mxu2 %v2497_v1  ;;  %s4005_s27 = smov (!%p255_p3, %s2479_s27), 63  ;;  %v2739_v7 = vld [vmem:[%s3995_s2] ss:$0 sm:$0xff]  ;;  %v2489_v17 = vld [vmem:[%s3996_s3 + $0x1b0] sm:$0xff]  ;;  %454 = vst [vmem:[#allocation2 + $0x30] sm:$0x1] %v2657_v2 }
   0xf   : > { %2586 = vmatpush.msra.mxu3 %v2497_v1  ;;  %1034 = vmatpush.msra.mxu0 %v2497_v1  ;;  %s2480_s8 = sshll.u32 %s4005_s27, 3  ;;  %v2491_v13 = vld [vmem:[%s3996_s3 + $0x1c0] sm:$0xff]  ;;  %v2488_v18 = vld [vmem:[%s3996_s3 + $0x1a8] sm:$0xff]  ;;  %455 = vst [vmem:[#allocation2 + $0x60] sm:$0x1] %v2657_v2  ;;  %v2486_v20 = vld [vmem:[%s3996_s3 + $0x198] sm:$0xff] }
  0x10   : > { %2587 = vmatpush.msra.mxu1 %v2496_v3  ;;  %2588 = vmatpush.msra.mxu2 %v2496_v3  ;;  %s2734_s15 = scalar_lea.vmem %s3993_s0, %s2480_s8  ;;  %456 = vst [vmem:[#allocation2 + $0x90] sm:$0x1] %v2657_v2  ;;  %v2487_v19 = vld [vmem:[%s3996_s3 + $0x1a0] sm:$0xff]  ;;  %v2485_v21 = vld [vmem:[%s3996_s3 + $0x190] sm:$0xff]  ;;  %v2484_v24 = vld [vmem:[%s3996_s3 + $0x188] sm:$0xff]  ;;  %s3858_s28 = scalar_lea.vmem %s3997_s4, %s2480_s8 }
  0x11   : > { %2589 = vmatpush.msra.mxu3 %v2496_v3  ;;  %1035 = vmatpush.msra.mxu0 %v2496_v3  ;;  %v280_v8 = vld [vmem:[%s2734_s15 + $0x40] sm:$0xff]  ;;  %457 = vst [vmem:[#allocation2 + $0xc0] sm:$0x1] %v2657_v2  ;;  %v281_v22 = vld [vmem:[%s2734_s15 + $0x48] sm:$0xff]  ;;  %v2530_v30 = vld [vmem:[%s3996_s3 + $0x2f8] sm:$0xff]  ;;  %p266_p4 = scmp.lt.s32.totalorder %s2699_s22, 1 }
  0x12   : > { %2590 = vmatpush.msra.mxu1 %v2495_v4  ;;  %2591 = vmatpush.msra.mxu2 %v2495_v4  ;;  %v316_v10 = vmul.f32 %v2724_v5, %v280_v8  ;;  %459 = vst [vmem:[#allocation2 + $0x120] sm:$0x1] %v2657_v2  ;;  %v317_v23 = vmul.f32 %v2724_v5, %v281_v22  ;;  %v2483_v26 = vld [vmem:[%s3996_s3 + $0x180] sm:$0xff]  ;;  %v855_v31 = vld [vmem:[%s3996_s3 + $0x78] sm:$0xff]  ;;  %v2529_v34 = vld [vmem:[%s3996_s3 + $0x2f0] sm:$0xff] }
  0x13   : > { %2592 = vmatpush.msra.mxu3 %v2495_v4  ;;  %1036 = vmatpush.msra.mxu0 %v2495_v4  ;;  %460 = vst [vmem:[#allocation2 + $0x150] sm:$0x1] %v2657_v2  ;;  %v288_v28 = vld [vmem:[%s2734_s15 + $0x80] sm:$0xff]  ;;  %v854_v35 = vld [vmem:[%s3996_s3 + $0x70] sm:$0xff]  ;;  %v2514_v39 = vld [vmem:[%s3996_s3 + $0x278] sm:$0xff]  ;;  %s4007_s22 = smov (!%p266_p4, %s2699_s22), 1 }
  0x14   : > { %2593 = vmatpush.msra.mxu1 %v2494_v6  ;;  %2594 = vmatpush.msra.mxu2 %v2494_v6  ;;  %v352_v12 = vadd.f32 %v2739_v7, %v316_v10  ;;  %461 = vst [vmem:[#allocation2 + $0x180] sm:$0x1] %v2657_v2  ;;  %v353_v25 = vadd.f32 %v2739_v7, %v317_v23  ;;  %v296_v32 = vld [vmem:[%s2734_s15 + $0xc0] sm:$0xff]  ;;  %v2528_v40 = vld [vmem:[%s3996_s3 + $0x2e8] sm:$0xff]  ;;  %v871_v43 = vld [vmem:[%s3996_s3 + $0xf8] sm:$0xff]  ;;  %s268_s29 = scalar_lea.vmem %s3998_s5, %s4007_s22  ;;  %s271_s9 = scalar_lea.vmem %s3999_s6, %s4007_s22 }
  0x15   : > { %2595 = vmatpush.msra.mxu3 %v2494_v6  ;;  %1037 = vmatpush.msra.mxu0 %v2494_v6  ;;  %462 = vst [vmem:[#allocation2 + $0x1b0] sm:$0x1] %v2657_v2  ;;  %v324_v33 = vmul.f32 %v2724_v5, %v288_v28  ;;  %v272_v36 = vld [vmem:[%s2734_s15] sm:$0xff]  ;;  %v332_v38 = vmul.f32 %v2724_v5, %v296_v32  ;;  %v853_v41 = vld [vmem:[%s3996_s3 + $0x68] sm:$0xff]  ;;  %v2513_v44 = vld [vmem:[%s3996_s3 + $0x270] sm:$0xff] }
  0x16   : > { %2596 = vmatpush.msra.mxu1 %v2493_v9  ;;  %2597 = vmatpush.msra.mxu2 %v2493_v9  ;;  %v384_v14 = vmax.f32 %v352_v12, 0.0  ;;  %463 = vst [vmem:[#allocation2 + $0x1e0] sm:$0x1] %v2657_v2  ;;  %v2797_v29 = vmax.f32 %v353_v25, 0.0  ;;  %v289_v42 = vld [vmem:[%s2734_s15 + $0x88] sm:$0xff]  ;;  %v308_v46 = vmul.f32 %v2724_v5, %v272_v36  ;;  %v2527_v47 = vld [vmem:[%s3996_s3 + $0x2e0] sm:$0xff] }
  0x17   : > { %2598 = vmatpush.msra.mxu3 %v2493_v9  ;;  %1038 = vmatpush.msra.mxu0 %v2493_v9  ;;  %464 = vst [vmem:[#allocation2 + $0x210] sm:$0x1] %v2657_v2  ;;  %v360_v45 = vadd.f32 %v2739_v7, %v324_v33  ;;  %v852_v48 = vld [vmem:[%s3996_s3 + $0x60] sm:$0xff]  ;;  %v870_v49 = vld [vmem:[%s3996_s3 + $0xf0] sm:$0xff]  ;;  %v2857_v51 = vadd.f32 %v2739_v7, %v332_v38  ;;  %v297_v52 = vld [vmem:[%s2734_s15 + $0xc8] sm:$0xff] }
  0x18   : > { %2599 = vmatpush.msra.mxu1 %v2492_v11  ;;  %2600 = vmatpush.msra.mxu2 %v2492_v11  ;;  %v2756_v16 = vrot.slane %v384_v14, 7  ;;  %430 = vst [vmem:[#allocation2 + $0xf8] sm:$0xff] %v384_v14  ;;  %v516_v37 = vrot.slane %v2797_v29, 7  ;;  %v325_v53 = vmul.f32 %v2724_v5, %v289_v42  ;;  %v344_v55 = vadd.f32 %v2739_v7, %v308_v46  ;;  %v273_v56 = vld [vmem:[%s2734_s15 + $0x8] sm:$0xff]  ;;  %v282_v58 = vld [vmem:[%s2734_s15 + $0x50] sm:$0xff]  ;;  %v2526_v61 = vld [vmem:[%s3996_s3 + $0x2d8] sm:$0xff] }
  0x19   : > { %2601 = vmatpush.msra.mxu3 %v2492_v11  ;;  %1039 = vmatpush.msra.mxu0 %v2492_v11  ;;  %465 = vst [vmem:[#allocation2 + $0x240] sm:$0x1] %v2657_v2  ;;  %v2863_v54 = vmax.f32 %v360_v45, 0.0  ;;  %v333_v57 = vmul.f32 %v2724_v5, %v297_v52  ;;  %v400_v59 = vmax.f32 %v2857_v51, 0.0  ;;  %v2512_v60 = vld [vmem:[%s3996_s3 + $0x268] sm:$0xff]  ;;  %v851_v62 = vld [vmem:[%s3996_s3 + $0x58] sm:$0xff]  ;;  %v309_v0 = vmul.f32 %v2724_v5, %v273_v56 }
  0x1a   : > { %2602 = vmatpush.msra.mxu1 %v2491_v13  ;;  %2603 = vmatpush.msra.mxu2 %v2491_v13  ;;  %591 = vst [vmem:[#allocation2 + $0xf0] sm:$0xfe] %v2756_v16  ;;  %v2853_v50 = vsel %vm502_vm0, %v2756_v16, %v516_v37  ;;  %v361_v63 = vadd.f32 %v2739_v7, %v325_v53  ;;  %v869_v1 = vld [vmem:[%s3996_s3 + $0xe8] sm:$0xff]  ;;  %v2511_v3 = vld [vmem:[%s3996_s3 + $0x260] sm:$0xff]  ;;  %v2525_v4 = vld [vmem:[%s3996_s3 + $0x2d0] sm:$0xff]  ;;  %v2896_v8 = vmax.f32 %v344_v55, 0.0 }
  0x1b   : > { %2604 = vmatpush.msra.mxu3 %v2491_v13  ;;  %1040 = vmatpush.msra.mxu0 %v2491_v13  ;;  %466 = vst [vmem:[#allocation2 + $0x270] sm:$0x1] %v2657_v2  ;;  %v527_v6 = vrot.slane %v2863_v54, 7  ;;  %v850_v9 = vld [vmem:[%s3996_s3 + $0x50] sm:$0xff]  ;;  %v868_v10 = vld [vmem:[%s3996_s3 + $0xe0] sm:$0xff]  ;;  %v2906_v11 = vadd.f32 %v2739_v7, %v333_v57  ;;  %v539_v13 = vrot.slane %v400_v59, 7  ;;  %v318_v14 = vmul.f32 %v2724_v5, %v282_v58 }
  0x1c   : > { %2605 = vmatpush.msra.mxu1 %v2490_v15  ;;  %2606 = vmatpush.msra.mxu2 %v2490_v15  ;;  %467 = vst [vmem:[#allocation2 + $0x2a0] sm:$0x1] %v2657_v2  ;;  %v290_v12 = vld [vmem:[%s2734_s15 + $0x90] sm:$0xff]  ;;  %v345_v16 = vadd.f32 %v2739_v7, %v309_v0  ;;  %v283_v22 = vld [vmem:[%s2734_s15 + $0x58] sm:$0xff]  ;;  %v2524_v25 = vld [vmem:[%s3996_s3 + $0x2c8] sm:$0xff] }
  0x1d   : > { %2607 = vmatpush.msra.mxu3 %v2490_v15  ;;  %1041 = vmatpush.msra.mxu0 %v2490_v15  ;;  %468 = vst [vmem:[#allocation2 + $0x2d0] sm:$0x1] %v2657_v2  ;;  %v2912_v15 = vmax.f32 %v361_v63, 0.0  ;;  %v354_v23 = vadd.f32 %v2739_v7, %v318_v14  ;;  %v2523_v32 = vld [vmem:[%s3996_s3 + $0x2c0] sm:$0xff]  ;;  %v866_v37 = vld [vmem:[%s3996_s3 + $0xd0] sm:$0xff]  ;;  %v299_v42 = vld [vmem:[%s2734_s15 + $0xd8] sm:$0xff] }
  0x1e   : > { %2608 = vmatpush.msra.mxu1 %v2489_v17  ;;  %2609 = vmatpush.msra.mxu2 %v2489_v17  ;;  %469 = vst [vmem:[#allocation2 + $0x300] sm:$0x1] %v2657_v2  ;;  %v2934_v28 = vmax.f32 %v345_v16, 0.0  ;;  %v848_v36 = vld [vmem:[%s3996_s3 + $0x40] sm:$0xff]  ;;  %v335_v53 = vmul.f32 %v2724_v5, %v299_v42  ;;  %v2508_v58 = vld [vmem:[%s3996_s3 + $0x248] sm:$0xff] }
  0x1f   : > { %2610 = vmatpush.msra.mxu3 %v2489_v17  ;;  %1042 = vmatpush.msra.mxu0 %v2489_v17  ;;  %615 = vst [vmem:[#allocation2 + $0x5f] sm:$0x1] %v2657_v2  ;;  %v298_v17 = vld [vmem:[%s2734_s15 + $0xd0] sm:$0xff]  ;;  %v284_v55 = vld [vmem:[%s2734_s15 + $0x60] sm:$0xff] }
  0x20   : > { %2611 = vmatpush.msra.mxu1 %v2488_v18  ;;  %2612 = vmatpush.msra.mxu2 %v2488_v18  ;;  %616 = vst [vmem:[#allocation2 + $0x8f] sm:$0x1] %v2657_v2  ;;  %v504_v45 = vrot.slane %v2934_v28, 7  ;;  %v292_v14 = vld [vmem:[%s2734_s15 + $0xa0] sm:$0xff] }
  0x21   : > { %2613 = vmatpush.msra.mxu3 %v2488_v18  ;;  %1043 = vmatpush.msra.mxu0 %v2488_v18  ;;  %v912_v27 = vld [vmem:[#allocation2 + $0xf0] sm:$0xff]  ;;  %617 = vst [vmem:[#allocation2 + $0xbf] sm:$0x1] %v2657_v2  ;;  %v503_v18 = vrot.slane %v2896_v8, 7  ;;  %v844_v42 = vld [vmem:[%s3996_s3 + $0x20] sm:$0xff] }
  0x22   : > { %2614 = vmatpush.msra.mxu1 %v2487_v19  ;;  %2615 = vmatpush.msra.mxu2 %v2487_v19  ;;  %618 = vst [vmem:[#allocation2 + $0xef] sm:$0x1] %v2657_v2 }
  0x23   : > { %2616 = vmatpush.msra.mxu3 %v2487_v19  ;;  %1044 = vmatpush.msra.mxu0 %v2487_v19  ;;  %619 = vst [vmem:[#allocation2 + $0x11f] sm:$0x1] %v2657_v2  ;;  %v326_v19 = vmul.f32 %v2724_v5, %v290_v12 }
  0x24   : > { %2617 = vmatpush.msra.mxu1 %v2486_v20  ;;  %2618 = vmatpush.msra.mxu2 %v2486_v20  ;;  %620 = vst [vmem:[#allocation2 + $0x14f] sm:$0x1] %v2657_v2 }
  0x25   : > { %2619 = vmatpush.msra.mxu3 %v2486_v20  ;;  %1045 = vmatpush.msra.mxu0 %v2486_v20  ;;  %621 = vst [vmem:[#allocation2 + $0x17f] sm:$0x1] %v2657_v2  ;;  %v401_v20 = vmax.f32 %v2906_v11, 0.0  ;;  %v362_v33 = vadd.f32 %v2739_v7, %v326_v19  ;;  %v864_v11 = vld [vmem:[%s3996_s3 + $0xc0] sm:$0xff] }
  0x26   : > { %2620 = vmatpush.msra.mxu1 %v2485_v21  ;;  %2621 = vmatpush.msra.mxu2 %v2485_v21  ;;  %622 = vst [vmem:[#allocation2 + $0x1af] sm:$0x1] %v2657_v2 }
  0x27   : > { %2622 = vmatpush.msra.mxu3 %v2485_v21  ;;  %1046 = vmatpush.msra.mxu0 %v2485_v21  ;;  %623 = vst [vmem:[#allocation2 + $0x1df] sm:$0x1] %v2657_v2  ;;  %v274_v21 = vld [vmem:[%s2734_s15 + $0x10] sm:$0xff]  ;;  %v540_v38 = vrot.slane %v401_v20, 7 }
  0x28   : > { %2623 = vmatpush.msra.mxu1 %v2484_v24  ;;  %2624 = vmatpush.msra.mxu2 %v2484_v24  ;;  %624 = vst [vmem:[#allocation2 + $0x20f] sm:$0x1] %v2657_v2 }
  0x29   : > { %2625 = vmatpush.msra.mxu3 %v2484_v24  ;;  %1047 = vmatpush.msra.mxu0 %v2484_v24  ;;  %625 = vst [vmem:[#allocation2 + $0x23f] sm:$0x1] %v2657_v2  ;;  %v2510_v24 = vld [vmem:[%s3996_s3 + $0x258] sm:$0xff]  ;;  %v541_v51 = vsel %vm502_vm0, %v539_v13, %v540_v38 }
  0x2a   : > { %2626 = vmatpush.msra.mxu1 %v2483_v26  ;;  %2627 = vmatpush.msra.mxu2 %v2483_v26  ;;  %626 = vst [vmem:[#allocation2 + $0x26f] sm:$0x1] %v2657_v2 }
  0x2b   : > { %2628 = vmatpush.msra.mxu3 %v2483_v26  ;;  %1073 = vmatmul.f32.vlgmr.msra.gmra.mxu1 %v912_v27  ;;  %627 = vst [vmem:[#allocation2 + $0x29f] sm:$0x1] %v2657_v2  ;;  %v528_v27 = vrot.slane %v2912_v15, 7 }
  0x2c   : > { %1259 = vmatpush.msrb.mxu2 %v2530_v30  ;;  %1048 = vmatpush.msra.mxu0 %v2483_v26  ;;  %628 = vst [vmem:[#allocation2 + $0x2cf] sm:$0x1] %v2657_v2  ;;  %v849_v26 = vld [vmem:[%s3996_s3 + $0x48] sm:$0xff]  ;;  %v867_v30 = vld [vmem:[%s3996_s3 + $0xd8] sm:$0xff] }
  0x2d   : > { %1372 = vmatpush.msrb.mxu3 %v855_v31  ;;  %1146 = vmatpush.msrb.mxu1 %v2514_v39  ;;  %629 = vst [vmem:[#allocation2 + $0x2ff] sm:$0x1] %v2657_v2  ;;  %v2509_v31 = vld [vmem:[%s3996_s3 + $0x250] sm:$0xff]  ;;  %v319_v39 = vmul.f32 %v2724_v5, %v283_v22  ;;  %v328_v22 = vmul.f32 %v2724_v5, %v292_v14  ;;  %v843_v14 = vld [vmem:[%s3996_s3 + $0x18] sm:$0xff] }
  0x2e   : > { %1260 = vmatpush.msrb.mxu2 %v2529_v34  ;;  %1485 = vmatpush.msrb.mxu0 %v871_v43  ;;  %630 = vst [vmem:[#allocation2 + $0x32f] sm:$0x1] %v2657_v2  ;;  %v334_v2 = vmul.f32 %v2724_v5, %v298_v17  ;;  %v310_v34 = vmul.f32 %v2724_v5, %v274_v21 }
  0x2f   : > { %1373 = vmatpush.msrb.mxu3 %v854_v35  ;;  %1147 = vmatpush.msrb.mxu1 %v2513_v44  ;;  %599 = vst [vmem:[#allocation2 + $0x1b0] sm:$0xfe] %v527_v6  ;;  %v291_v35 = vld [vmem:[%s2734_s15 + $0x98] sm:$0xff]  ;;  %v529_v44 = vsel %vm502_vm0, %v527_v6, %v528_v27  ;;  %v355_v52 = vadd.f32 %v2739_v7, %v319_v39 }
  0x30   : > { %1261 = vmatpush.msrb.mxu2 %v2528_v40  ;;  %1486 = vmatpush.msrb.mxu0 %v870_v49  ;;  %438 = vst [vmem:[#allocation2 + $0x1b8] sm:$0xff] %v2863_v54  ;;  %v2958_v40 = vmax.f32 %v354_v23, 0.0  ;;  %v327_v46 = vmul.f32 %v2724_v5, %v291_v35  ;;  %v275_v49 = vld [vmem:[%s2734_s15 + $0x18] sm:$0xff]  ;;  %v320_v17 = vmul.f32 %v2724_v5, %v284_v55 }
  0x31   : > { %1374 = vmatpush.msrb.mxu3 %v853_v41  ;;  %1148 = vmatpush.msrb.mxu1 %v2512_v60  ;;  %607 = vst [vmem:[#allocation2 + $0x270] sm:$0xfe] %v539_v13  ;;  %v2961_v41 = vadd.f32 %v2739_v7, %v334_v2  ;;  %v847_v60 = vld [vmem:[%s3996_s3 + $0x38] sm:$0xff]  ;;  %v311_v0 = vmul.f32 %v2724_v5, %v275_v49  ;;  %v3016_v12 = vmax.f32 %v355_v52, 0.0 }
  0x32   : > { %1262 = vmatpush.msrb.mxu2 %v2527_v47  ;;  %1487 = vmatpush.msrb.mxu0 %v869_v1  ;;  %446 = vst [vmem:[#allocation2 + $0x278] sm:$0xff] %v400_v59  ;;  %v2968_v47 = vmax.f32 %v362_v33, 0.0  ;;  %v518_v56 = vrot.slane %v2958_v40, 7  ;;  %v2522_v59 = vld [vmem:[%s3996_s3 + $0x2b8] sm:$0xff]  ;;  %v363_v63 = vadd.f32 %v2739_v7, %v327_v46  ;;  %v865_v1 = vld [vmem:[%s3996_s3 + $0xc8] sm:$0xff]  ;;  %v3019_v13 = vadd.f32 %v2739_v7, %v335_v53 }
  0x33   : > { %1375 = vmatpush.msrb.mxu3 %v852_v48  ;;  %1076 = vmatmul.f32.gmra.mxu1 %v2853_v50  ;;  %583 = vst [vmem:[#allocation2 + $0x30] sm:$0xfe] %v503_v18  ;;  %v346_v48 = vadd.f32 %v2739_v7, %v310_v34  ;;  %v402_v57 = vmax.f32 %v2961_v41, 0.0  ;;  %v347_v19 = vadd.f32 %v2739_v7, %v311_v0  ;;  %v519_v23 = vrot.slane %v3016_v12, 7  ;;  %v863_v35 = vld [vmem:[%s3996_s3 + $0xb8] sm:$0xff]  ;;  %v293_v41 = vld [vmem:[%s2734_s15 + $0xa8] sm:$0xff] }
  0x34   : > { %1263 = vmatpush.msrb.mxu2 %v2526_v61  ;;  %1149 = vmatpush.msrb.mxu1 %v2511_v3  ;;  %592 = vst [vmem:[#allocation2 + $0x108] sm:$0xff] %v2853_v50  ;;  %v2507_v3 = vld [vmem:[%s3996_s3 + $0x240] sm:$0xff]  ;;  %v403_v2 = vmax.f32 %v3019_v13, 0.0  ;;  %v364_v38 = vadd.f32 %v2739_v7, %v328_v22  ;;  %v861_v22 = vld [vmem:[%s3996_s3 + $0xa8] sm:$0xff] }
  0x35   : > { %1376 = vmatpush.msrb.mxu3 %v851_v62  ;;  %1488 = vmatpush.msrb.mxu0 %v868_v10  ;;  %431 = vst [vmem:[#allocation2 + $0x110] sm:$0xff] %v2797_v29  ;;  %v2993_v62 = vsel %vm502_vm0, %v503_v18, %v504_v45  ;;  %v3005_v6 = vmax.f32 %v346_v48, 0.0  ;;  %v846_v10 = vld [vmem:[%s3996_s3 + $0x30] sm:$0xff]  ;;  %v3024_v16 = vrot.slane %v402_v57, 7  ;;  %v3028_v18 = vmax.f32 %v363_v63, 0.0  ;;  %v2503_v13 = vld [vmem:[%s3996_s3 + $0x220] sm:$0xff] }
  0x36   : > { %1264 = vmatpush.msrb.mxu2 %v2525_v4  ;;  %1150 = vmatpush.msrb.mxu1 %v2510_v24  ;;  %v936_v43 = vld [vmem:[#allocation2 + $0x1b0] sm:$0xff]  ;;  %600 = vst [vmem:[#allocation2 + $0x1c8] sm:$0xff] %v529_v44  ;;  %v530_v4 = vrot.slane %v2968_v47, 7  ;;  %v276_v24 = vld [vmem:[%s2734_s15 + $0x20] sm:$0xff]  ;;  %v3054_v34 = vmax.f32 %v347_v19, 0.0  ;;  %v3081_v45 = vsel %vm502_vm0, %v518_v56, %v519_v23  ;;  %v543_v46 = vrot.slane %v403_v2, 7 }
  0x37   : > { %1377 = vmatpush.msrb.mxu3 %v850_v9  ;;  %1489 = vmatpush.msrb.mxu0 %v867_v30  ;;  %439 = vst [vmem:[#allocation2 + $0x1d0] sm:$0xff] %v2912_v15  ;;  %v2521_v9 = vld [vmem:[%s3996_s3 + $0x2b0] sm:$0xff]  ;;  %v506_v21 = vrot.slane %v3005_v6, 7  ;;  %v2506_v30 = vld [vmem:[%s3996_s3 + $0x238] sm:$0xff]  ;;  %v531_v33 = vrot.slane %v3028_v18, 7  ;;  %v312_v39 = vmul.f32 %v2724_v5, %v276_v24 }
  0x38   : > { %1265 = vmatpush.msrb.mxu2 %v2524_v25  ;;  %1151 = vmatpush.msrb.mxu1 %v2509_v31  ;;  %v960_v50 = vld [vmem:[#allocation2 + $0x270] sm:$0xff]  ;;  %608 = vst [vmem:[#allocation2 + $0x288] sm:$0xff] %v541_v51  ;;  %v285_v25 = vld [vmem:[%s2734_s15 + $0x68] sm:$0xff]  ;;  %v507_v55 = vrot.slane %v3054_v34, 7  ;;  %v544_v63 = vsel %vm502_vm0, %v3024_v16, %v543_v46 }
  0x39   : > { %1378 = vmatpush.msrb.mxu3 %v849_v26  ;;  %1490 = vmatpush.msrb.mxu0 %v866_v37  ;;  %447 = vst [vmem:[#allocation2 + $0x290] sm:$0xff] %v401_v20  ;;  %v300_v20 = vld [vmem:[%s2734_s15 + $0xe0] sm:$0xff]  ;;  %v356_v26 = vadd.f32 %v2739_v7, %v320_v17  ;;  %v2520_v31 = vld [vmem:[%s3996_s3 + $0x2a8] sm:$0xff]  ;;  %v321_v48 = vmul.f32 %v2724_v5, %v285_v25  ;;  %v842_v24 = vld [vmem:[%s3996_s3 + $0x10] sm:$0xff] }
  0x3a   : > { %1266 = vmatpush.msrb.mxu2 %v2523_v32  ;;  %1121 = vmatmul.f32.vlgmr.msra.gmra.mxu3 %v960_v50  ;;  %v2988_v61 = vld [vmem:[#allocation2 + $0x30] sm:$0xff]  ;;  %593 = vst [vmem:[#allocation2 + $0x120] sm:$0xfe] %v518_v56  ;;  %v336_v27 = vmul.f32 %v2724_v5, %v300_v20  ;;  %v845_v32 = vld [vmem:[%s3996_s3 + $0x28] sm:$0xff]  ;;  %v2519_v37 = vld [vmem:[%s3996_s3 + $0x2a0] sm:$0xff]  ;;  %v532_v53 = vsel %vm502_vm0, %v530_v4, %v531_v33 }
  0x3b   : > { %1379 = vmatpush.msrb.mxu3 %v848_v36  ;;  %1097 = vmatmul.f32.vlgmr.msra.gmra.mxu2 %v936_v43  ;;  %432 = vst [vmem:[#allocation2 + $0x128] sm:$0xff] %v2958_v40  ;;  %v2505_v36 = vld [vmem:[%s3996_s3 + $0x230] sm:$0xff]  ;;  %v3087_v49 = vmax.f32 %v356_v26, 0.0  ;;  %v329_v56 = vmul.f32 %v2724_v5, %v293_v41  ;;  %v357_v0 = vadd.f32 %v2739_v7, %v321_v48  ;;  %v860_v25 = vld [vmem:[%s3996_s3 + $0xa0] sm:$0xff]  ;;  %v2502_v48 = vld [vmem:[%s3996_s3 + $0x218] sm:$0xff] }
  0x3c   : > { %1152 = vmatpush.msrb.mxu1 %v2508_v58  ;;  %1267 = vmatpush.msrb.mxu2 %v2522_v59  ;;  %601 = vst [vmem:[#allocation2 + $0x1e0] sm:$0xfe] %v530_v4  ;;  %v862_v43 = vld [vmem:[%s3996_s3 + $0xb0] sm:$0xff]  ;;  %v3090_v50 = vadd.f32 %v2739_v7, %v336_v27  ;;  %v348_v58 = vadd.f32 %v2739_v7, %v312_v39  ;;  %v277_v59 = vld [vmem:[%s2734_s15 + $0x28] sm:$0xff] }
  0x3d   : > { %1049 = vmatmul.f32.vlgmr.msra.gmra.mxu0 %v2988_v61  ;;  %1380 = vmatpush.msrb.mxu3 %v847_v60  ;;  %440 = vst [vmem:[#allocation2 + $0x1e8] sm:$0xff] %v2968_v47  ;;  %v521_v4 = vrot.slane %v3087_v49, 7  ;;  %v3127_v17 = vsel %vm502_vm0, %v506_v21, %v507_v55  ;;  %v365_v19 = vadd.f32 %v2739_v7, %v329_v56  ;;  %v3152_v26 = vmax.f32 %v357_v0, 0.0  ;;  %v859_v55 = vld [vmem:[%s3996_s3 + $0x98] sm:$0xff]  ;;  %v2501_v56 = vld [vmem:[%s3996_s3 + $0x210] sm:$0xff]  ;;  %v840_v0 = vld [vmem:[%s3996_s3] sm:$0xff] }
  0x3e   : > { %1491 = vmatpush.msrb.mxu0 %v865_v1  ;;  %1153 = vmatpush.msrb.mxu1 %v2507_v3  ;;  %609 = vst [vmem:[#allocation2 + $0x2a0] sm:$0xfe] %v3024_v16  ;;  %v286_v3 = vld [vmem:[%s2734_s15 + $0x70] sm:$0xff]  ;;  %v313_v20 = vmul.f32 %v2724_v5, %v277_v59  ;;  %v3140_v23 = vmax.f32 %v348_v58, 0.0  ;;  %v2515_v58 = vld [vmem:[%s3996_s3 + $0x280] sm:$0xff] }
  0x3f   : > { %1268 = vmatpush.msrb.mxu2 %v2521_v9  ;;  %1381 = vmatpush.msrb.mxu3 %v846_v10  ;;  %448 = vst [vmem:[#allocation2 + $0x2a8] sm:$0xff] %v402_v57  ;;  %v3099_v57 = vmax.f32 %v364_v38, 0.0  ;;  %v404_v9 = vmax.f32 %v3090_v50, 0.0  ;;  %v2504_v10 = vld [vmem:[%s3996_s3 + $0x228] sm:$0xff]  ;;  %v3163_v33 = vmax.f32 %v365_v19, 0.0  ;;  %v522_v39 = vrot.slane %v3152_v26, 7 }
  0x40   : > { %1492 = vmatpush.msrb.mxu0 %v864_v11  ;;  %1154 = vmatpush.msrb.mxu1 %v2506_v30  ;;  %585 = vst [vmem:[#allocation2 + $0x60] sm:$0xfe] %v506_v21  ;;  %v2518_v11 = vld [vmem:[%s3996_s3 + $0x298] sm:$0xff]  ;;  %v294_v30 = vld [vmem:[%s2734_s15 + $0xb0] sm:$0xff]  ;;  %v2516_v50 = vld [vmem:[%s3996_s3 + $0x288] sm:$0xff] }
  0x41   : > { %1269 = vmatpush.msrb.mxu2 %v2520_v31  ;;  %1382 = vmatpush.msrb.mxu3 %v845_v32  ;;  %424 = vst [vmem:[#allocation2 + $0x68] sm:$0xff] %v3005_v6  ;;  %v533_v21 = vrot.slane %v3099_v57, 7  ;;  %v3159_v31 = vrot.slane %v404_v9, 7  ;;  %v322_v32 = vmul.f32 %v2724_v5, %v286_v3  ;;  %v330_v38 = vmul.f32 %v2724_v5, %v294_v30 }
  0x42   : > { %1124 = vmatmul.f32.gmra.mxu3 %v541_v51  ;;  %1493 = vmatpush.msrb.mxu0 %v863_v35  ;;  %594 = vst [vmem:[#allocation2 + $0x138] sm:$0xff] %v3081_v45  ;;  %v301_v51 = vld [vmem:[%s2734_s15 + $0xe8] sm:$0xff]  ;;  %v349_v35 = vadd.f32 %v2739_v7, %v313_v20 }
  0x43   : > { %1100 = vmatmul.f32.gmra.mxu2 %v529_v44  ;;  %v918_v44 = vld [vmem:[#allocation2 + $0x120] sm:$0xff]  ;;  %1155 = vmatpush.msrb.mxu1 %v2505_v36  ;;  %433 = vst [vmem:[#allocation2 + $0x140] sm:$0xff] %v3016_v12  ;;  %v337_v1 = vmul.f32 %v2724_v5, %v301_v51  ;;  %v302_v36 = vld [vmem:[%s2734_s15 + $0xf0] sm:$0xff]  ;;  %v841_v51 = vld [vmem:[%s3996_s3 + $0x8] sm:$0xff]  ;;  %v366_v59 = vadd.f32 %v2739_v7, %v330_v38 }
  0x44   : > { %1079 = vmatmul.f32.gmra.mxu1 %v918_v44  ;;  %1270 = vmatpush.msrb.mxu2 %v2519_v37  ;;  %v942_v52 = vld [vmem:[#allocation2 + $0x1e0] sm:$0xff]  ;;  %602 = vst [vmem:[#allocation2 + $0x1f8] sm:$0xff] %v532_v53  ;;  %v509_v37 = vrot.slane %v3140_v23, 7  ;;  %v358_v44 = vadd.f32 %v2739_v7, %v322_v32  ;;  %v338_v46 = vmul.f32 %v2724_v5, %v302_v36  ;;  %v279_v32 = vld [vmem:[%s2734_s15 + $0x38] sm:$0xff] }
  0x45   : > { %1052 = vmatmul.f32.gmra.mxu0 %v2993_v62  ;;  %1383 = vmatpush.msrb.mxu3 %v844_v42  ;;  %v966_v60 = vld [vmem:[#allocation2 + $0x2a0] sm:$0xff]  ;;  %441 = vst [vmem:[#allocation2 + $0x200] sm:$0xff] %v3028_v18  ;;  %v373_v27 = vadd.f32 %v2739_v7, %v337_v1  ;;  %v278_v42 = vld [vmem:[%s2734_s15 + $0x30] sm:$0xff] }
  0x46   : > { %1494 = vmatpush.msrb.mxu0 %v862_v43  ;;  %610 = vst [vmem:[#allocation2 + $0x2b8] sm:$0xff] %v544_v63  ;;  %1156 = vmatpush.msrb.mxu1 %v2504_v10  ;;  %v287_v43 = vld [vmem:[%s2734_s15 + $0x78] sm:$0xff]  ;;  %v858_v1 = vld [vmem:[%s3996_s3 + $0x90] sm:$0xff]  ;;  %v3228_v19 = vmax.f32 %v358_v44, 0.0  ;;  %v374_v20 = vadd.f32 %v2739_v7, %v338_v46 }
  0x47   : > { %v3120_v16 = vld [vmem:[#allocation2 + $0x60] sm:$0xff]  ;;  %449 = vst [vmem:[#allocation2 + $0x2c0] sm:$0xff] %v403_v2  ;;  %1271 = vmatpush.msrb.mxu2 %v2518_v11  ;;  %1384 = vmatpush.msrb.mxu3 %v843_v14  ;;  %v2517_v2 = vld [vmem:[%s3996_s3 + $0x290] sm:$0xff]  ;;  %v3173_v41 = vmax.f32 %v373_v27, 0.0  ;;  %v323_v11 = vmul.f32 %v2724_v5, %v287_v43  ;;  %v2500_v14 = vld [vmem:[%s3996_s3 + $0x208] sm:$0xff]  ;;  %v3241_v27 = vmax.f32 %v366_v59, 0.0 }
  0x48   : > { %586 = vst [vmem:[#allocation2 + $0x78] sm:$0xff] %v3127_v17  ;;  %1495 = vmatpush.msrb.mxu0 %v861_v22  ;;  %1157 = vmatpush.msrb.mxu1 %v2503_v13  ;;  %v857_v43 = vld [vmem:[%s3996_s3 + $0x88] sm:$0xff]  ;;  %v2546_v44 = vld [vmem:[%s3996_s3 + $0x378] sm:$0xff] }
  0x49   : > { %425 = vst [vmem:[#allocation2 + $0x80] sm:$0xff] %v3054_v34  ;;  %1272 = vmatpush.msrb.mxu2 %v2517_v2  ;;  %1385 = vmatpush.msrb.mxu3 %v842_v24  ;;  %v546_v10 = vrot.slane %v3173_v41, 7  ;;  %v359_v36 = vadd.f32 %v2739_v7, %v323_v11 }
  0x4a   : > { %1127 = vmatmul.f32.gmra.mxu3 %v966_v60  ;;  %595 = vst [vmem:[#allocation2 + $0x150] sm:$0xfe] %v521_v4  ;;  %1496 = vmatpush.msrb.mxu0 %v860_v25  ;;  %v314_v60 = vmul.f32 %v2724_v5, %v278_v42  ;;  %v2499_v25 = vld [vmem:[%s3996_s3 + $0x200] sm:$0xff]  ;;  %v3251_v42 = vmax.f32 %v374_v20, 0.0 }
  0x4b   : > { %1103 = vmatmul.f32.gmra.mxu2 %v942_v52  ;;  %434 = vst [vmem:[#allocation2 + $0x158] sm:$0xff] %v3087_v49  ;;  %v534_v52 = vrot.slane %v3163_v33, 7  ;;  %1158 = vmatpush.msrb.mxu1 %v2502_v48 }
  0x4c   : > { %1082 = vmatmul.f32.gmra.mxu1 %v3081_v45  ;;  %603 = vst [vmem:[#allocation2 + $0x210] sm:$0xfe] %v533_v21  ;;  %1273 = vmatpush.msrb.mxu2 %v2516_v50  ;;  %v350_v30 = vadd.f32 %v2739_v7, %v314_v60 }
  0x4d   : > { %1055 = vmatmul.f32.gmra.mxu0 %v3120_v16  ;;  %442 = vst [vmem:[#allocation2 + $0x218] sm:$0xff] %v3099_v57  ;;  %1386 = vmatpush.msrb.mxu3 %v841_v51  ;;  %v535_v13 = vsel %vm502_vm0, %v533_v21, %v534_v52  ;;  %v547_v21 = vsel %vm502_vm0, %v3159_v31, %v546_v10  ;;  %v856_v52 = vld [vmem:[%s3996_s3 + $0x80] sm:$0xff]  ;;  %v887_v10 = vld [vmem:[%s3996_s3 + $0x178] sm:$0xff] }
  0x4e   : > { %611 = vst [vmem:[#allocation2 + $0x2d0] sm:$0xfe] %v3159_v31  ;;  %1497 = vmatpush.msrb.mxu0 %v859_v55  ;;  %1159 = vmatpush.msrb.mxu1 %v2501_v56  ;;  %v2562_v31 = vld [vmem:[%s3996_s3 + $0x3f8] sm:$0xff]  ;;  %v315_v51 = vmul.f32 %v2724_v5, %v279_v32  ;;  %v536_v55 = vrot.slane %v3241_v27, 7  ;;  %v3278_v56 = vmax.f32 %v350_v30, 0.0  ;;  %v632_v32 = vrot.slane %v2896_v8, 1 }
  0x4f   : > { %450 = vst [vmem:[#allocation2 + $0x2d8] sm:$0xff] %v404_v9  ;;  %v3219_v9 = vsel %vm502_vm0, %v521_v4, %v522_v39  ;;  %v303_v4 = vld [vmem:[%s2734_s15 + $0xf8] sm:$0xff]  ;;  %1274 = vmatpush.msrb.mxu2 %v2515_v58  ;;  %1387 = vmatpush.msrb.mxu3 %v840_v0  ;;  %v524_v39 = vrot.slane %v3228_v19, 7  ;;  %v548_v58 = vrot.slane %v3251_v42, 7 }
  0x50   : > { %587 = vst [vmem:[#allocation2 + $0x90] sm:$0xfe] %v509_v37  ;;  %1498 = vmatpush.msrb.mxu0 %v858_v1  ;;  %1160 = vmatpush.msrb.mxu1 %v2500_v14  ;;  %v339_v38 = vmul.f32 %v2724_v5, %v303_v4  ;;  %v351_v60 = vadd.f32 %v2739_v7, %v315_v51  ;;  %v886_v51 = vld [vmem:[%s3996_s3 + $0x170] sm:$0xff] }
  0x51   : > { %v3213_v3 = vld [vmem:[#allocation2 + $0x150] sm:$0xff]  ;;  %426 = vst [vmem:[#allocation2 + $0x98] sm:$0xff] %v3140_v23  ;;  %1857 = vmatpush.msra.mxu2 %v2546_v44  ;;  %1970 = vmatpush.msra.mxu3 %v2562_v31  ;;  %v636_v44 = vrot.slane %v3054_v34, 1 }
  0x52   : > { %1130 = vmatmul.f32.gmra.mxu3 %v544_v63  ;;  %v295_v63 = vld [vmem:[%s2734_s15 + $0xb8] sm:$0xff]  ;;  %596 = vst [vmem:[#allocation2 + $0x168] sm:$0xff] %v3219_v9  ;;  %1161 = vmatpush.msrb.mxu1 %v2499_v25  ;;  %v3303_v14 = vmax.f32 %v351_v60, 0.0  ;;  %v2640_v60 = vld [vmem:[#allocation2] sm:$0xff] }
  0x53   : > { %1106 = vmatmul.f32.gmra.mxu2 %v532_v53  ;;  %v3190_v53 = vmax.f32 %v349_v35, 0.0  ;;  %v948_v22 = vld [vmem:[#allocation2 + $0x210] sm:$0xff]  ;;  %435 = vst [vmem:[#allocation2 + $0x170] sm:$0xff] %v3152_v26  ;;  %v331_v24 = vmul.f32 %v2724_v5, %v295_v63  ;;  %1499 = vmatpush.msrb.mxu0 %v857_v43  ;;  %v375_v5 = vadd.f32 %v2739_v7, %v339_v38  ;;  %v512_v63 = vrot.slane %v3278_v56, 7 }
  0x54   : > { %1085 = vmatmul.f32.gmra.mxu1 %v3213_v3  ;;  %604 = vst [vmem:[#allocation2 + $0x228] sm:$0xff] %v535_v13  ;;  %v635_v43 = vrot.slane %v3005_v6, 1 }
  0x55   : > { %1058 = vmatmul.f32.gmra.mxu0 %v3127_v17  ;;  %v510_v2 = vrot.slane %v3190_v53, 7  ;;  %v972_v35 = vld [vmem:[#allocation2 + $0x2d0] sm:$0xff]  ;;  %443 = vst [vmem:[#allocation2 + $0x230] sm:$0xff] %v3163_v33  ;;  %v367_v50 = vadd.f32 %v2739_v7, %v331_v24  ;;  %v3293_v1 = vmax.f32 %v375_v5, 0.0  ;;  %v2578_v7 = vld [vmem:[%s3996_s3 + $0x478] sm:$0xff]  ;;  %1598 = vmatpush.msra.mxu1 %v887_v10  ;;  %v513_v24 = vrot.slane %v3303_v14, 7 }
  0x56   : > { %612 = vst [vmem:[#allocation2 + $0x2e8] sm:$0xff] %v547_v21  ;;  %1500 = vmatpush.msrb.mxu0 %v856_v52  ;;  %v2577_v52 = vld [vmem:[%s3996_s3 + $0x470] sm:$0xff]  ;;  %v639_v5 = vrot.slane %v3190_v53, 1 }
  0x57   : > { %v3262_v46 = vld [vmem:[#allocation2 + $0x90] sm:$0xff]  ;;  %451 = vst [vmem:[#allocation2 + $0x2f0] sm:$0xff] %v3173_v41  ;;  %v3268_v48 = vsel %vm502_vm0, %v509_v37, %v510_v2  ;;  %v3281_v37 = vmax.f32 %v359_v36, 0.0  ;;  %v3287_v59 = vmax.f32 %v367_v50, 0.0  ;;  %v637_v50 = vsel %vm631_vm1, %v635_v43, %v636_v44  ;;  %1599 = vmatpush.msra.mxu1 %v886_v51  ;;  %v2574_v43 = vld [vmem:[%s3996_s3 + $0x458] sm:$0xff] }
  0x58   : > { %588 = vst [vmem:[#allocation2 + $0xa8] sm:$0xff] %v3268_v48  ;;  %2083 = vmatpush.msra.mxu0 %v2578_v7  ;;  %v2561_v36 = vld [vmem:[%s3996_s3 + $0x3f0] sm:$0xff]  ;;  %v885_v7 = vld [vmem:[%s3996_s3 + $0x168] sm:$0xff] }
  0x59   : > { %427 = vst [vmem:[#allocation2 + $0xb0] sm:$0xff] %v3190_v53  ;;  %v525_v0 = vrot.slane %v3281_v37, 7  ;;  %v537_v11 = vrot.slane %v3287_v59, 7  ;;  %1971 = vmatpush.msra.mxu3 %v2561_v36  ;;  %1600 = vmatpush.msra.mxu1 %v885_v7  ;;  %v2542_v36 = vld [vmem:[%s3996_s3 + $0x358] sm:$0xff] }
  0x5a   : > { %1133 = vmatmul.f32.gmra.mxu3 %v972_v35  ;;  %597 = vst [vmem:[#allocation2 + $0x180] sm:$0xfe] %v524_v39  ;;  %v633_v35 = vrot.slane %v2934_v28, 1  ;;  %2084 = vmatpush.msra.mxu0 %v2577_v52  ;;  %v2573_v52 = vld [vmem:[%s3996_s3 + $0x450] sm:$0xff] }
  0x5b   : > { %1109 = vmatmul.f32.gmra.mxu2 %v948_v22  ;;  %436 = vst [vmem:[#allocation2 + $0x188] sm:$0xff] %v3228_v19  ;;  %v3310_v4 = vsel %vm502_vm0, %v524_v39, %v525_v0  ;;  %v549_v22 = vrot.slane %v3293_v1, 7  ;;  %v538_v2 = vsel %vm502_vm0, %v536_v55, %v537_v11  ;;  %v3332_v39 = vsel %vm502_vm0, %v512_v63, %v513_v24  ;;  %v2560_v0 = vld [vmem:[%s3996_s3 + $0x3e8] sm:$0xff]  ;;  %v2543_v24 = vld [vmem:[%s3996_s3 + $0x360] sm:$0xff] }
  0x5c   : > { %1088 = vmatmul.f32.gmra.mxu1 %v3219_v9  ;;  %605 = vst [vmem:[#allocation2 + $0x240] sm:$0xfe] %v536_v55  ;;  %v634_v31 = vsel %vm631_vm1, %v632_v32, %v633_v35  ;;  %v638_v55 = vrot.slane %v3140_v23, 1  ;;  %1972 = vmatpush.msra.mxu3 %v2560_v0  ;;  %v2576_v11 = vld [vmem:[%s3996_s3 + $0x468] sm:$0xff]  ;;  %v2575_v32 = vld [vmem:[%s3996_s3 + $0x460] sm:$0xff] }
  0x5d   : > { %1061 = vmatmul.f32.gmra.mxu0 %v3262_v46  ;;  %444 = vst [vmem:[#allocation2 + $0x248] sm:$0xff] %v3241_v27  ;;  %v550_v30 = vsel %vm502_vm0, %v548_v58, %v549_v22  ;;  %v641_v22 = vrot.slane %v3278_v56, 1 }
  0x5e   : > { %613 = vst [vmem:[#allocation2 + $0x300] sm:$0xfe] %v548_v58  ;;  %v640_v58 = vsel %vm631_vm1, %v638_v55, %v639_v5  ;;  %2085 = vmatpush.msra.mxu0 %v2576_v11  ;;  %v913_v55 = vld [vmem:[#allocation2 + $0xf8] sm:$0xff] }
  0x5f   : > { %452 = vst [vmem:[#allocation2 + $0x308] sm:$0xff] %v3251_v42 }
  0x60   : > { %589 = vst [vmem:[#allocation2 + $0xc0] sm:$0xfe] %v512_v63  ;;  %v2544_v63 = vld [vmem:[%s3996_s3 + $0x368] sm:$0xff]  ;;  %2086 = vmatpush.msra.mxu0 %v2575_v32 }
  0x61   : > { %v3306_v20 = vld [vmem:[#allocation2 + $0x180] sm:$0xff]  ;;  %428 = vst [vmem:[#allocation2 + $0xc8] sm:$0xff] %v3278_v56 }
  0x62   : > { %1136 = vmatmul.f32.gmra.mxu3 %v547_v21  ;;  %598 = vst [vmem:[#allocation2 + $0x198] sm:$0xff] %v3310_v4  ;;  %v2545_v21 = vld [vmem:[%s3996_s3 + $0x370] sm:$0xff]  ;;  %2087 = vmatpush.msra.mxu0 %v2574_v43 }
  0x63   : > { %1112 = vmatmul.f32.gmra.mxu2 %v535_v13  ;;  %v954_v13 = vld [vmem:[#allocation2 + $0x240] sm:$0xff]  ;;  %437 = vst [vmem:[#allocation2 + $0x1a0] sm:$0xff] %v3281_v37 }
  0x64   : > { %1091 = vmatmul.f32.gmra.mxu1 %v3306_v20  ;;  %606 = vst [vmem:[#allocation2 + $0x258] sm:$0xff] %v538_v2  ;;  %1858 = vmatpush.msra.mxu2 %v2545_v21  ;;  %v645_v21 = vrot.slane %v2797_v29, 1 }
  0x65   : > { %1064 = vmatmul.f32.gmra.mxu0 %v3268_v48  ;;  %v978_v25 = vld [vmem:[#allocation2 + $0x300] sm:$0xff]  ;;  %445 = vst [vmem:[#allocation2 + $0x260] sm:$0xff] %v3287_v59 }
  0x66   : > { %614 = vst [vmem:[#allocation2 + $0x318] sm:$0xff] %v550_v30  ;;  %1859 = vmatpush.msra.mxu2 %v2544_v63  ;;  %2088 = vmatpush.msra.mxu0 %v2573_v52  ;;  %v2556_v63 = vld [vmem:[%s3996_s3 + $0x3c8] sm:$0xff] }
  0x67   : > { %v3328_v38 = vld [vmem:[#allocation2 + $0xc0] sm:$0xff]  ;;  %453 = vst [vmem:[#allocation2 + $0x320] sm:$0xff] %v3293_v1  ;;  %v781_v52 = vld [vmem:[#allocation2 + $0x128] sm:$0xff] }
  0x68   : > { %590 = vst [vmem:[#allocation2 + $0xd8] sm:$0xff] %v3332_v39  ;;  %1860 = vmatpush.msra.mxu2 %v2543_v24 }
  0x69   : > { %429 = vst [vmem:[#allocation2 + $0xe0] sm:$0xff] %v3303_v14 }
  0x6a   : > { %1139 = vmatmul.f32.gmra.mxu3 %v978_v25  ;;  %712 = vst [vmem:[#allocation2 + $0x40] sm:$0xff] %v634_v31  ;;  %v2559_v25 = vld [vmem:[%s3996_s3 + $0x3e0] sm:$0xff]  ;;  %1861 = vmatpush.msra.mxu2 %v2542_v36  ;;  %v777_v36 = vld [vmem:[#allocation2 + $0x108] sm:$0xff] }
  0x6b   : > { %1115 = vmatmul.f32.gmra.mxu2 %v954_v13  ;;  %713 = vst [vmem:[#allocation2 + $0x58] sm:$0x7f] %v633_v35  ;;  %v642_v13 = vrot.slane %v3303_v14, 1  ;;  %1973 = vmatpush.msra.mxu3 %v2559_v25  ;;  %v654_v25 = vrot.slane %v3281_v37, 1 }
  0x6c   : > { %1094 = vmatmul.f32.gmra.mxu1 %v3310_v4  ;;  %714 = vst [vmem:[#allocation2 + $0x70] sm:$0xff] %v637_v50 }
  0x6d   : > { %1067 = vmatmul.f32.gmra.mxu0 %v3328_v38  ;;  %715 = vst [vmem:[#allocation2 + $0x88] sm:$0x7f] %v636_v44  ;;  %v648_v44 = vrot.slane %v3016_v12, 1 }
  0x6e   : > { %717 = vst [vmem:[#allocation2 + $0xb8] sm:$0x7f] %v639_v5  ;;  %v651_v5 = vrot.slane %v3152_v26, 1 }
  0x6f   : > { %716 = vst [vmem:[#allocation2 + $0xa0] sm:$0xff] %v640_v58 }
  0x70   : > { %719 = vst [vmem:[#allocation2 + $0xe8] sm:$0x7f] %v642_v13 }
  0x71   : > { %721 = vst [vmem:[#allocation2 + $0x118] sm:$0x7f] %v645_v21 }
  0x72   : > { %1142 = vmatmul.f32.gmra.mxu3 %v550_v30  ;;  %v893_v10 = vld [vmem:[#allocation2 + $0x58] sm:$0xff]  ;;  %723 = vst [vmem:[#allocation2 + $0x148] sm:$0x7f] %v648_v44 }
  0x73   : > { %1118 = vmatmul.f32.gmra.mxu2 %v538_v2  ;;  %v643_v2 = vsel %vm631_vm1, %v641_v22, %v642_v13  ;;  %725 = vst [vmem:[#allocation2 + $0x178] sm:$0x7f] %v651_v5  ;;  %v881_v22 = vld [vmem:[%s3996_s3 + $0x148] sm:$0xff] }
  0x74   : > { %1162 = vmatmul.f32.vlgmr.msrb.gmra.mxu1 %v2896_v8  ;;  %718 = vst [vmem:[#allocation2 + $0xd0] sm:$0xff] %v643_v2  ;;  %v899_v30 = vld [vmem:[#allocation2 + $0x88] sm:$0xff] }
  0x75   : > { %1070 = vmatmul.f32.gmra.mxu0 %v3332_v39  ;;  %v905_v29 = vld [vmem:[#allocation2 + $0xb8] sm:$0xff]  ;;  %v2572_v13 = vld [vmem:[%s3996_s3 + $0x448] sm:$0xff]  ;;  %727 = vst [vmem:[#allocation2 + $0x1a8] sm:$0x7f] %v654_v25 }
  0x76   : > { %2089 = vmatpush.msra.mxu0 %v2572_v13 }
  0x78   : > { %v917_v11 = vld [vmem:[#allocation2 + $0x118] sm:$0xff] }
  0x7a   : > { %1388 = vmatmul.f32.vlgmr.msrb.gmra.mxu3 %v2640_v60 }
  0x7b   : > { %1275 = vmatmul.f32.vlgmr.msrb.gmra.mxu2 %v634_v31  ;;  %v2541_v31 = vld [vmem:[%s3996_s3 + $0x350] sm:$0xff] }
  0x7c   : > { %1165 = vmatmul.f32.gmra.mxu1 %v2934_v28  ;;  %1862 = vmatpush.msra.mxu2 %v2541_v31  ;;  %v657_v31 = vrot.slane %v2912_v15, 1 }
  0x7d   : > { %1501 = vmatmul.f32.vlgmr.msrb.gmra.mxu0 %v2640_v60 }
  0x7e   : > { %729 = vst [vmem:[#allocation2 + $0x1d8] sm:$0x7f] %v657_v31 }
  0x82   : > { %1391 = vmatmul.f32.gmra.mxu3 %v2640_v60 }
  0x83   : > { %1278 = vmatmul.f32.gmra.mxu2 %v893_v10  ;;  %v916_v10 = vld [vmem:[#allocation2 + $0x110] sm:$0xff] }
  0x84   : > { %1168 = vmatmul.f32.gmra.mxu1 %v3005_v6 }
  0x85   : > { %1504 = vmatmul.f32.gmra.mxu0 %v2640_v60 }
  0x8a   : > { %1394 = vmatmul.f32.gmra.mxu3 %v2988_v61  ;;  %v884_v61 = vld [vmem:[%s3996_s3 + $0x160] sm:$0xff] }
  0x8b   : > { %1281 = vmatmul.f32.gmra.mxu2 %v637_v50  ;;  %1601 = vmatpush.msra.mxu1 %v884_v61  ;;  %v911_v50 = vld [vmem:[#allocation2 + $0xe8] sm:$0xff] }
  0x8c   : > { %1171 = vmatmul.f32.gmra.mxu1 %v3054_v34 }
  0x8d   : > { %1507 = vmatmul.f32.gmra.mxu0 %v2896_v8  ;;  %v2641_v8 = vld [vmem:[#allocation2 + $0xf8] sm:$0xff] }
  0x8e   : > { %v644_v35 = vrot.slane %v2641_v8, 1 }
  0x92   : > { %1397 = vmatmul.f32.gmra.mxu3 %v2993_v62  ;;  %v646_v62 = vsel %vm631_vm1, %v644_v35, %v645_v21 }
  0x93   : > { %1284 = vmatmul.f32.gmra.mxu2 %v899_v30  ;;  %720 = vst [vmem:[#allocation2 + $0x100] sm:$0xff] %v646_v62  ;;  %v774_v30 = vld [vmem:[#allocation2 + $0xf0] sm:$0xff] }
  0x94   : > { %1174 = vmatmul.f32.gmra.mxu1 %v3140_v23 }
  0x95   : > { %1510 = vmatmul.f32.gmra.mxu0 %v2934_v28  ;;  %v2558_v28 = vld [vmem:[%s3996_s3 + $0x3d8] sm:$0xff] }
  0x96   : > { %1974 = vmatpush.msra.mxu3 %v2558_v28 }
  0x9a   : > { %1400 = vmatmul.f32.gmra.mxu3 %v3120_v16  ;;  %v883_v16 = vld [vmem:[%s3996_s3 + $0x158] sm:$0xff] }
  0x9b   : > { %1287 = vmatmul.f32.gmra.mxu2 %v640_v58  ;;  %1602 = vmatpush.msra.mxu1 %v883_v16  ;;  %v2571_v16 = vld [vmem:[%s3996_s3 + $0x440] sm:$0xff] }
  0x9c   : > { %1177 = vmatmul.f32.gmra.mxu1 %v3190_v53  ;;  %2090 = vmatpush.msra.mxu0 %v2571_v16  ;;  %v3568_v16 = vld [vmem:[#allocation2 + $0x1b8] sm:$0xff] }
  0x9d   : > { %1513 = vmatmul.f32.gmra.mxu0 %v3005_v6  ;;  %v647_v6 = vrot.slane %v2958_v40, 1 }
  0xa2   : > { %1403 = vmatmul.f32.gmra.mxu3 %v3127_v17  ;;  %v649_v17 = vsel %vm631_vm1, %v647_v6, %v648_v44 }
  0xa3   : > { %1290 = vmatmul.f32.gmra.mxu2 %v905_v29  ;;  %722 = vst [vmem:[#allocation2 + $0x130] sm:$0xff] %v649_v17  ;;  %v880_v29 = vld [vmem:[%s3996_s3 + $0x140] sm:$0xff] }
  0xa4   : > { %1180 = vmatmul.f32.gmra.mxu1 %v3278_v56 }
  0xa5   : > { %1516 = vmatmul.f32.gmra.mxu0 %v3054_v34  ;;  %v2557_v34 = vld [vmem:[%s3996_s3 + $0x3d0] sm:$0xff] }
  0xa6   : > { %1975 = vmatpush.msra.mxu3 %v2557_v34  ;;  %v780_v34 = vld [vmem:[#allocation2 + $0x120] sm:$0xff] }
  0xa8   : > { %v3420_v51 = vpop.f32.mrf.mxu1  ;;  %1976 = vmatpush.msra.mxu3 %v2556_v63  ;;  %v879_v63 = vld [vmem:[%s3996_s3 + $0x138] sm:$0xff] }
  0xaa   : > { %1406 = vmatmul.f32.gmra.mxu3 %v3262_v46  ;;  %v882_v46 = vld [vmem:[%s3996_s3 + $0x150] sm:$0xff] }
  0xab   : > { %1293 = vmatmul.f32.gmra.mxu2 %v643_v2  ;;  %1603 = vmatpush.msra.mxu1 %v882_v46 }
  0xac   : > { %1183 = vmatmul.f32.gmra.mxu1 %v3303_v14 }
  0xad   : > { %1519 = vmatmul.f32.gmra.mxu0 %v3140_v23  ;;  %v650_v23 = vrot.slane %v3087_v49, 1  ;;  %1604 = vmatpush.msra.mxu1 %v881_v22 }
  0xaf   : > { %1605 = vmatpush.msra.mxu1 %v880_v29 }
  0xb0   : > { %v3435_v60 = vpop.f32.mrf.mxu1 }
  0xb1   : > { %1606 = vmatpush.msra.mxu1 %v879_v63 }
  0xb2   : > { %1409 = vmatmul.f32.gmra.mxu3 %v3268_v48  ;;  %v652_v48 = vsel %vm631_vm1, %v650_v23, %v651_v5 }
  0xb3   : > { %1296 = vmatmul.f32.gmra.mxu2 %v911_v50  ;;  %724 = vst [vmem:[#allocation2 + $0x160] sm:$0xff] %v652_v48 }
  0xb4   : > { %1186 = vmatmul.f32.gmra.mxu1 %v913_v55 }
  0xb5   : > { %1522 = vmatmul.f32.gmra.mxu0 %v3190_v53  ;;  %v2540_v53 = vld [vmem:[%s3996_s3 + $0x348] sm:$0xff] }
  0xb6   : > { %1863 = vmatpush.msra.mxu2 %v2540_v53 }
  0xba   : > { %v3433_v58 = vpop.f32.mrf.mxu0  ;;  %1412 = vmatmul.f32.gmra.mxu3 %v3328_v38 }
  0xbb   : > { %1299 = vmatmul.f32.gmra.mxu2 %v646_v62  ;;  %v923_v62 = vld [vmem:[#allocation2 + $0x148] sm:$0xff] }
  0xbc   : > { %1189 = vmatmul.f32.gmra.mxu1 %v916_v10 }
  0xbd   : > { %1525 = vmatmul.f32.gmra.mxu0 %v3278_v56  ;;  %v3447_v7 = vpop.f32.mrf.mxu3 }
  0xbe   : > { %v3444_v0 = vpop.f32.mrf.mxu2 }
  0xc1   : > { %v3460_v56 = vpop.f32.mrf.mxu1 }
  0xc2   : > { %v3449_v38 = vpop.f32.mrf.mxu0  ;;  %1415 = vmatmul.f32.gmra.mxu3 %v3332_v39  ;;  %v653_v39 = vrot.slane %v3228_v19, 1 }
  0xc3   : > { %1302 = vmatmul.f32.gmra.mxu2 %v917_v11 }
  0xc4   : > { %1192 = vmatmul.f32.gmra.mxu1 %v2958_v40  ;;  %v655_v61 = vsel %vm631_vm1, %v653_v39, %v654_v25  ;;  %v2555_v40 = vld [vmem:[%s3996_s3 + $0x3c0] sm:$0xff]  ;;  %v660_v39 = vrot.slane %v3028_v18, 1 }
  0xc5   : > { %1528 = vmatmul.f32.gmra.mxu0 %v3303_v14  ;;  %v3463_v24 = vpop.f32.mrf.mxu3  ;;  %726 = vst [vmem:[#allocation2 + $0x190] sm:$0xff] %v655_v61  ;;  %v2539_v14 = vld [vmem:[%s3996_s3 + $0x340] sm:$0xff]  ;;  %1977 = vmatpush.msra.mxu3 %v2555_v40 }
  0xc6   : > { %v3458_v2 = vpop.f32.mrf.mxu2  ;;  %1864 = vmatpush.msra.mxu2 %v2539_v14  ;;  %731 = vst [vmem:[#allocation2 + $0x208] sm:$0x7f] %v660_v39 }
  0xc9   : > { %v3479_v35 = vpop.f32.mrf.mxu1 }
  0xca   : > { %v3469_v32 = vpop.f32.mrf.mxu0  ;;  %1418 = vmatmul.f32.gmra.mxu3 %v774_v30 }
  0xcb   : > { %1305 = vmatmul.f32.gmra.mxu2 %v649_v17  ;;  %v656_v17 = vrot.slane %v2863_v54, 1  ;;  %v2554_v54 = vld [vmem:[%s3996_s3 + $0x3b8] sm:$0xff] }
  0xcc   : > { %1195 = vmatmul.f32.gmra.mxu1 %v3016_v12  ;;  %1978 = vmatpush.msra.mxu3 %v2554_v54  ;;  %v3588_v54 = vld [vmem:[#allocation2 + $0x1d0] sm:$0xff] }
  0xcd   : > { %1531 = vmatmul.f32.gmra.mxu0 %v913_v55  ;;  %v3481_v21 = vpop.f32.mrf.mxu3  ;;  %v658_v50 = vsel %vm631_vm1, %v656_v17, %v657_v31  ;;  %v2538_v55 = vld [vmem:[%s3996_s3 + $0x338] sm:$0xff]  ;;  %v663_v31 = vrot.slane %v3163_v33, 1 }
  0xce   : > { %v3477_v8 = vpop.f32.mrf.mxu2  ;;  %728 = vst [vmem:[#allocation2 + $0x1c0] sm:$0xff] %v658_v50  ;;  %1865 = vmatpush.msra.mxu2 %v2538_v55 }
  0xcf   : > { %733 = vst [vmem:[#allocation2 + $0x238] sm:$0x7f] %v663_v31 }
  0xd1   : > { %v3494_v6 = vpop.f32.mrf.mxu1 }
  0xd2   : > { %v3484_v28 = vpop.f32.mrf.mxu0  ;;  %1421 = vmatmul.f32.gmra.mxu3 %v777_v36  ;;  %v2569_v36 = vld [vmem:[%s3996_s3 + $0x430] sm:$0xff] }
  0xd3   : > { %1308 = vmatmul.f32.gmra.mxu2 %v923_v62  ;;  %v878_v62 = vld [vmem:[%s3996_s3 + $0x130] sm:$0xff] }
  0xd4   : > { %1198 = vmatmul.f32.gmra.mxu1 %v3087_v49 }
  0xd5   : > { %1534 = vmatmul.f32.gmra.mxu0 %v916_v10  ;;  %v3496_v44 = vpop.f32.mrf.mxu3  ;;  %v2570_v10 = vld [vmem:[%s3996_s3 + $0x438] sm:$0xff]  ;;  %1607 = vmatpush.msra.mxu1 %v878_v62  ;;  %v3602_v62 = vld [vmem:[#allocation2 + $0x1e8] sm:$0xff] }
  0xd6   : > { %v3492_v43 = vpop.f32.mrf.mxu2  ;;  %2091 = vmatpush.msra.mxu0 %v2570_v10 }
  0xd8   : > { %2092 = vmatpush.msra.mxu0 %v2569_v36 }
  0xd9   : > { %v3512_v15 = vpop.f32.mrf.mxu1 }
  0xda   : > { %v3502_v46 = vpop.f32.mrf.mxu0  ;;  %1424 = vmatmul.f32.gmra.mxu3 %v780_v34 }
  0xdb   : > { %1311 = vmatmul.f32.gmra.mxu2 %v652_v48  ;;  %v929_v48 = vld [vmem:[#allocation2 + $0x178] sm:$0xff] }
  0xdc   : > { %1201 = vmatmul.f32.gmra.mxu1 %v3152_v26 }
  0xdd   : > { %1537 = vmatmul.f32.gmra.mxu0 %v781_v52  ;;  %v3514_v5 = vpop.f32.mrf.mxu3 }
  0xde   : > { %v3510_v23 = vpop.f32.mrf.mxu2 }
  0xe1   : > { %v3528_v22 = vpop.f32.mrf.mxu1 }
  0xe2   : > { %v3517_v53 = vpop.f32.mrf.mxu0  ;;  %1427 = vmatmul.f32.gmra.mxu3 %v3081_v45  ;;  %v659_v45 = vrot.slane %v2968_v47, 1  ;;  %v2553_v47 = vld [vmem:[%s3996_s3 + $0x3b0] sm:$0xff] }
  0xe3   : > { %1314 = vmatmul.f32.gmra.mxu2 %v929_v48  ;;  %1979 = vmatpush.msra.mxu3 %v2553_v47 }
  0xe4   : > { %1204 = vmatmul.f32.gmra.mxu1 %v3228_v19  ;;  %v3539_v30 = vsel %vm631_vm1, %v659_v45, %v660_v39 }
  0xe5   : > { %1540 = vmatmul.f32.gmra.mxu0 %v3016_v12  ;;  %v3531_v13 = vpop.f32.mrf.mxu3  ;;  %730 = vst [vmem:[#allocation2 + $0x1f0] sm:$0xff] %v3539_v30  ;;  %v2537_v12 = vld [vmem:[%s3996_s3 + $0x330] sm:$0xff] }
  0xe6   : > { %v3526_v11 = vpop.f32.mrf.mxu2  ;;  %1866 = vmatpush.msra.mxu2 %v2537_v12  ;;  %v877_v12 = vld [vmem:[%s3996_s3 + $0x128] sm:$0xff] }
  0xe7   : > { %1608 = vmatpush.msra.mxu1 %v877_v12 }
  0xea   : > { %v3536_v25 = vpop.f32.mrf.mxu0  ;;  %1430 = vmatmul.f32.gmra.mxu3 %v3213_v3  ;;  %v935_v3 = vld [vmem:[#allocation2 + $0x1a8] sm:$0xff] }
  0xeb   : > { %1317 = vmatmul.f32.gmra.mxu2 %v655_v61  ;;  %v3551_v61 = vpop.f32.mrf.mxu1 }
  0xec   : > { %1207 = vmatmul.f32.gmra.mxu1 %v3281_v37 }
  0xed   : > { %1543 = vmatmul.f32.gmra.mxu0 %v3087_v49  ;;  %v3554_v14 = vpop.f32.mrf.mxu3 }
  0xee   : > { %v3549_v18 = vpop.f32.mrf.mxu2 }
  0xf2   : > { %v3557_v40 = vpop.f32.mrf.mxu0  ;;  %1433 = vmatmul.f32.gmra.mxu3 %v3219_v9  ;;  %v662_v9 = vrot.slane %v3099_v57, 1  ;;  %v2552_v57 = vld [vmem:[%s3996_s3 + $0x3a8] sm:$0xff] }
  0xf3   : > { %1320 = vmatmul.f32.gmra.mxu2 %v935_v3  ;;  %v1163_v49 = vpop.f32.mrf.mxu1  ;;  %1980 = vmatpush.msra.mxu3 %v2552_v57  ;;  %v2535_v57 = vld [vmem:[%s3996_s3 + $0x320] sm:$0xff] }
  0xf4   : > { %1210 = vmatmul.f32.gmra.mxu1 %v3568_v16  ;;  %v3577_v52 = vsel %vm631_vm1, %v662_v9, %v663_v31  ;;  %v1164_v55 = vadd.f32 %v1163_v49, %v3433_v58  ;;  %v941_v58 = vld [vmem:[#allocation2 + $0x1d8] sm:$0xff]  ;;  %v665_v9 = vrot.slane %v3241_v27, 1  ;;  %v666_v31 = vrot.slane %v3287_v59, 1 }
  0xf5   : > { %1546 = vmatmul.f32.gmra.mxu0 %v3152_v26  ;;  %v3571_v17 = vpop.f32.mrf.mxu3  ;;  %732 = vst [vmem:[#allocation2 + $0x220] sm:$0xff] %v3577_v52  ;;  %v2536_v26 = vld [vmem:[%s3996_s3 + $0x328] sm:$0xff] }
  0xf6   : > { %v3566_v29 = vpop.f32.mrf.mxu2  ;;  %1867 = vmatpush.msra.mxu2 %v2536_v26  ;;  %v3612_v26 = vsel %vm631_vm1, %v665_v9, %v666_v31  ;;  %735 = vst [vmem:[#allocation2 + $0x268] sm:$0x7f] %v666_v31  ;;  %v804_v9 = vld [vmem:[#allocation2 + $0x1e0] sm:$0xff]  ;;  %v2642_v31 = vld [vmem:[#allocation2 + $0x278] sm:$0xff] }
  0xf7   : > { %734 = vst [vmem:[#allocation2 + $0x250] sm:$0xff] %v3612_v26 }
  0xf8   : > { %1868 = vmatpush.msra.mxu2 %v2535_v57 }
  0xfa   : > { %v1502_v34 = vpop.f32.mrf.mxu0  ;;  %1436 = vmatmul.f32.gmra.mxu3 %v3306_v20 }
  0xfb   : > { %1323 = vmatmul.f32.gmra.mxu2 %v658_v50  ;;  %v1166_v50 = vpop.f32.mrf.mxu1 }
  0xfc   : > { %1213 = vmatmul.f32.gmra.mxu1 %v3588_v54  ;;  %v1167_v39 = vadd.f32 %v1166_v50, %v3449_v38 }
  0xfd   : > { %1549 = vmatmul.f32.gmra.mxu0 %v3228_v19  ;;  %v1389_v20 = vpop.f32.mrf.mxu3  ;;  %v2568_v19 = vld [vmem:[%s3996_s3 + $0x428] sm:$0xff] }
  0xfe   : > { %v1276_v33 = vpop.f32.mrf.mxu2  ;;  %2093 = vmatpush.msra.mxu0 %v2568_v19 }
  0xff   : > { %v1277_v48 = vadd.f32 %v1276_v33, %v1164_v55  ;;  %v2551_v33 = vld [vmem:[%s3996_s3 + $0x3a0] sm:$0xff] }
 0x100   : > { %1981 = vmatpush.msra.mxu3 %v2551_v33 }
 0x101   : > { %v1390_v63 = vadd.f32 %v1389_v20, %v1277_v48  ;;  %v3622_v48 = vld [vmem:[#allocation2 + $0x200] sm:$0xff] }
 0x102   : > { %v1505_v45 = vpop.f32.mrf.mxu0  ;;  %1439 = vmatmul.f32.gmra.mxu3 %v3310_v4  ;;  %v798_v4 = vld [vmem:[#allocation2 + $0x1b0] sm:$0xff] }
 0x103   : > { %v3592_v10 = vadd.f32 %v1502_v34, %v1390_v63  ;;  %1326 = vmatmul.f32.gmra.mxu2 %v941_v58  ;;  %v1169_v3 = vpop.f32.mrf.mxu1  ;;  %v947_v58 = vld [vmem:[#allocation2 + $0x208] sm:$0xff] }
 0x104   : > { %1216 = vmatmul.f32.gmra.mxu1 %v3602_v62 }
 0x105   : > { %1552 = vmatmul.f32.gmra.mxu0 %v3281_v37  ;;  %v1392_v38 = vpop.f32.mrf.mxu3  ;;  %v1170_v37 = vadd.f32 %v1169_v3, %v3469_v32 }
 0x106   : > { %v1279_v47 = vpop.f32.mrf.mxu2 }
 0x107   : > { %v1280_v36 = vadd.f32 %v1279_v47, %v1167_v39  ;;  %v876_v47 = vld [vmem:[%s3996_s3 + $0x120] sm:$0xff] }
 0x108   : > { %1609 = vmatpush.msra.mxu1 %v876_v47  ;;  %v807_v47 = vld [vmem:[#allocation2 + $0x1f8] sm:$0xff] }
 0x109   : > { %v1393_v49 = vadd.f32 %v1392_v38, %v1280_v36  ;;  %v3635_v38 = vld [vmem:[#allocation2 + $0x218] sm:$0xff] }
 0x10a   : > { %v1508_v55 = vpop.f32.mrf.mxu0  ;;  %1442 = vmatmul.f32.gmra.mxu3 %v798_v4 }
 0x10b   : > { %v3608_v34 = vadd.f32 %v1505_v45, %v1393_v49  ;;  %1329 = vmatmul.f32.gmra.mxu2 %v3539_v30  ;;  %v1172_v30 = vpop.f32.mrf.mxu1  ;;  %v801_v45 = vld [vmem:[#allocation2 + $0x1c8] sm:$0xff] }
 0x10c   : > { %1219 = vmatmul.f32.gmra.mxu1 %v3622_v48  ;;  %v1173_v19 = vadd.f32 %v1172_v30, %v3484_v28 }
 0x10d   : > { %1555 = vmatmul.f32.gmra.mxu0 %v3568_v16  ;;  %v1395_v32 = vpop.f32.mrf.mxu3  ;;  %v2567_v16 = vld [vmem:[%s3996_s3 + $0x420] sm:$0xff] }
 0x10e   : > { %v1282_v50 = vpop.f32.mrf.mxu2  ;;  %2094 = vmatpush.msra.mxu0 %v2567_v16 }
 0x10f   : > { %v1283_v20 = vadd.f32 %v1282_v50, %v1170_v37  ;;  %v2643_v37 = vld [vmem:[#allocation2 + $0x290] sm:$0xff] }
 0x110   : > { %v669_v57 = vrot.slane %v2643_v37, 1  ;;  %v2644_v37 = vld [vmem:[#allocation2 + $0x2a8] sm:$0xff] }
 0x111   : > { %v1396_v63 = vadd.f32 %v1395_v32, %v1283_v20  ;;  %v2534_v20 = vld [vmem:[%s3996_s3 + $0x318] sm:$0xff] }
 0x112   : > { %v1511_v12 = vpop.f32.mrf.mxu0  ;;  %1445 = vmatmul.f32.gmra.mxu3 %v801_v45  ;;  %737 = vst [vmem:[#allocation2 + $0x298] sm:$0x7f] %v669_v57  ;;  %v2550_v32 = vld [vmem:[%s3996_s3 + $0x398] sm:$0xff]  ;;  %1869 = vmatpush.msra.mxu2 %v2534_v20 }
 0x113   : > { %v3626_v39 = vadd.f32 %v1508_v55, %v1396_v63  ;;  %1332 = vmatmul.f32.gmra.mxu2 %v947_v58  ;;  %v1175_v36 = vpop.f32.mrf.mxu1  ;;  %v668_v55 = vrot.slane %v2642_v31, 1  ;;  %v3653_v63 = vld [vmem:[#allocation2 + $0x230] sm:$0xff]  ;;  %1982 = vmatpush.msra.mxu3 %v2550_v32 }
 0x114   : > { %1222 = vmatmul.f32.gmra.mxu1 %v3635_v38 }
 0x115   : > { %1558 = vmatmul.f32.gmra.mxu0 %v3588_v54  ;;  %v1398_v4 = vpop.f32.mrf.mxu3  ;;  %v3643_v30 = vsel %vm631_vm1, %v668_v55, %v669_v57  ;;  %v1176_v54 = vadd.f32 %v1175_v36, %v3502_v46  ;;  %v671_v57 = vrot.slane %v2644_v37, 1 }
 0x116   : > { %v1285_v3 = vpop.f32.mrf.mxu2  ;;  %736 = vst [vmem:[#allocation2 + $0x280] sm:$0xff] %v3643_v30 }
 0x117   : > { %v1286_v49 = vadd.f32 %v1285_v3, %v1173_v19 }
 0x119   : > { %v1399_v28 = vadd.f32 %v1398_v4, %v1286_v49  ;;  %v875_v49 = vld [vmem:[%s3996_s3 + $0x118] sm:$0xff] }
 0x11a   : > { %v1514_v50 = vpop.f32.mrf.mxu0  ;;  %1448 = vmatmul.f32.gmra.mxu3 %v804_v9  ;;  %1610 = vmatpush.msra.mxu1 %v875_v49 }
 0x11b   : > { %v3639_v33 = vadd.f32 %v1511_v12, %v1399_v28  ;;  %1335 = vmatmul.f32.gmra.mxu2 %v3577_v52  ;;  %v1178_v52 = vpop.f32.mrf.mxu1  ;;  %v953_v12 = vld [vmem:[#allocation2 + $0x238] sm:$0xff] }
 0x11c   : > { %1225 = vmatmul.f32.gmra.mxu1 %v3653_v63  ;;  %v1179_v36 = vadd.f32 %v1178_v52, %v3517_v53  ;;  %v810_v53 = vld [vmem:[#allocation2 + $0x210] sm:$0xff] }
 0x11d   : > { %1561 = vmatmul.f32.gmra.mxu0 %v3602_v62  ;;  %v1401_v46 = vpop.f32.mrf.mxu3  ;;  %v2566_v62 = vld [vmem:[%s3996_s3 + $0x418] sm:$0xff]  ;;  %v2549_v52 = vld [vmem:[%s3996_s3 + $0x390] sm:$0xff] }
 0x11e   : > { %v1288_v58 = vpop.f32.mrf.mxu2  ;;  %2095 = vmatpush.msra.mxu0 %v2566_v62  ;;  %1983 = vmatpush.msra.mxu3 %v2549_v52  ;;  %v874_v62 = vld [vmem:[%s3996_s3 + $0x110] sm:$0xff] }
 0x11f   : > { %v1289_v45 = vadd.f32 %v1288_v58, %v1176_v54  ;;  %1611 = vmatpush.msra.mxu1 %v874_v62  ;;  %v873_v62 = vld [vmem:[%s3996_s3 + $0x108] sm:$0xff] }
 0x121   : > { %v1402_v19 = vadd.f32 %v1401_v46, %v1289_v45  ;;  %1612 = vmatpush.msra.mxu1 %v873_v62 }
 0x122   : > { %v1517_v3 = vpop.f32.mrf.mxu0  ;;  %1451 = vmatmul.f32.gmra.mxu3 %v807_v47  ;;  %v813_v47 = vld [vmem:[#allocation2 + $0x228] sm:$0xff] }
 0x123   : > { %v3657_v16 = vadd.f32 %v1514_v50, %v1402_v19  ;;  %1338 = vmatmul.f32.gmra.mxu2 %v953_v12  ;;  %v1181_v28 = vpop.f32.mrf.mxu1  ;;  %v2645_v50 = vld [vmem:[#allocation2 + $0x2c0] sm:$0xff] }
 0x124   : > { %1228 = vmatmul.f32.gmra.mxu1 %v3241_v27  ;;  %v672_v54 = vrot.slane %v2645_v50, 1  ;;  %v2533_v27 = vld [vmem:[%s3996_s3 + $0x310] sm:$0xff] }
 0x125   : > { %1564 = vmatmul.f32.gmra.mxu0 %v3622_v48  ;;  %v1404_v31 = vpop.f32.mrf.mxu3  ;;  %v1182_v48 = vadd.f32 %v1181_v28, %v3536_v25  ;;  %1870 = vmatpush.msra.mxu2 %v2533_v27  ;;  %v959_v25 = vld [vmem:[#allocation2 + $0x268] sm:$0xff] }
 0x126   : > { %v1291_v4 = vpop.f32.mrf.mxu2  ;;  %v3672_v58 = vsel %vm631_vm1, %v671_v57, %v672_v54  ;;  %739 = vst [vmem:[#allocation2 + $0x2c8] sm:$0x7f] %v672_v54  ;;  %v675_v57 = vrot.slane %v3173_v41, 1  ;;  %v2532_v41 = vld [vmem:[%s3996_s3 + $0x308] sm:$0xff] }
 0x127   : > { %v1292_v9 = vadd.f32 %v1291_v4, %v1179_v36  ;;  %738 = vst [vmem:[#allocation2 + $0x2b0] sm:$0xff] %v3672_v58  ;;  %1871 = vmatpush.msra.mxu2 %v2532_v41 }
 0x128   : > { %741 = vst [vmem:[#allocation2 + $0x2f8] sm:$0x7f] %v675_v57 }
 0x129   : > { %v1405_v55 = vadd.f32 %v1404_v31, %v1292_v9  ;;  %v3693_v9 = vld [vmem:[#allocation2 + $0x278] sm:$0xff] }
 0x12a   : > { %v1520_v32 = vpop.f32.mrf.mxu0  ;;  %1454 = vmatmul.f32.gmra.mxu3 %v810_v53  ;;  %v2646_v53 = vld [vmem:[#allocation2 + $0x2d8] sm:$0xff] }
 0x12b   : > { %v3668_v20 = vadd.f32 %v1517_v3, %v1405_v55  ;;  %1341 = vmatmul.f32.gmra.mxu2 %v3612_v26  ;;  %v1184_v26 = vpop.f32.mrf.mxu1  ;;  %v3697_v55 = vld [vmem:[#allocation2 + $0x240] sm:$0xff]  ;;  %v674_v37 = vrot.slane %v2646_v53, 1  ;;  %v3736_v53 = vld [vmem:[#allocation2 + $0x270] sm:$0xff] }
 0x12c   : > { %1231 = vmatmul.f32.gmra.mxu1 %v3287_v59  ;;  %v1185_v49 = vadd.f32 %v1184_v26, %v3557_v40 }
 0x12d   : > { %1567 = vmatmul.f32.gmra.mxu0 %v3635_v38  ;;  %v1407_v12 = vpop.f32.mrf.mxu3  ;;  %v2565_v38 = vld [vmem:[%s3996_s3 + $0x410] sm:$0xff] }
 0x12e   : > { %v1294_v45 = vpop.f32.mrf.mxu2  ;;  %2096 = vmatpush.msra.mxu0 %v2565_v38  ;;  %v2564_v38 = vld [vmem:[%s3996_s3 + $0x408] sm:$0xff] }
 0x12f   : > { %v1295_v46 = vadd.f32 %v1294_v45, %v1182_v48  ;;  %v3706_v48 = vsel %vm631_vm1, %v674_v37, %v675_v57  ;;  %v3717_v45 = vld [vmem:[#allocation2 + $0x290] sm:$0xff]  ;;  %v677_v37 = vrot.slane %v3251_v42, 1  ;;  %v678_v57 = vrot.slane %v3293_v1, 1  ;;  %v2531_v42 = vld [vmem:[%s3996_s3 + $0x300] sm:$0xff] }
 0x130   : > { %740 = vst [vmem:[#allocation2 + $0x2e0] sm:$0xff] %v3706_v48  ;;  %2097 = vmatpush.msra.mxu0 %v2564_v38  ;;  %v2547_v1 = vld [vmem:[%s3996_s3 + $0x380] sm:$0xff]  ;;  %1872 = vmatpush.msra.mxu2 %v2531_v42 }
 0x131   : > { %v1408_v19 = vadd.f32 %v1407_v12, %v1295_v46  ;;  %v965_v46 = vld [vmem:[#allocation2 + $0x298] sm:$0xff]  ;;  %v3744_v41 = vsel %vm631_vm1, %v677_v37, %v678_v57  ;;  %743 = vst [vmem:[#allocation2 + $0x328] sm:$0x7f] %v678_v57  ;;  %v872_v38 = vld [vmem:[%s3996_s3 + $0x100] sm:$0xff] }
 0x132   : > { %v1523_v36 = vpop.f32.mrf.mxu0  ;;  %1457 = vmatmul.f32.gmra.mxu3 %v813_v47  ;;  %742 = vst [vmem:[#allocation2 + $0x310] sm:$0xff] %v3744_v41  ;;  %1613 = vmatpush.msra.mxu1 %v872_v38  ;;  %v3769_v37 = vld [vmem:[#allocation2 + $0x2a0] sm:$0xff]  ;;  %v979_v38 = vld [vmem:[#allocation2 + $0x308] sm:$0xff] }
 0x133   : > { %v3684_v3 = vadd.f32 %v1520_v32, %v1408_v19  ;;  %1344 = vmatmul.f32.gmra.mxu2 %v959_v25  ;;  %v1187_v28 = vpop.f32.mrf.mxu1  ;;  %v3703_v32 = vld [vmem:[#allocation2 + $0x248] sm:$0xff]  ;;  %v3721_v25 = vld [vmem:[#allocation2 + $0x258] sm:$0xff] }
 0x134   : > { %1234 = vmatmul.f32.gmra.mxu1 %v3693_v9 }
 0x135   : > { %1570 = vmatmul.f32.gmra.mxu0 %v3653_v63  ;;  %v1410_v31 = vpop.f32.mrf.mxu3  ;;  %v1188_v63 = vadd.f32 %v1187_v28, %v3420_v51 }
 0x136   : > { %v1297_v4 = vpop.f32.mrf.mxu2 }
 0x137   : > { %v1298_v59 = vadd.f32 %v1297_v4, %v1185_v49 }
 0x139   : > { %v1411_v40 = vadd.f32 %v1410_v31, %v1298_v59  ;;  %v967_v59 = vld [vmem:[#allocation2 + $0x2a8] sm:$0xff] }
 0x13a   : > { %v1526_v54 = vpop.f32.mrf.mxu0  ;;  %1460 = vmatmul.f32.gmra.mxu3 %v3697_v55 }
 0x13b   : > { %v3700_v50 = vadd.f32 %v1523_v36, %v1411_v40  ;;  %1347 = vmatmul.f32.gmra.mxu2 %v3643_v30  ;;  %v2548_v30 = vld [vmem:[%s3996_s3 + $0x388] sm:$0xff]  ;;  %v1190_v52 = vpop.f32.mrf.mxu1  ;;  %v3725_v36 = vld [vmem:[#allocation2 + $0x260] sm:$0xff] }
 0x13c   : > { %1984 = vmatpush.msra.mxu3 %v2548_v30  ;;  %1237 = vmatmul.f32.gmra.mxu1 %v3717_v45  ;;  %v1191_v49 = vadd.f32 %v1190_v52, %v3435_v60  ;;  %v970_v52 = vld [vmem:[#allocation2 + $0x2c0] sm:$0xff] }
 0x13d   : > { %1573 = vmatmul.f32.gmra.mxu0 %v3703_v32  ;;  %v1413_v51 = vpop.f32.mrf.mxu3 }
 0x13e   : > { %v1300_v27 = vpop.f32.mrf.mxu2  ;;  %1985 = vmatpush.msra.mxu3 %v2547_v1 }
 0x13f   : > { %v1301_v26 = vadd.f32 %v1300_v27, %v1188_v63 }
 0x141   : > { %v1414_v12 = vadd.f32 %v1413_v51, %v1301_v26  ;;  %v971_v51 = vld [vmem:[#allocation2 + $0x2c8] sm:$0xff] }
 0x142   : > { %v1529_v47 = vpop.f32.mrf.mxu0  ;;  %1463 = vmatmul.f32.gmra.mxu3 %v3721_v25 }
 0x143   : > { %v3723_v19 = vadd.f32 %v1526_v54, %v1414_v12  ;;  %1350 = vmatmul.f32.gmra.mxu2 %v965_v46  ;;  %v1193_v28 = vpop.f32.mrf.mxu1  ;;  %v3756_v12 = vld [vmem:[#allocation2 + $0x288] sm:$0xff] }
 0x144   : > { %1240 = vmatmul.f32.gmra.mxu1 %v967_v59  ;;  %v1194_v30 = vadd.f32 %v1193_v28, %v3460_v56 }
 0x145   : > { %1576 = vmatmul.f32.gmra.mxu0 %v3725_v36  ;;  %v1416_v40 = vpop.f32.mrf.mxu3 }
 0x146   : > { %v1303_v4 = vpop.f32.mrf.mxu2 }
 0x147   : > { %v1304_v31 = vadd.f32 %v1303_v4, %v1191_v49 }
 0x149   : > { %v1417_v60 = vadd.f32 %v1416_v40, %v1304_v31  ;;  %v973_v31 = vld [vmem:[#allocation2 + $0x2d8] sm:$0xff] }
 0x14a   : > { %v1532_v63 = vpop.f32.mrf.mxu0  ;;  %1466 = vmatmul.f32.gmra.mxu3 %v3736_v53 }
 0x14b   : > { %v3740_v54 = vadd.f32 %v1529_v47, %v1417_v60  ;;  %1353 = vmatmul.f32.gmra.mxu2 %v3672_v58  ;;  %v1196_v27 = vpop.f32.mrf.mxu1 }
 0x14c   : > { %1243 = vmatmul.f32.gmra.mxu1 %v970_v52  ;;  %v1197_v62 = vadd.f32 %v1196_v27, %v3479_v35 }
 0x14d   : > { %1579 = vmatmul.f32.gmra.mxu0 %v3693_v9  ;;  %v1419_v56 = vpop.f32.mrf.mxu3  ;;  %v2563_v9 = vld [vmem:[%s3996_s3 + $0x400] sm:$0xff] }
 0x14e   : > { %v1306_v58 = vpop.f32.mrf.mxu2  ;;  %2098 = vmatpush.msra.mxu0 %v2563_v9 }
 0x14f   : > { %v1307_v26 = vadd.f32 %v1306_v58, %v1194_v30  ;;  %v976_v58 = vld [vmem:[#allocation2 + $0x2f0] sm:$0xff] }
 0x151   : > { %v1420_v46 = vadd.f32 %v1419_v56, %v1307_v26  ;;  %v977_v26 = vld [vmem:[#allocation2 + $0x2f8] sm:$0xff] }
 0x152   : > { %v1535_v49 = vpop.f32.mrf.mxu0  ;;  %1469 = vmatmul.f32.gmra.mxu3 %v3756_v12 }
 0x153   : > { %v3758_v47 = vadd.f32 %v1532_v63, %v1420_v46  ;;  %1356 = vmatmul.f32.gmra.mxu2 %v971_v51  ;;  %v1199_v28 = vpop.f32.mrf.mxu1  ;;  %v3776_v51 = vld [vmem:[#allocation2 + $0x2b8] sm:$0xff] }
 0x154   : > { %1246 = vmatmul.f32.gmra.mxu1 %v973_v31  ;;  %v1200_v30 = vadd.f32 %v1199_v28, %v3494_v6  ;;  %v3782_v28 = vld [vmem:[#allocation2 + $0x2d0] sm:$0xff] }
 0x155   : > { %1582 = vmatmul.f32.gmra.mxu0 %v3717_v45  ;;  %v1422_v60 = vpop.f32.mrf.mxu3 }
 0x156   : > { %v1309_v4 = vpop.f32.mrf.mxu2 }
 0x157   : > { %v1310_v40 = vadd.f32 %v1309_v4, %v1197_v62 }
 0x159   : > { %v1423_v35 = vadd.f32 %v1422_v60, %v1310_v40 }
 0x15a   : > { %v1538_v63 = vpop.f32.mrf.mxu0  ;;  %1472 = vmatmul.f32.gmra.mxu3 %v3769_v37 }
 0x15b   : > { %v3771_v57 = vadd.f32 %v1535_v49, %v1423_v35  ;;  %1359 = vmatmul.f32.gmra.mxu2 %v3706_v48  ;;  %v1202_v1 = vpop.f32.mrf.mxu1 }
 0x15c   : > { %1249 = vmatmul.f32.gmra.mxu1 %v976_v58  ;;  %v1203_v49 = vadd.f32 %v1202_v1, %v3512_v15  ;;  %v983_v1 = vld [vmem:[#allocation2 + $0x328] sm:$0xff] }
 0x15d   : > { %1585 = vmatmul.f32.gmra.mxu0 %v967_v59  ;;  %v1425_v45 = vpop.f32.mrf.mxu3 }
 0x15e   : > { %v1312_v42 = vpop.f32.mrf.mxu2 }
 0x15f   : > { %v1313_v27 = vadd.f32 %v1312_v42, %v1200_v30  ;;  %v982_v30 = vld [vmem:[#allocation2 + $0x320] sm:$0xff] }
 0x161   : > { %v1426_v56 = vadd.f32 %v1425_v45, %v1313_v27  ;;  %v3789_v45 = vld [vmem:[#allocation2 + $0x2e8] sm:$0xff] }
 0x162   : > { %v1541_v48 = vpop.f32.mrf.mxu0  ;;  %1475 = vmatmul.f32.gmra.mxu3 %v3776_v51 }
 0x163   : > { %v3778_v46 = vadd.f32 %v1538_v63, %v1426_v56  ;;  %1362 = vmatmul.f32.gmra.mxu2 %v977_v26  ;;  %v1205_v62 = vpop.f32.mrf.mxu1 }
 0x164   : > { %1252 = vmatmul.f32.gmra.mxu1 %v979_v38  ;;  %v1206_v35 = vadd.f32 %v1205_v62, %v3528_v22  ;;  %v3795_v38 = vld [vmem:[#allocation2] sm:$0xff] }
 0x165   : > { %1588 = vmatmul.f32.gmra.mxu0 %v970_v52  ;;  %v1428_v59 = vpop.f32.mrf.mxu3 }
 0x166   : > { %v1315_v6 = vpop.f32.mrf.mxu2 }
 0x167   : > { %v1316_v9 = vadd.f32 %v1315_v6, %v1203_v49 }
 0x169   : > { %v1429_v4 = vadd.f32 %v1428_v59, %v1316_v9  ;;  %v1713_v9 = vld [vmem:[#allocation2 + $0x68] sm:$0xff] }
 0x16a   : > { %v1544_v60 = vpop.f32.mrf.mxu0  ;;  %1478 = vmatmul.f32.gmra.mxu3 %v3782_v28 }
 0x16b   : > { %v3784_v40 = vadd.f32 %v1541_v48, %v1429_v4  ;;  %1365 = vmatmul.f32.gmra.mxu2 %v3744_v41  ;;  %v1208_v63 = vpop.f32.mrf.mxu1 }
 0x16c   : > { %1255 = vmatmul.f32.gmra.mxu1 %v982_v30  ;;  %v1209_v56 = vadd.f32 %v1208_v63, %v3551_v61  ;;  %v1715_v30 = vld [vmem:[#allocation2 + $0x78] sm:$0xff] }
 0x16d   : > { %1591 = vmatmul.f32.gmra.mxu0 %v973_v31  ;;  %v1431_v52 = vpop.f32.mrf.mxu3  ;;  %v1712_v31 = vld [vmem:[#allocation2 + $0x60] sm:$0xff] }
 0x16e   : > { %v1318_v15 = vpop.f32.mrf.mxu2 }
 0x16f   : > { %v1319_v42 = vadd.f32 %v1318_v15, %v1206_v35 }
 0x171   : > { %v1432_v27 = vadd.f32 %v1431_v52, %v1319_v42  ;;  %v1716_v52 = vld [vmem:[#allocation2 + $0x80] sm:$0xff] }
 0x172   : > { %v1547_v41 = vpop.f32.mrf.mxu0  ;;  %1481 = vmatmul.f32.gmra.mxu3 %v3789_v45 }
 0x173   : > { %v3791_v26 = vadd.f32 %v1544_v60, %v1432_v27  ;;  %1368 = vmatmul.f32.gmra.mxu2 %v983_v1  ;;  %v1211_v48 = vpop.f32.mrf.mxu1  ;;  %v1714_v60 = vld [vmem:[#allocation2 + $0x70] sm:$0xff] }
 0x174   : > { %1614 = vmatmul.f32.vlgmr.msra.gmra.mxu1 %v3795_v38  ;;  %v1212_v61 = vadd.f32 %v1211_v48, %v3444_v0  ;;  %v752_v48 = vld [vmem:[#allocation2 + $0x40] sm:$0xff] }
 0x175   : > { %1594 = vmatmul.f32.gmra.mxu0 %v976_v58  ;;  %v1434_v6 = vpop.f32.mrf.mxu3 }
 0x176   : > { %v1321_v22 = vpop.f32.mrf.mxu2 }
 0x177   : > { %v1322_v49 = vadd.f32 %v1321_v22, %v1209_v56 }
 0x179   : > { %v1435_v62 = vadd.f32 %v1434_v6, %v1322_v49 }
 0x17a   : > { %v1550_v4 = vpop.f32.mrf.mxu0  ;;  %1986 = vmatmul.f32.vlgmr.msra.gmra.mxu3 %v1713_v9  ;;  %v1719_v9 = vld [vmem:[#allocation2 + $0x98] sm:$0xff] }
 0x17b   : > { %v3798_v59 = vadd.f32 %v1547_v41, %v1435_v62  ;;  %1873 = vmatmul.f32.vlgmr.msra.gmra.mxu2 %v1712_v31  ;;  %v1214_v15 = vpop.f32.mrf.mxu1  ;;  %v1717_v41 = vld [vmem:[#allocation2 + $0x88] sm:$0xff]  ;;  %v1718_v31 = vld [vmem:[#allocation2 + $0x90] sm:$0xff] }
 0x17c   : > { %1617 = vmatmul.f32.gmra.mxu1 %v3795_v38  ;;  %v1215_v56 = vadd.f32 %v1214_v15, %v3458_v2 }
 0x17d   : > { %2099 = vmatmul.f32.vlgmr.msra.gmra.mxu0 %v1714_v60  ;;  %v1437_v58 = vpop.f32.mrf.mxu3 }
 0x17e   : > { %v1324_v35 = vpop.f32.mrf.mxu2 }
 0x17f   : > { %v1325_v63 = vadd.f32 %v1324_v35, %v1212_v61  ;;  %v1720_v35 = vld [vmem:[#allocation2 + $0xa0] sm:$0xff] }
 0x181   : > { %v1438_v42 = vadd.f32 %v1437_v58, %v1325_v63  ;;  %v755_v58 = vld [vmem:[#allocation2 + $0x58] sm:$0xff] }
 0x182   : > { %v1553_v27 = vpop.f32.mrf.mxu0  ;;  %1989 = vmatmul.f32.gmra.mxu3 %v1716_v52  ;;  %v1721_v52 = vld [vmem:[#allocation2 + $0xa8] sm:$0xff] }
 0x183   : > { %v3802_v1 = vadd.f32 %v1550_v4, %v1438_v42  ;;  %1876 = vmatmul.f32.gmra.mxu2 %v1715_v30  ;;  %v1217_v22 = vpop.f32.mrf.mxu1 }
 0x184   : > { %1620 = vmatmul.f32.gmra.mxu1 %v752_v48  ;;  %v1218_v63 = vadd.f32 %v1217_v22, %v3477_v8 }
 0x185   : > { %2102 = vmatmul.f32.gmra.mxu0 %v1717_v41  ;;  %v1440_v6 = vpop.f32.mrf.mxu3 }
 0x186   : > { %v1327_v0 = vpop.f32.mrf.mxu2 }
 0x187   : > { %v1328_v49 = vadd.f32 %v1327_v0, %v1215_v56  ;;  %v1722_v0 = vld [vmem:[#allocation2 + $0xb0] sm:$0xff] }
 0x189   : > { %v1441_v62 = vadd.f32 %v1440_v6, %v1328_v49  ;;  %v1723_v49 = vld [vmem:[#allocation2 + $0xb8] sm:$0xff] }
 0x18a   : > { %v1556_v4 = vpop.f32.mrf.mxu0  ;;  %1992 = vmatmul.f32.gmra.mxu3 %v1719_v9  ;;  %v1724_v9 = vld [vmem:[#allocation2 + $0xc0] sm:$0xff] }
 0x18b   : > { %v3805_v61 = vadd.f32 %v1553_v27, %v1441_v62  ;;  %1879 = vmatmul.f32.gmra.mxu2 %v1718_v31  ;;  %v1220_v15 = vpop.f32.mrf.mxu1 }
 0x18c   : > { %1623 = vmatmul.f32.gmra.mxu1 %v755_v58  ;;  %v1221_v6 = vadd.f32 %v1220_v15, %v3492_v43  ;;  %v1726_v58 = vld [vmem:[#allocation2 + $0xd0] sm:$0xff] }
 0x18d   : > { %2105 = vmatmul.f32.gmra.mxu0 %v1720_v35  ;;  %v1443_v42 = vpop.f32.mrf.mxu3 }
 0x18e   : > { %v1330_v2 = vpop.f32.mrf.mxu2 }
 0x18f   : > { %v1331_v30 = vadd.f32 %v1330_v2, %v1218_v63  ;;  %v1725_v2 = vld [vmem:[#allocation2 + $0xc8] sm:$0xff] }
 0x191   : > { %v1444_v56 = vadd.f32 %v1443_v42, %v1331_v30 }
 0x192   : > { %v1559_v27 = vpop.f32.mrf.mxu0  ;;  %1995 = vmatmul.f32.gmra.mxu3 %v1722_v0  ;;  %v1727_v0 = vld [vmem:[#allocation2 + $0xd8] sm:$0xff] }
 0x193   : > { %v3808_v48 = vadd.f32 %v1556_v4, %v1444_v56  ;;  %1882 = vmatmul.f32.gmra.mxu2 %v1721_v52  ;;  %v1223_v22 = vpop.f32.mrf.mxu1 }
 0x194   : > { %1626 = vmatmul.f32.gmra.mxu1 %v1714_v60  ;;  %v1224_v42 = vadd.f32 %v1223_v22, %v3510_v23 }
 0x195   : > { %2108 = vmatmul.f32.gmra.mxu0 %v1723_v49  ;;  %v1446_v62 = vpop.f32.mrf.mxu3 }
 0x196   : > { %v1333_v8 = vpop.f32.mrf.mxu2 }
 0x197   : > { %v1334_v31 = vadd.f32 %v1333_v8, %v1221_v6  ;;  %v1728_v8 = vld [vmem:[#allocation2 + $0xe0] sm:$0xff] }
 0x199   : > { %v1447_v63 = vadd.f32 %v1446_v62, %v1334_v31 }
 0x19a   : > { %v1562_v4 = vpop.f32.mrf.mxu0  ;;  %1998 = vmatmul.f32.gmra.mxu3 %v1725_v2  ;;  %v1730_v2 = vld [vmem:[#allocation2 + $0xf0] sm:$0xff] }
 0x19b   : > { %v3811_v30 = vadd.f32 %v1559_v27, %v1447_v63  ;;  %1885 = vmatmul.f32.gmra.mxu2 %v1724_v9  ;;  %v1226_v43 = vpop.f32.mrf.mxu1  ;;  %v1729_v27 = vld [vmem:[#allocation2 + $0xe8] sm:$0xff] }
 0x19c   : > { %1629 = vmatmul.f32.gmra.mxu1 %v1717_v41  ;;  %v1227_v62 = vadd.f32 %v1226_v43, %v3526_v11 }
 0x19d   : > { %2111 = vmatmul.f32.gmra.mxu0 %v1726_v58  ;;  %v1449_v56 = vpop.f32.mrf.mxu3 }
 0x19e   : > { %v1336_v52 = vpop.f32.mrf.mxu2 }
 0x19f   : > { %v1337_v15 = vadd.f32 %v1336_v52, %v1224_v42  ;;  %v1731_v52 = vld [vmem:[#allocation2 + $0xf8] sm:$0xff] }
 0x1a1   : > { %v1450_v6 = vadd.f32 %v1449_v56, %v1337_v15 }
 0x1a2   : > { %v1565_v60 = vpop.f32.mrf.mxu0  ;;  %2001 = vmatmul.f32.gmra.mxu3 %v1728_v8  ;;  %v1733_v8 = vld [vmem:[#allocation2 + $0x108] sm:$0xff] }
 0x1a3   : > { %v3814_v31 = vadd.f32 %v1562_v4, %v1450_v6  ;;  %1888 = vmatmul.f32.gmra.mxu2 %v1727_v0  ;;  %v1229_v23 = vpop.f32.mrf.mxu1  ;;  %v1732_v4 = vld [vmem:[#allocation2 + $0x100] sm:$0xff] }
 0x1a4   : > { %1632 = vmatmul.f32.gmra.mxu1 %v1720_v35  ;;  %v1230_v56 = vadd.f32 %v1229_v23, %v3549_v18 }
 0x1a5   : > { %2114 = vmatmul.f32.gmra.mxu0 %v1729_v27  ;;  %v1452_v63 = vpop.f32.mrf.mxu3 }
 0x1a6   : > { %v1339_v9 = vpop.f32.mrf.mxu2 }
 0x1a7   : > { %v1340_v22 = vadd.f32 %v1339_v9, %v1227_v62  ;;  %v1734_v9 = vld [vmem:[#allocation2 + $0x110] sm:$0xff] }
 0x1a9   : > { %v1453_v42 = vadd.f32 %v1452_v63, %v1340_v22 }
 0x1aa   : > { %v1568_v41 = vpop.f32.mrf.mxu0  ;;  %2004 = vmatmul.f32.gmra.mxu3 %v1731_v52  ;;  %v1736_v52 = vld [vmem:[#allocation2 + $0x120] sm:$0xff] }
 0x1ab   : > { %v3817_v15 = vadd.f32 %v1565_v60, %v1453_v42  ;;  %1891 = vmatmul.f32.gmra.mxu2 %v1730_v2  ;;  %v1232_v11 = vpop.f32.mrf.mxu1  ;;  %v1735_v60 = vld [vmem:[#allocation2 + $0x118] sm:$0xff] }
 0x1ac   : > { %1635 = vmatmul.f32.gmra.mxu1 %v1723_v49  ;;  %v1233_v63 = vadd.f32 %v1232_v11, %v3566_v29 }
 0x1ad   : > { %2117 = vmatmul.f32.gmra.mxu0 %v1732_v4  ;;  %v1455_v6 = vpop.f32.mrf.mxu3 }
 0x1ae   : > { %v1342_v0 = vpop.f32.mrf.mxu2 }
 0x1af   : > { %v1343_v43 = vadd.f32 %v1342_v0, %v1230_v56  ;;  %v1737_v0 = vld [vmem:[#allocation2 + $0x128] sm:$0xff] }
 0x1b1   : > { %v1456_v62 = vadd.f32 %v1455_v6, %v1343_v43 }
 0x1b2   : > { %v1571_v35 = vpop.f32.mrf.mxu0  ;;  %2007 = vmatmul.f32.gmra.mxu3 %v1734_v9  ;;  %v1739_v9 = vld [vmem:[#allocation2 + $0x138] sm:$0xff] }
 0x1b3   : > { %v3820_v22 = vadd.f32 %v1568_v41, %v1456_v62  ;;  %1894 = vmatmul.f32.gmra.mxu2 %v1733_v8  ;;  %v1235_v18 = vpop.f32.mrf.mxu1  ;;  %v1738_v41 = vld [vmem:[#allocation2 + $0x130] sm:$0xff] }
 0x1b4   : > { %1638 = vmatmul.f32.gmra.mxu1 %v1726_v58  ;;  %v1236_v6 = vadd.f32 %v1235_v18, %v3447_v7 }
 0x1b5   : > { %2120 = vmatmul.f32.gmra.mxu0 %v1735_v60  ;;  %v1458_v42 = vpop.f32.mrf.mxu3 }
 0x1b6   : > { %v1345_v2 = vpop.f32.mrf.mxu2 }
 0x1b7   : > { %v1346_v23 = vadd.f32 %v1345_v2, %v1233_v63  ;;  %v1740_v2 = vld [vmem:[#allocation2 + $0x140] sm:$0xff] }
 0x1b9   : > { %v1459_v56 = vadd.f32 %v1458_v42, %v1346_v23 }
 0x1ba   : > { %v1574_v49 = vpop.f32.mrf.mxu0  ;;  %2010 = vmatmul.f32.gmra.mxu3 %v1737_v0  ;;  %v1742_v0 = vld [vmem:[#allocation2 + $0x150] sm:$0xff] }
 0x1bb   : > { %v3823_v43 = vadd.f32 %v1571_v35, %v1459_v56  ;;  %1897 = vmatmul.f32.gmra.mxu2 %v1736_v52  ;;  %v1238_v29 = vpop.f32.mrf.mxu1  ;;  %v1741_v35 = vld [vmem:[#allocation2 + $0x148] sm:$0xff] }
 0x1bc   : > { %1641 = vmatmul.f32.gmra.mxu1 %v1729_v27  ;;  %v1239_v42 = vadd.f32 %v1238_v29, %v3463_v24 }
 0x1bd   : > { %2123 = vmatmul.f32.gmra.mxu0 %v1738_v41  ;;  %v1461_v62 = vpop.f32.mrf.mxu3 }
 0x1be   : > { %v1348_v8 = vpop.f32.mrf.mxu2 }
 0x1bf   : > { %v1349_v11 = vadd.f32 %v1348_v8, %v1236_v6  ;;  %v1743_v8 = vld [vmem:[#allocation2 + $0x158] sm:$0xff] }
 0x1c1   : > { %v1462_v63 = vadd.f32 %v1461_v62, %v1349_v11 }
 0x1c2   : > { %v1577_v58 = vpop.f32.mrf.mxu0  ;;  %2013 = vmatmul.f32.gmra.mxu3 %v1740_v2  ;;  %v1745_v2 = vld [vmem:[#allocation2 + $0x168] sm:$0xff] }
 0x1c3   : > { %v3826_v23 = vadd.f32 %v1574_v49, %v1462_v63  ;;  %1900 = vmatmul.f32.gmra.mxu2 %v1739_v9  ;;  %v1241_v7 = vpop.f32.mrf.mxu1  ;;  %v1744_v49 = vld [vmem:[#allocation2 + $0x160] sm:$0xff] }
 0x1c4   : > { %1644 = vmatmul.f32.gmra.mxu1 %v1732_v4  ;;  %v1242_v62 = vadd.f32 %v1241_v7, %v3481_v21 }
 0x1c5   : > { %2126 = vmatmul.f32.gmra.mxu0 %v1741_v35  ;;  %v1464_v56 = vpop.f32.mrf.mxu3 }
 0x1c6   : > { %v1351_v52 = vpop.f32.mrf.mxu2 }
 0x1c7   : > { %v1352_v18 = vadd.f32 %v1351_v52, %v1239_v42  ;;  %v1746_v52 = vld [vmem:[#allocation2 + $0x170] sm:$0xff] }
 0x1c9   : > { %v1465_v6 = vadd.f32 %v1464_v56, %v1352_v18 }
 0x1ca   : > { %v1580_v27 = vpop.f32.mrf.mxu0  ;;  %2016 = vmatmul.f32.gmra.mxu3 %v1743_v8  ;;  %v1748_v8 = vld [vmem:[#allocation2 + $0x180] sm:$0xff] }
 0x1cb   : > { %v3829_v11 = vadd.f32 %v1577_v58, %v1465_v6  ;;  %1903 = vmatmul.f32.gmra.mxu2 %v1742_v0  ;;  %v1244_v24 = vpop.f32.mrf.mxu1  ;;  %v1747_v58 = vld [vmem:[#allocation2 + $0x178] sm:$0xff] }
 0x1cc   : > { %1647 = vmatmul.f32.gmra.mxu1 %v1735_v60  ;;  %v1245_v56 = vadd.f32 %v1244_v24, %v3496_v44 }
 0x1cd   : > { %2129 = vmatmul.f32.gmra.mxu0 %v1744_v49  ;;  %v1467_v63 = vpop.f32.mrf.mxu3 }
 0x1ce   : > { %v1354_v9 = vpop.f32.mrf.mxu2 }
 0x1cf   : > { %v1355_v29 = vadd.f32 %v1354_v9, %v1242_v62  ;;  %v1749_v9 = vld [vmem:[#allocation2 + $0x188] sm:$0xff] }
 0x1d1   : > { %v1468_v42 = vadd.f32 %v1467_v63, %v1355_v29 }
 0x1d2   : > { %v1583_v4 = vpop.f32.mrf.mxu0  ;;  %2019 = vmatmul.f32.gmra.mxu3 %v1746_v52  ;;  %v1751_v52 = vld [vmem:[#allocation2 + $0x198] sm:$0xff] }
 0x1d3   : > { %v3832_v18 = vadd.f32 %v1580_v27, %v1468_v42  ;;  %1906 = vmatmul.f32.gmra.mxu2 %v1745_v2  ;;  %v1247_v21 = vpop.f32.mrf.mxu1  ;;  %v1750_v27 = vld [vmem:[#allocation2 + $0x190] sm:$0xff] }
 0x1d4   : > { %1650 = vmatmul.f32.gmra.mxu1 %v1738_v41  ;;  %v1248_v63 = vadd.f32 %v1247_v21, %v3514_v5 }
 0x1d5   : > { %2132 = vmatmul.f32.gmra.mxu0 %v1747_v58  ;;  %v1470_v6 = vpop.f32.mrf.mxu3 }
 0x1d6   : > { %v1357_v0 = vpop.f32.mrf.mxu2 }
 0x1d7   : > { %v1358_v7 = vadd.f32 %v1357_v0, %v1245_v56  ;;  %v1752_v0 = vld [vmem:[#allocation2 + $0x1a0] sm:$0xff] }
 0x1d9   : > { %v1471_v62 = vadd.f32 %v1470_v6, %v1358_v7 }
 0x1da   : > { %v1586_v60 = vpop.f32.mrf.mxu0  ;;  %2022 = vmatmul.f32.gmra.mxu3 %v1749_v9  ;;  %v1754_v9 = vld [vmem:[#allocation2 + $0x1b0] sm:$0xff] }
 0x1db   : > { %v3835_v29 = vadd.f32 %v1583_v4, %v1471_v62  ;;  %1909 = vmatmul.f32.gmra.mxu2 %v1748_v8  ;;  %v1250_v44 = vpop.f32.mrf.mxu1  ;;  %v1753_v4 = vld [vmem:[#allocation2 + $0x1a8] sm:$0xff] }
 0x1dc   : > { %1653 = vmatmul.f32.gmra.mxu1 %v1741_v35  ;;  %v1251_v6 = vadd.f32 %v1250_v44, %v3531_v13 }
 0x1dd   : > { %2135 = vmatmul.f32.gmra.mxu0 %v1750_v27  ;;  %v1473_v42 = vpop.f32.mrf.mxu3 }
 0x1de   : > { %v1360_v2 = vpop.f32.mrf.mxu2 }
 0x1df   : > { %v1361_v24 = vadd.f32 %v1360_v2, %v1248_v63  ;;  %v1755_v2 = vld [vmem:[#allocation2 + $0x1b8] sm:$0xff] }
 0x1e1   : > { %v1474_v56 = vadd.f32 %v1473_v42, %v1361_v24 }
 0x1e2   : > { %v1589_v41 = vpop.f32.mrf.mxu0  ;;  %2025 = vmatmul.f32.gmra.mxu3 %v1752_v0  ;;  %v1757_v0 = vld [vmem:[#allocation2 + $0x1c8] sm:$0xff] }
 0x1e3   : > { %v3838_v7 = vadd.f32 %v1586_v60, %v1474_v56  ;;  %1912 = vmatmul.f32.gmra.mxu2 %v1751_v52  ;;  %v1253_v5 = vpop.f32.mrf.mxu1  ;;  %v1756_v60 = vld [vmem:[#allocation2 + $0x1c0] sm:$0xff] }
 0x1e4   : > { %1656 = vmatmul.f32.gmra.mxu1 %v1744_v49  ;;  %v1254_v42 = vadd.f32 %v1253_v5, %v3554_v14 }
 0x1e5   : > { %2138 = vmatmul.f32.gmra.mxu0 %v1753_v4  ;;  %v1476_v62 = vpop.f32.mrf.mxu3 }
 0x1e6   : > { %v1363_v8 = vpop.f32.mrf.mxu2 }
 0x1e7   : > { %v1364_v21 = vadd.f32 %v1363_v8, %v1251_v6  ;;  %v1758_v8 = vld [vmem:[#allocation2 + $0x1d0] sm:$0xff] }
 0x1e9   : > { %v1477_v63 = vadd.f32 %v1476_v62, %v1364_v21 }
 0x1ea   : > { %v1592_v35 = vpop.f32.mrf.mxu0  ;;  %2028 = vmatmul.f32.gmra.mxu3 %v1755_v2  ;;  %v1760_v2 = vld [vmem:[#allocation2 + $0x1e0] sm:$0xff] }
 0x1eb   : > { %v3841_v24 = vadd.f32 %v1589_v41, %v1477_v63  ;;  %1915 = vmatmul.f32.gmra.mxu2 %v1754_v9  ;;  %v1256_v13 = vpop.f32.mrf.mxu1  ;;  %v1759_v41 = vld [vmem:[#allocation2 + $0x1d8] sm:$0xff] }
 0x1ec   : > { %1659 = vmatmul.f32.gmra.mxu1 %v1747_v58  ;;  %v1257_v62 = vadd.f32 %v1256_v13, %v3571_v17 }
 0x1ed   : > { %2141 = vmatmul.f32.gmra.mxu0 %v1756_v60  ;;  %v1479_v56 = vpop.f32.mrf.mxu3 }
 0x1ee   : > { %v1366_v52 = vpop.f32.mrf.mxu2 }
 0x1ef   : > { %v1367_v44 = vadd.f32 %v1366_v52, %v1254_v42  ;;  %v1761_v52 = vld [vmem:[#allocation2 + $0x1e8] sm:$0xff] }
 0x1f1   : > { %v1480_v6 = vadd.f32 %v1479_v56, %v1367_v44 }
 0x1f2   : > { %v1595_v49 = vpop.f32.mrf.mxu0  ;;  %2031 = vmatmul.f32.gmra.mxu3 %v1758_v8  ;;  %v1764_v8 = vld [vmem:[#allocation2 + $0x200] sm:$0xff] }
 0x1f3   : > { %v3844_v21 = vadd.f32 %v1592_v35, %v1480_v6  ;;  %1918 = vmatmul.f32.gmra.mxu2 %v1757_v0  ;;  %v1615_v14 = vpop.f32.mrf.mxu1  ;;  %v3849_v35 = vld [vmem:[#allocation2 + $0x1f0] sm:$0xff]  ;;  %v1763_v0 = vld [vmem:[#allocation2 + $0x1f8] sm:$0xff] }
 0x1f4   : > { %1662 = vmatmul.f32.gmra.mxu1 %v1750_v27  ;;  %v1616_v27 = vadd.f32 %v1615_v14, %v3592_v10 }
 0x1f5   : > { %4000 = vst [vmem:[#allocation3_spill] sm:$0xff] %v3844_v21  ;;  %2144 = vmatmul.f32.gmra.mxu0 %v1759_v41  ;;  %v1482_v63 = vpop.f32.mrf.mxu3 }
 0x1f6   : > { %v1369_v9 = vpop.f32.mrf.mxu2 }
 0x1f7   : > { %v1370_v5 = vadd.f32 %v1369_v9, %v1257_v62  ;;  %v3860_v9 = vld [vmem:[#allocation2 + $0x208] sm:$0xff] }
 0x1f9   : > { %v1483_v42 = vadd.f32 %v1482_v63, %v1370_v5 }
 0x1fa   : > { %v2100_v58 = vpop.f32.mrf.mxu0  ;;  %2034 = vmatmul.f32.gmra.mxu3 %v1761_v52 }
 0x1fb   : > { %v3847_v44 = vadd.f32 %v1595_v49, %v1483_v42  ;;  %1921 = vmatmul.f32.gmra.mxu2 %v1760_v2  ;;  %v1618_v17 = vpop.f32.mrf.mxu1  ;;  %v1767_v42 = vld [vmem:[#allocation2 + $0x218] sm:$0xff] }
 0x1fc   : > { %1665 = vmatmul.f32.gmra.mxu1 %v1753_v4  ;;  %v1766_v4 = vld [vmem:[#allocation2 + $0x210] sm:$0xff]  ;;  %v1619_v52 = vadd.f32 %v1618_v17, %v3608_v34 }
 0x1fd   : > { %4001 = vst [vmem:[#allocation4_spill] sm:$0xff] %v3847_v44  ;;  %2147 = vmatmul.f32.gmra.mxu0 %v3849_v35  ;;  %v1987_v13 = vpop.f32.mrf.mxu3  ;;  %v1770_v17 = vld [vmem:[#allocation2 + $0x230] sm:$0xff] }
 0x1fe   : > { %v1874_v56 = vpop.f32.mrf.mxu2 }
 0x1ff   : > { %v1988_v6 = vadd.f32 %v1987_v13, %v1874_v56  ;;  %v3865_v13 = vld [vmem:[#allocation2 + $0x220] sm:$0xff] }
 0x201   : > { %v2101_v62 = vadd.f32 %v2100_v58, %v1988_v6 }
 0x202   : > { %v2103_v49 = vpop.f32.mrf.mxu0  ;;  %2037 = vmatmul.f32.gmra.mxu3 %v1764_v8 }
 0x203   : > { %1924 = vmatmul.f32.gmra.mxu2 %v1763_v0  ;;  %v2196_v5 = vadd.f32 %v2101_v62, %v1616_v27  ;;  %v1621_v2 = vpop.f32.mrf.mxu1 }
 0x204   : > { %1668 = vmatmul.f32.gmra.mxu1 %v1756_v60  ;;  %v1769_v60 = vld [vmem:[#allocation2 + $0x228] sm:$0xff] }
 0x205   : > { %2336 = vst [vmem:[%s3858_s28] sm:$0xff] %v2196_v5  ;;  %2150 = vmatmul.f32.gmra.mxu0 %v3860_v9  ;;  %v1990_v10 = vpop.f32.mrf.mxu3  ;;  %v2266_v27 = vmul.f32 %v2196_v5, %v2196_v5 }
 0x206   : > { %v1877_v63 = vpop.f32.mrf.mxu2 }
 0x207   : > { %v1991_v14 = vadd.f32 %v1990_v10, %v1877_v63 }
 0x209   : > { %v2104_v58 = vadd.f32 %v2103_v49, %v1991_v14  ;;  %v1622_v49 = vadd.f32 %v1621_v2, %v3626_v39 }
 0x20a   : > { %v2106_v56 = vpop.f32.mrf.mxu0  ;;  %2040 = vmatmul.f32.gmra.mxu3 %v1767_v42  ;;  %v3870_v42 = vld [vmem:[#allocation2 + $0x238] sm:$0xff] }
 0x20b   : > { %1927 = vmatmul.f32.gmra.mxu2 %v1766_v4  ;;  %v2197_v0 = vadd.f32 %v2104_v58, %v1619_v52  ;;  %v1624_v8 = vpop.f32.mrf.mxu1 }
 0x20c   : > { %1671 = vmatmul.f32.gmra.mxu1 %v1759_v41  ;;  %v1625_v39 = vadd.f32 %v1624_v8, %v3639_v33 }
 0x20d   : > { %v2228_v62 = vadd.f32 %v2197_v0, %v2196_v5  ;;  %v2267_v44 = vmul.f32 %v2197_v0, %v2197_v0  ;;  %2337 = vst [vmem:[%s3858_s28 + $0x8] sm:$0xff] %v2197_v0  ;;  %2153 = vmatmul.f32.gmra.mxu0 %v3865_v13  ;;  %v1993_v63 = vpop.f32.mrf.mxu3 }
 0x20e   : > { %v1880_v6 = vpop.f32.mrf.mxu2 }
 0x20f   : > { %v2298_v10 = vadd.f32 %v2267_v44, %v2266_v27  ;;  %v1994_v34 = vadd.f32 %v1993_v63, %v1880_v6  ;;  %v3877_v27 = vld [vmem:[#allocation2 + $0x250] sm:$0xff] }
 0x211   : > { %v2107_v4 = vadd.f32 %v2106_v56, %v1994_v34 }
 0x212   : > { %v2109_v14 = vpop.f32.mrf.mxu0  ;;  %2043 = vmatmul.f32.gmra.mxu3 %v1770_v17 }
 0x213   : > { %1930 = vmatmul.f32.gmra.mxu2 %v1769_v60  ;;  %v2198_v52 = vadd.f32 %v2107_v4, %v1622_v49  ;;  %v1627_v58 = vpop.f32.mrf.mxu1 }
 0x214   : > { %1674 = vmatmul.f32.gmra.mxu1 %v3849_v35 }
 0x215   : > { %v2229_v0 = vadd.f32 %v2228_v62, %v2198_v52  ;;  %v2268_v21 = vmul.f32 %v2198_v52, %v2198_v52  ;;  %2338 = vst [vmem:[%s3858_s28 + $0x10] sm:$0xff] %v2198_v52  ;;  %2156 = vmatmul.f32.gmra.mxu0 %v3870_v42  ;;  %v1996_v44 = vpop.f32.mrf.mxu3 }
 0x216   : > { %v1883_v5 = vpop.f32.mrf.mxu2 }
 0x217   : > { %v2299_v41 = vadd.f32 %v2298_v10, %v2268_v21  ;;  %v1997_v6 = vadd.f32 %v1996_v44, %v1883_v5 }
 0x219   : > { %v2110_v2 = vadd.f32 %v2109_v14, %v1997_v6 }
 0x21a   : > { %v2112_v56 = vpop.f32.mrf.mxu0  ;;  %2046 = vmatmul.f32.gmra.mxu3 %v3703_v32  ;;  %v3885_v32 = vld [vmem:[#allocation2 + $0x268] sm:$0xff] }
 0x21b   : > { %1933 = vmatmul.f32.gmra.mxu2 %v3697_v55  ;;  %v2199_v63 = vadd.f32 %v2110_v2, %v1625_v39  ;;  %v1630_v60 = vpop.f32.mrf.mxu1  ;;  %v1628_v55 = vadd.f32 %v1627_v58, %v3657_v16 }
 0x21c   : > { %1677 = vmatmul.f32.gmra.mxu1 %v3860_v9  ;;  %v1631_v58 = vadd.f32 %v1630_v60, %v3668_v20  ;;  %v1782_v20 = vld [vmem:[#allocation2 + $0x290] sm:$0xff] }
 0x21d   : > { %v2230_v34 = vadd.f32 %v2229_v0, %v2199_v63  ;;  %v2269_v17 = vmul.f32 %v2199_v63, %v2199_v63  ;;  %2339 = vst [vmem:[%s3858_s28 + $0x18] sm:$0xff] %v2199_v63  ;;  %2159 = vmatmul.f32.gmra.mxu0 %v3877_v27  ;;  %v1999_v21 = vpop.f32.mrf.mxu3 }
 0x21e   : > { %v1886_v62 = vpop.f32.mrf.mxu2 }
 0x21f   : > { %v2300_v35 = vadd.f32 %v2299_v41, %v2269_v17  ;;  %v2000_v33 = vadd.f32 %v1999_v21, %v1886_v62  ;;  %v3893_v41 = vld [vmem:[#allocation2 + $0x280] sm:$0xff]  ;;  %v3900_v21 = vld [vmem:[#allocation2 + $0x298] sm:$0xff] }
 0x221   : > { %v2113_v8 = vadd.f32 %v2112_v56, %v2000_v33 }
 0x222   : > { %v2115_v10 = vpop.f32.mrf.mxu0  ;;  %2049 = vmatmul.f32.gmra.mxu3 %v3725_v36 }
 0x223   : > { %1936 = vmatmul.f32.gmra.mxu2 %v3721_v25  ;;  %v2200_v49 = vadd.f32 %v2113_v8, %v1628_v55  ;;  %v1633_v14 = vpop.f32.mrf.mxu1  ;;  %v1779_v25 = vld [vmem:[#allocation2 + $0x278] sm:$0xff] }
 0x224   : > { %1680 = vmatmul.f32.gmra.mxu1 %v3865_v13 }
 0x225   : > { %v2231_v52 = vadd.f32 %v2230_v34, %v2200_v49  ;;  %v2270_v5 = vmul.f32 %v2200_v49, %v2200_v49  ;;  %2340 = vst [vmem:[%s3858_s28 + $0x20] sm:$0xff] %v2200_v49  ;;  %2162 = vmatmul.f32.gmra.mxu0 %v3885_v32  ;;  %v2002_v0 = vpop.f32.mrf.mxu3 }
 0x226   : > { %v1889_v4 = vpop.f32.mrf.mxu2 }
 0x227   : > { %v2301_v9 = vadd.f32 %v2300_v35, %v2270_v5  ;;  %v2003_v16 = vadd.f32 %v2002_v0, %v1889_v4  ;;  %v3907_v5 = vld [vmem:[#allocation2 + $0x2b0] sm:$0xff] }
 0x229   : > { %v2116_v44 = vadd.f32 %v2115_v10, %v2003_v16 }
 0x22a   : > { %v2118_v36 = vpop.f32.mrf.mxu0  ;;  %2052 = vmatmul.f32.gmra.mxu3 %v1779_v25 }
 0x22b   : > { %1939 = vmatmul.f32.gmra.mxu2 %v3736_v53  ;;  %v2201_v6 = vadd.f32 %v2116_v44, %v1631_v58  ;;  %v1636_v2 = vpop.f32.mrf.mxu1  ;;  %v1634_v53 = vadd.f32 %v1633_v14, %v3684_v3  ;;  %v1785_v3 = vld [vmem:[#allocation2 + $0x2a8] sm:$0xff] }
 0x22c   : > { %1683 = vmatmul.f32.gmra.mxu1 %v3870_v42 }
 0x22d   : > { %v2232_v56 = vadd.f32 %v2231_v52, %v2201_v6  ;;  %v2271_v63 = vmul.f32 %v2201_v6, %v2201_v6  ;;  %2341 = vst [vmem:[%s3858_s28 + $0x28] sm:$0xff] %v2201_v6  ;;  %2165 = vmatmul.f32.gmra.mxu0 %v3893_v41  ;;  %v2005_v62 = vpop.f32.mrf.mxu3 }
 0x22e   : > { %v1892_v39 = vpop.f32.mrf.mxu2 }
 0x22f   : > { %v2302_v13 = vadd.f32 %v2301_v9, %v2271_v63  ;;  %v2006_v34 = vadd.f32 %v2005_v62, %v1892_v39 }
 0x231   : > { %v2119_v60 = vadd.f32 %v2118_v36, %v2006_v34 }
 0x232   : > { %v2121_v17 = vpop.f32.mrf.mxu0  ;;  %2055 = vmatmul.f32.gmra.mxu3 %v1782_v20 }
 0x233   : > { %1942 = vmatmul.f32.gmra.mxu2 %v3756_v12  ;;  %v2202_v35 = vadd.f32 %v2119_v60, %v1634_v53  ;;  %v1639_v55 = vpop.f32.mrf.mxu1  ;;  %v1637_v12 = vadd.f32 %v1636_v2, %v3700_v50  ;;  %v1788_v50 = vld [vmem:[#allocation2 + $0x2c0] sm:$0xff]  ;;  %v3914_v2 = vld [vmem:[#allocation2 + $0x2c8] sm:$0xff] }
 0x234   : > { %1686 = vmatmul.f32.gmra.mxu1 %v3877_v27 }
 0x235   : > { %v2233_v8 = vadd.f32 %v2232_v56, %v2202_v35  ;;  %v2272_v10 = vmul.f32 %v2202_v35, %v2202_v35  ;;  %2342 = vst [vmem:[%s3858_s28 + $0x30] sm:$0xff] %v2202_v35  ;;  %2168 = vmatmul.f32.gmra.mxu0 %v3900_v21  ;;  %v2008_v49 = vpop.f32.mrf.mxu3  ;;  %v3921_v35 = vld [vmem:[#allocation2 + $0x2e0] sm:$0xff] }
 0x236   : > { %v1895_v33 = vpop.f32.mrf.mxu2 }
 0x237   : > { %v2303_v42 = vadd.f32 %v2302_v13, %v2272_v10  ;;  %v2009_v4 = vadd.f32 %v2008_v49, %v1895_v33 }
 0x239   : > { %v2122_v14 = vadd.f32 %v2121_v17, %v2009_v4 }
 0x23a   : > { %v2124_v52 = vpop.f32.mrf.mxu0  ;;  %2058 = vmatmul.f32.gmra.mxu3 %v1785_v3 }
 0x23b   : > { %1945 = vmatmul.f32.gmra.mxu2 %v3769_v37  ;;  %v2203_v0 = vadd.f32 %v2122_v14, %v1637_v12  ;;  %v1642_v16 = vpop.f32.mrf.mxu1  ;;  %v1640_v37 = vadd.f32 %v1639_v55, %v3723_v19  ;;  %v1791_v19 = vld [vmem:[#allocation2 + $0x2d8] sm:$0xff] }
 0x23c   : > { %1689 = vmatmul.f32.gmra.mxu1 %v3885_v32  ;;  %v3928_v14 = vld [vmem:[#allocation2 + $0x2f8] sm:$0xff] }
 0x23d   : > { %v2234_v25 = vadd.f32 %v2233_v8, %v2203_v0  ;;  %v2273_v58 = vmul.f32 %v2203_v0, %v2203_v0  ;;  %2343 = vst [vmem:[%s3858_s28 + $0x38] sm:$0xff] %v2203_v0  ;;  %2171 = vmatmul.f32.gmra.mxu0 %v3907_v5  ;;  %v2011_v44 = vpop.f32.mrf.mxu3 }
 0x23e   : > { %v1898_v9 = vpop.f32.mrf.mxu2 }
 0x23f   : > { %v2304_v27 = vadd.f32 %v2303_v42, %v2273_v58  ;;  %v2012_v36 = vadd.f32 %v2011_v44, %v1898_v9 }
 0x241   : > { %v2125_v6 = vadd.f32 %v2124_v52, %v2012_v36 }
 0x242   : > { %v2127_v39 = vpop.f32.mrf.mxu0  ;;  %2061 = vmatmul.f32.gmra.mxu3 %v1788_v50 }
 0x243   : > { %1948 = vmatmul.f32.gmra.mxu2 %v3776_v51  ;;  %v2204_v56 = vadd.f32 %v2125_v6, %v1640_v37  ;;  %v1645_v62 = vpop.f32.mrf.mxu1  ;;  %v1643_v51 = vadd.f32 %v1642_v16, %v3740_v54  ;;  %v1794_v54 = vld [vmem:[#allocation2 + $0x2f0] sm:$0xff] }
 0x244   : > { %1692 = vmatmul.f32.gmra.mxu1 %v3893_v41  ;;  %v1798_v37 = vld [vmem:[#allocation2 + $0x310] sm:$0xff] }
 0x245   : > { %v2235_v13 = vadd.f32 %v2234_v25, %v2204_v56  ;;  %v2274_v34 = vmul.f32 %v2204_v56, %v2204_v56  ;;  %2344 = vst [vmem:[%s3858_s28 + $0x40] sm:$0xff] %v2204_v56  ;;  %2174 = vmatmul.f32.gmra.mxu0 %v3914_v2  ;;  %v2014_v20 = vpop.f32.mrf.mxu3 }
 0x246   : > { %v1901_v63 = vpop.f32.mrf.mxu2 }
 0x247   : > { %v2305_v32 = vadd.f32 %v2304_v27, %v2274_v34  ;;  %v2015_v53 = vadd.f32 %v2014_v20, %v1901_v63  ;;  %v1799_v34 = vld [vmem:[#allocation2 + $0x318] sm:$0xff] }
 0x249   : > { %v2128_v60 = vadd.f32 %v2127_v39, %v2015_v53 }
 0x24a   : > { %v2130_v17 = vpop.f32.mrf.mxu0  ;;  %2064 = vmatmul.f32.gmra.mxu3 %v1791_v19 }
 0x24b   : > { %1951 = vmatmul.f32.gmra.mxu2 %v3782_v28  ;;  %v2205_v33 = vadd.f32 %v2128_v60, %v1643_v51  ;;  %v1648_v8 = vpop.f32.mrf.mxu1  ;;  %v1646_v28 = vadd.f32 %v1645_v62, %v3758_v47  ;;  %v1801_v51 = vld [vmem:[#allocation2 + $0x328] sm:$0xff] }
 0x24c   : > { %1695 = vmatmul.f32.gmra.mxu1 %v3900_v21  ;;  %v1796_v21 = vld [vmem:[#allocation2 + $0x300] sm:$0xff]  ;;  %v1649_v27 = vadd.f32 %v1648_v8, %v3771_v57 }
 0x24d   : > { %v2236_v10 = vadd.f32 %v2235_v13, %v2205_v33  ;;  %v2275_v49 = vmul.f32 %v2205_v33, %v2205_v33  ;;  %2345 = vst [vmem:[%s3858_s28 + $0x48] sm:$0xff] %v2205_v33  ;;  %2177 = vmatmul.f32.gmra.mxu0 %v3921_v35  ;;  %v2017_v42 = vpop.f32.mrf.mxu3  ;;  %v1800_v57 = vld [vmem:[#allocation2 + $0x320] sm:$0xff] }
 0x24e   : > { %v1904_v55 = vpop.f32.mrf.mxu2 }
 0x24f   : > { %v2306_v41 = vadd.f32 %v2305_v32, %v2275_v49  ;;  %v2018_v4 = vadd.f32 %v2017_v42, %v1904_v55 }
 0x251   : > { %v2131_v3 = vadd.f32 %v2130_v17, %v2018_v4 }
 0x252   : > { %v2133_v12 = vpop.f32.mrf.mxu0  ;;  %2067 = vmatmul.f32.gmra.mxu3 %v1794_v54 }
 0x253   : > { %1954 = vmatmul.f32.gmra.mxu2 %v3789_v45  ;;  %v2206_v52 = vadd.f32 %v2131_v3, %v1646_v28  ;;  %v1651_v9 = vpop.f32.mrf.mxu1  ;;  %v1797_v45 = vld [vmem:[#allocation2 + $0x308] sm:$0xff] }
 0x254   : > { %1698 = vmatmul.f32.gmra.mxu1 %v3907_v5  ;;  %v1652_v32 = vadd.f32 %v1651_v9, %v3778_v46 }
 0x255   : > { %v2237_v16 = vadd.f32 %v2236_v10, %v2206_v52  ;;  %v2276_v25 = vmul.f32 %v2206_v52, %v2206_v52  ;;  %2346 = vst [vmem:[%s3858_s28 + $0x50] sm:$0xff] %v2206_v52  ;;  %2180 = vmatmul.f32.gmra.mxu0 %v3928_v14  ;;  %v2020_v58 = vpop.f32.mrf.mxu3 }
 0x256   : > { %v1907_v0 = vpop.f32.mrf.mxu2 }
 0x257   : > { %v2307_v44 = vadd.f32 %v2306_v41, %v2276_v25  ;;  %v2021_v47 = vadd.f32 %v2020_v58, %v1907_v0  ;;  %v2648_v58 = vld [vmem:[#allocation2] sm:$0xff] }
 0x259   : > { %v2134_v36 = vadd.f32 %v2133_v12, %v2021_v47 }
 0x25a   : > { %v2136_v50 = vpop.f32.mrf.mxu0  ;;  %2070 = vmatmul.f32.gmra.mxu3 %v1797_v45 }
 0x25b   : > { %1957 = vmatmul.f32.gmra.mxu2 %v1796_v21  ;;  %v2207_v6 = vadd.f32 %v2134_v36, %v1649_v27  ;;  %v1654_v56 = vpop.f32.mrf.mxu1 }
 0x25c   : > { %1701 = vmatmul.f32.gmra.mxu1 %v3914_v2  ;;  %v1655_v46 = vadd.f32 %v1654_v56, %v3784_v40 }
 0x25d   : > { %v2238_v63 = vadd.f32 %v2237_v16, %v2207_v6  ;;  %v2277_v62 = vmul.f32 %v2207_v6, %v2207_v6  ;;  %2347 = vst [vmem:[%s3858_s28 + $0x58] sm:$0xff] %v2207_v6  ;;  %2183 = vmatmul.f32.gmra.mxu0 %v1798_v37  ;;  %v2023_v13 = vpop.f32.mrf.mxu3 }
 0x25e   : > { %v1910_v39 = vpop.f32.mrf.mxu2 }
 0x25f   : > { %v2308_v20 = vadd.f32 %v2307_v44, %v2277_v62  ;;  %v2024_v5 = vadd.f32 %v2023_v13, %v1910_v39 }
 0x261   : > { %v2137_v53 = vadd.f32 %v2136_v50, %v2024_v5 }
 0x262   : > { %v2139_v19 = vpop.f32.mrf.mxu0  ;;  %2073 = vmatmul.f32.gmra.mxu3 %v1800_v57 }
 0x263   : > { %1960 = vmatmul.f32.gmra.mxu2 %v1799_v34  ;;  %v2208_v60 = vadd.f32 %v2137_v53, %v1652_v32  ;;  %v1657_v33 = vpop.f32.mrf.mxu1 }
 0x264   : > { %1704 = vmatmul.f32.gmra.mxu1 %v3921_v35  ;;  %v1658_v40 = vadd.f32 %v1657_v33, %v3791_v26 }
 0x265   : > { %v2239_v55 = vadd.f32 %v2238_v63, %v2208_v60  ;;  %v2278_v8 = vmul.f32 %v2208_v60, %v2208_v60  ;;  %2348 = vst [vmem:[%s3858_s28 + $0x60] sm:$0xff] %v2208_v60  ;;  %2186 = vmatmul.f32.gmra.mxu0 %v1801_v51  ;;  %v2026_v10 = vpop.f32.mrf.mxu3 }
 0x266   : > { %v1913_v17 = vpop.f32.mrf.mxu2 }
 0x267   : > { %v2309_v49 = vadd.f32 %v2308_v20, %v2278_v8  ;;  %v2027_v42 = vadd.f32 %v2026_v10, %v1913_v17 }
 0x269   : > { %v2140_v2 = vadd.f32 %v2139_v19, %v2027_v42 }
 0x26a   : > { %v2142_v41 = vpop.f32.mrf.mxu0  ;;  %2076 = vmatmul.f32.gmra.mxu3 %v3795_v38 }
 0x26b   : > { %1963 = vmatmul.f32.gmra.mxu2 %v3795_v38  ;;  %v2209_v4 = vadd.f32 %v2140_v2, %v1655_v46  ;;  %v1660_v28 = vpop.f32.mrf.mxu1 }
 0x26c   : > { %1707 = vmatmul.f32.gmra.mxu1 %v3928_v14  ;;  %v1661_v14 = vadd.f32 %v1660_v28, %v3798_v59 }
 0x26d   : > { %v2240_v3 = vadd.f32 %v2239_v55, %v2209_v4  ;;  %v2279_v12 = vmul.f32 %v2209_v4, %v2209_v4  ;;  %2349 = vst [vmem:[%s3858_s28 + $0x68] sm:$0xff] %v2209_v4  ;;  %2189 = vmatmul.f32.gmra.mxu0 %v3795_v38  ;;  %v2029_v52 = vpop.f32.mrf.mxu3 }
 0x26e   : > { %v1916_v54 = vpop.f32.mrf.mxu2 }
 0x26f   : > { %v2310_v0 = vadd.f32 %v2309_v49, %v2279_v12  ;;  %v2030_v35 = vadd.f32 %v2029_v52, %v1916_v54 }
 0x271   : > { %v2143_v9 = vadd.f32 %v2142_v41, %v2030_v35 }
 0x272   : > { %v2145_v16 = vpop.f32.mrf.mxu0  ;;  %2079 = vmatmul.f32.gmra.mxu3 %v2648_v58 }
 0x273   : > { %1966 = vmatmul.f32.gmra.mxu2 %v3795_v38  ;;  %v2210_v25 = vadd.f32 %v2143_v9, %v1658_v40  ;;  %v1663_v44 = vpop.f32.mrf.mxu1 }
 0x274   : > { %v1664_v20 = vadd.f32 %v1663_v44, %v3802_v1 }
 0x275   : > { %v2241_v47 = vadd.f32 %v2240_v3, %v2210_v25  ;;  %v2280_v45 = vmul.f32 %v2210_v25, %v2210_v25  ;;  %2350 = vst [vmem:[%s3858_s28 + $0x70] sm:$0xff] %v2210_v25  ;;  %2192 = vmatmul.f32.gmra.mxu0 %v2648_v58  ;;  %v2032_v27 = vpop.f32.mrf.mxu3 }
 0x276   : > { %v1919_v21 = vpop.f32.mrf.mxu2 }
 0x277   : > { %v2311_v36 = vadd.f32 %v2310_v0, %v2280_v45  ;;  %v2033_v50 = vadd.f32 %v2032_v27, %v1919_v21 }
 0x279   : > { %v2146_v26 = vadd.f32 %v2145_v16, %v2033_v50 }
 0x27a   : > { %v2148_v37 = vpop.f32.mrf.mxu0 }
 0x27b   : > { %v2211_v6 = vadd.f32 %v2146_v26, %v1661_v14  ;;  %v1666_v39 = vpop.f32.mrf.mxu1 }
 0x27c   : > { %v1667_v55 = vadd.f32 %v1666_v39, %v3805_v61 }
 0x27d   : > { %v2242_v56 = vadd.f32 %v2241_v47, %v2211_v6  ;;  %v2281_v63 = vmul.f32 %v2211_v6, %v2211_v6  ;;  %2351 = vst [vmem:[%s3858_s28 + $0x78] sm:$0xff] %v2211_v6  ;;  %v2035_v62 = vpop.f32.mrf.mxu3 }
 0x27e   : > { %v1922_v38 = vpop.f32.mrf.mxu2 }
 0x27f   : > { %v2312_v13 = vadd.f32 %v2311_v36, %v2281_v63  ;;  %v2036_v34 = vadd.f32 %v2035_v62, %v1922_v38 }
 0x281   : > { %v2149_v5 = vadd.f32 %v2148_v37, %v2036_v34 }
 0x282   : > { %v2151_v57 = vpop.f32.mrf.mxu0 }
 0x283   : > { %v2212_v32 = vadd.f32 %v2149_v5, %v1664_v20  ;;  %v1669_v59 = vpop.f32.mrf.mxu1 }
 0x284   : > { %v1670_v28 = vadd.f32 %v1669_v59, %v3808_v48 }
 0x285   : > { %v2243_v19 = vadd.f32 %v2242_v56, %v2212_v32  ;;  %v2282_v51 = vmul.f32 %v2212_v32, %v2212_v32  ;;  %2352 = vst [vmem:[%s3858_s28 + $0x80] sm:$0xff] %v2212_v32  ;;  %v2038_v60 = vpop.f32.mrf.mxu3 }
 0x286   : > { %v1925_v53 = vpop.f32.mrf.mxu2 }
 0x287   : > { %v2313_v17 = vadd.f32 %v2312_v13, %v2282_v51  ;;  %v2039_v33 = vadd.f32 %v2038_v60, %v1925_v53 }
 0x289   : > { %v2152_v8 = vadd.f32 %v2151_v57, %v2039_v33 }
 0x28a   : > { %v2154_v10 = vpop.f32.mrf.mxu0 }
 0x28b   : > { %v2213_v49 = vadd.f32 %v2152_v8, %v1667_v55  ;;  %v1672_v1 = vpop.f32.mrf.mxu1 }
 0x28c   : > { %v1673_v58 = vadd.f32 %v1672_v1, %v3811_v30 }
 0x28d   : > { %v2244_v46 = vadd.f32 %v2243_v19, %v2213_v49  ;;  %v2283_v2 = vmul.f32 %v2213_v49, %v2213_v49  ;;  %2353 = vst [vmem:[%s3858_s28 + $0x88] sm:$0xff] %v2213_v49  ;;  %v2041_v41 = vpop.f32.mrf.mxu3 }
 0x28e   : > { %v1928_v42 = vpop.f32.mrf.mxu2 }
 0x28f   : > { %v2314_v4 = vadd.f32 %v2313_v17, %v2283_v2  ;;  %v2042_v54 = vadd.f32 %v2041_v41, %v1928_v42 }
 0x291   : > { %v2155_v3 = vadd.f32 %v2154_v10, %v2042_v54 }
 0x292   : > { %v2157_v12 = vpop.f32.mrf.mxu0 }
 0x293   : > { %v2214_v52 = vadd.f32 %v2155_v3, %v1670_v28  ;;  %v1675_v61 = vpop.f32.mrf.mxu1 }
 0x294   : > { %v1676_v37 = vadd.f32 %v1675_v61, %v3814_v31 }
 0x295   : > { %v2245_v35 = vadd.f32 %v2244_v46, %v2214_v52  ;;  %v2284_v40 = vmul.f32 %v2214_v52, %v2214_v52  ;;  %2354 = vst [vmem:[%s3858_s28 + $0x90] sm:$0xff] %v2214_v52  ;;  %v2044_v9 = vpop.f32.mrf.mxu3 }
 0x296   : > { %v1931_v0 = vpop.f32.mrf.mxu2 }
 0x297   : > { %v2315_v16 = vadd.f32 %v2314_v4, %v2284_v40  ;;  %v2045_v25 = vadd.f32 %v2044_v9, %v1931_v0 }
 0x299   : > { %v2158_v21 = vadd.f32 %v2157_v12, %v2045_v25 }
 0x29a   : > { %v2160_v44 = vpop.f32.mrf.mxu0 }
 0x29b   : > { %v2215_v47 = vadd.f32 %v2158_v21, %v1673_v58  ;;  %v1678_v48 = vpop.f32.mrf.mxu1 }
 0x29c   : > { %v1679_v5 = vadd.f32 %v1678_v48, %v3817_v15 }
 0x29d   : > { %v2246_v27 = vadd.f32 %v2245_v35, %v2215_v47  ;;  %v2285_v36 = vmul.f32 %v2215_v47, %v2215_v47  ;;  %2355 = vst [vmem:[%s3858_s28 + $0x98] sm:$0xff] %v2215_v47  ;;  %v2047_v50 = vpop.f32.mrf.mxu3 }
 0x29e   : > { %v1934_v45 = vpop.f32.mrf.mxu2 }
 0x29f   : > { %v2316_v14 = vadd.f32 %v2315_v16, %v2285_v36  ;;  %v2048_v26 = vadd.f32 %v2047_v50, %v1934_v45 }
 0x2a1   : > { %v2161_v6 = vadd.f32 %v2160_v44, %v2048_v26 }
 0x2a2   : > { %v2163_v38 = vpop.f32.mrf.mxu0 }
 0x2a3   : > { %v2216_v39 = vadd.f32 %v2161_v6, %v1676_v37  ;;  %v1681_v30 = vpop.f32.mrf.mxu1 }
 0x2a4   : > { %v1682_v55 = vadd.f32 %v1681_v30, %v3820_v22 }
 0x2a5   : > { %v2247_v63 = vadd.f32 %v2246_v27, %v2216_v39  ;;  %v2286_v62 = vmul.f32 %v2216_v39, %v2216_v39  ;;  %2356 = vst [vmem:[%s3858_s28 + $0xa0] sm:$0xff] %v2216_v39  ;;  %v2050_v13 = vpop.f32.mrf.mxu3 }
 0x2a6   : > { %v1937_v56 = vpop.f32.mrf.mxu2 }
 0x2a7   : > { %v2317_v34 = vadd.f32 %v2316_v14, %v2286_v62  ;;  %v2051_v20 = vadd.f32 %v2050_v13, %v1937_v56 }
 0x2a9   : > { %v2164_v57 = vadd.f32 %v2163_v38, %v2051_v20 }
 0x2aa   : > { %v2166_v32 = vpop.f32.mrf.mxu0 }
 0x2ab   : > { %v2217_v53 = vadd.f32 %v2164_v57, %v1679_v5  ;;  %v1684_v31 = vpop.f32.mrf.mxu1 }
 0x2ac   : > { %v1685_v54 = vadd.f32 %v1684_v31, %v3823_v43 }
 0x2ad   : > { %v2248_v19 = vadd.f32 %v2247_v63, %v2217_v53  ;;  %v2287_v51 = vmul.f32 %v2217_v53, %v2217_v53  ;;  %2357 = vst [vmem:[%s3858_s28 + $0xa8] sm:$0xff] %v2217_v53  ;;  %v2053_v60 = vpop.f32.mrf.mxu3 }
 0x2ae   : > { %v1940_v59 = vpop.f32.mrf.mxu2 }
 0x2af   : > { %v2318_v17 = vadd.f32 %v2317_v34, %v2287_v51  ;;  %v2054_v33 = vadd.f32 %v2053_v60, %v1940_v59 }
 0x2b1   : > { %v2167_v8 = vadd.f32 %v2166_v32, %v2054_v33 }
 0x2b2   : > { %v2169_v10 = vpop.f32.mrf.mxu0 }
 0x2b3   : > { %v2218_v49 = vadd.f32 %v2167_v8, %v1682_v55  ;;  %v1687_v15 = vpop.f32.mrf.mxu1 }
 0x2b4   : > { %v1688_v16 = vadd.f32 %v1687_v15, %v3826_v23 }
 0x2b5   : > { %v2249_v1 = vadd.f32 %v2248_v19, %v2218_v49  ;;  %v2288_v46 = vmul.f32 %v2218_v49, %v2218_v49  ;;  %2358 = vst [vmem:[%s3858_s28 + $0xb0] sm:$0xff] %v2218_v49  ;;  %v2056_v2 = vpop.f32.mrf.mxu3 }
 0x2b6   : > { %v1943_v42 = vpop.f32.mrf.mxu2 }
 0x2b7   : > { %v2319_v41 = vadd.f32 %v2318_v17, %v2288_v46  ;;  %v2057_v4 = vadd.f32 %v2056_v2, %v1943_v42 }
 0x2b9   : > { %v2170_v28 = vadd.f32 %v2169_v10, %v2057_v4 }
 0x2ba   : > { %v2172_v3 = vpop.f32.mrf.mxu0 }
 0x2bb   : > { %v2219_v12 = vadd.f32 %v2170_v28, %v1685_v54  ;;  %v1690_v22 = vpop.f32.mrf.mxu1 }
 0x2bc   : > { %v1691_v50 = vadd.f32 %v1690_v22, %v3829_v11 }
 0x2bd   : > { %v2250_v0 = vadd.f32 %v2249_v1, %v2219_v12  ;;  %v2289_v61 = vmul.f32 %v2219_v12, %v2219_v12  ;;  %2359 = vst [vmem:[%s3858_s28 + $0xb8] sm:$0xff] %v2219_v12  ;;  %v2059_v35 = vpop.f32.mrf.mxu3 }
 0x2be   : > { %v1946_v52 = vpop.f32.mrf.mxu2 }
 0x2bf   : > { %v2320_v40 = vadd.f32 %v2319_v41, %v2289_v61  ;;  %v2060_v9 = vadd.f32 %v2059_v35, %v1946_v52 }
 0x2c1   : > { %v2173_v25 = vadd.f32 %v2172_v3, %v2060_v9 }
 0x2c2   : > { %v2175_v58 = vpop.f32.mrf.mxu0 }
 0x2c3   : > { %v2220_v21 = vadd.f32 %v2173_v25, %v1688_v16  ;;  %v1693_v43 = vpop.f32.mrf.mxu1 }
 0x2c4   : > { %v1694_v62 = vadd.f32 %v1693_v43, %v3832_v18 }
 0x2c5   : > { %v2251_v47 = vadd.f32 %v2250_v0, %v2220_v21  ;;  %v2290_v45 = vmul.f32 %v2220_v21, %v2220_v21  ;;  %2360 = vst [vmem:[%s3858_s28 + $0xc0] sm:$0xff] %v2220_v21  ;;  %v2062_v48 = vpop.f32.mrf.mxu3 }
 0x2c6   : > { %v1949_v44 = vpop.f32.mrf.mxu2 }
 0x2c7   : > { %v2321_v27 = vadd.f32 %v2320_v40, %v2290_v45  ;;  %v2063_v36 = vadd.f32 %v2062_v48, %v1949_v44 }
 0x2c9   : > { %v2176_v14 = vadd.f32 %v2175_v58, %v2063_v36  ;;  %v4002_v58 = vld [vmem:[#allocation3_spill] sm:$0xff] }
 0x2ca   : > { %v2178_v26 = vpop.f32.mrf.mxu0 }
 0x2cb   : > { %v2221_v37 = vadd.f32 %v2176_v14, %v1691_v50  ;;  %v1696_v39 = vpop.f32.mrf.mxu1 }
 0x2cc   : > { %v1697_v19 = vadd.f32 %v1696_v39, %v3835_v29 }
 0x2cd   : > { %v2252_v23 = vadd.f32 %v2251_v47, %v2221_v37  ;;  %v2291_v38 = vmul.f32 %v2221_v37, %v2221_v37  ;;  %2361 = vst [vmem:[%s3858_s28 + $0xc8] sm:$0xff] %v2221_v37  ;;  %v2065_v56 = vpop.f32.mrf.mxu3 }
 0x2ce   : > { %v1952_v6 = vpop.f32.mrf.mxu2 }
 0x2cf   : > { %v2322_v30 = vadd.f32 %v2321_v27, %v2291_v38  ;;  %v2066_v63 = vadd.f32 %v2065_v56, %v1952_v6 }
 0x2d1   : > { %v2179_v13 = vadd.f32 %v2178_v26, %v2066_v63  ;;  %v4003_v26 = vld [vmem:[#allocation4_spill] sm:$0xff] }
 0x2d2   : > { %v2181_v34 = vpop.f32.mrf.mxu0 }
 0x2d3   : > { %v2222_v20 = vadd.f32 %v2179_v13, %v1694_v62  ;;  %v1699_v31 = vpop.f32.mrf.mxu1 }
 0x2d4   : > { %v1700_v42 = vadd.f32 %v1699_v31, %v3838_v7 }
 0x2d5   : > { %v2253_v11 = vadd.f32 %v2252_v23, %v2222_v20  ;;  %v2292_v57 = vmul.f32 %v2222_v20, %v2222_v20  ;;  %2362 = vst [vmem:[%s3858_s28 + $0xd0] sm:$0xff] %v2222_v20  ;;  %v2068_v32 = vpop.f32.mrf.mxu3 }
 0x2d6   : > { %v1955_v5 = vpop.f32.mrf.mxu2 }
 0x2d7   : > { %v2323_v53 = vadd.f32 %v2322_v30, %v2292_v57  ;;  %v2069_v59 = vadd.f32 %v2068_v32, %v1955_v5 }
 0x2d9   : > { %v2182_v51 = vadd.f32 %v2181_v34, %v2069_v59 }
 0x2da   : > { %v2184_v60 = vpop.f32.mrf.mxu0 }
 0x2db   : > { %v2223_v17 = vadd.f32 %v2182_v51, %v1697_v19  ;;  %v1702_v15 = vpop.f32.mrf.mxu1 }
 0x2dc   : > { %v1703_v12 = vadd.f32 %v1702_v15, %v3841_v24 }
 0x2dd   : > { %v2254_v18 = vadd.f32 %v2253_v11, %v2223_v17  ;;  %v2293_v55 = vmul.f32 %v2223_v17, %v2223_v17  ;;  %2363 = vst [vmem:[%s3858_s28 + $0xd8] sm:$0xff] %v2223_v17  ;;  %v2071_v8 = vpop.f32.mrf.mxu3 }
 0x2de   : > { %v1958_v33 = vpop.f32.mrf.mxu2 }
 0x2df   : > { %v2324_v10 = vadd.f32 %v2323_v53, %v2293_v55  ;;  %v2072_v49 = vadd.f32 %v2071_v8, %v1958_v33 }
 0x2e1   : > { %v2185_v1 = vadd.f32 %v2184_v60, %v2072_v49 }
 0x2e2   : > { %v2187_v46 = vpop.f32.mrf.mxu0 }
 0x2e3   : > { %v2224_v2 = vadd.f32 %v2185_v1, %v1700_v42  ;;  %v1705_v22 = vpop.f32.mrf.mxu1 }
 0x2e4   : > { %v1706_v21 = vadd.f32 %v1705_v22, %v4002_v58 }
 0x2e5   : > { %v2255_v29 = vadd.f32 %v2254_v18, %v2224_v2  ;;  %v2294_v4 = vmul.f32 %v2224_v2, %v2224_v2  ;;  %2364 = vst [vmem:[%s3858_s28 + $0xe0] sm:$0xff] %v2224_v2  ;;  %v2074_v54 = vpop.f32.mrf.mxu3 }
 0x2e6   : > { %v1961_v41 = vpop.f32.mrf.mxu2 }
 0x2e7   : > { %v2325_v28 = vadd.f32 %v2324_v10, %v2294_v4  ;;  %v2075_v3 = vadd.f32 %v2074_v54, %v1961_v41 }
 0x2e9   : > { %v2188_v52 = vadd.f32 %v2187_v46, %v2075_v3 }
 0x2ea   : > { %v2190_v7 = vpop.f32.mrf.mxu0 }
 0x2eb   : > { %v2225_v0 = vadd.f32 %v2188_v52, %v1703_v12  ;;  %v1708_v45 = vpop.f32.mrf.mxu1 }
 0x2ec   : > { %v1709_v37 = vadd.f32 %v1708_v45, %v4003_v26 }
 0x2ed   : > { %v2256_v35 = vadd.f32 %v2255_v29, %v2225_v0  ;;  %v2295_v40 = vmul.f32 %v2225_v0, %v2225_v0  ;;  %2365 = vst [vmem:[%s3858_s28 + $0xe8] sm:$0xff] %v2225_v0  ;;  %v2077_v9 = vpop.f32.mrf.mxu3 }
 0x2ee   : > { %v1964_v61 = vpop.f32.mrf.mxu2 }
 0x2ef   : > { %v2326_v16 = vadd.f32 %v2325_v28, %v2295_v40  ;;  %v2078_v25 = vadd.f32 %v2077_v9, %v1964_v61 }
 0x2f1   : > { %v2191_v44 = vadd.f32 %v2190_v7, %v2078_v25 }
 0x2f2   : > { %v2193_v36 = vpop.f32.mrf.mxu0 }
 0x2f3   : > { %v2226_v43 = vadd.f32 %v2191_v44, %v1706_v21 }
 0x2f5   : > { %v2257_v24 = vadd.f32 %v2256_v35, %v2226_v43  ;;  %v2296_v48 = vmul.f32 %v2226_v43, %v2226_v43  ;;  %2366 = vst [vmem:[%s3858_s28 + $0xf0] sm:$0xff] %v2226_v43  ;;  %v2080_v27 = vpop.f32.mrf.mxu3 }
 0x2f6   : > { %v1967_v47 = vpop.f32.mrf.mxu2 }
 0x2f7   : > { %v2327_v50 = vadd.f32 %v2326_v16, %v2296_v48  ;;  %v2081_v14 = vadd.f32 %v2080_v27, %v1967_v47 }
 0x2f9   : > { %v2194_v6 = vadd.f32 %v2193_v36, %v2081_v14 }
 0x2fb   : > { %v2227_v23 = vadd.f32 %v2194_v6, %v1709_v37 }
 0x2fd   : > { %v2258_v38 = vadd.f32 %v2257_v24, %v2227_v23  ;;  %v2297_v39 = vmul.f32 %v2227_v23, %v2227_v23  ;;  %2367 = vst [vmem:[%s3858_s28 + $0xf8] sm:$0xff] %v2227_v23 }
 0x2ff   : > { %v2259_v56 = vrot.slane %v2258_v38, 4  ;;  %v2328_v30 = vadd.f32 %v2327_v50, %v2297_v39 }
 0x301   : > { %v2260_v63 = vadd.f32 %v2259_v56, %v2258_v38  ;;  %v2329_v62 = vrot.slane %v2328_v30, 4 }
 0x303   : > { %v2261_v13 = vrot.slane %v2260_v63, 2  ;;  %v2330_v34 = vadd.f32 %v2329_v62, %v2328_v30 }
 0x305   : > { %v2262_v20 = vadd.f32 %v2261_v13, %v2260_v63  ;;  %v2331_v5 = vrot.slane %v2330_v34, 2 }
 0x307   : > { %v2263_v11 = vrot.slane %v2262_v20, 1  ;;  %v2332_v57 = vadd.f32 %v2331_v5, %v2330_v34 }
 0x309   : > { %v2264_v32 = vadd.f32 %v2263_v11, %v2262_v20  ;;  %v2333_v53 = vrot.slane %v2332_v57, 1 }
 0x30b   : > { %2265 = vst [vmem:[%s268_s29] sm:$0x1] %v2264_v32  ;;  %v2334_v59 = vadd.f32 %v2333_v53, %v2332_v57 }
 0x30d   : > { %2335 = vst [vmem:[%s271_s9] sm:$0x1] %v2334_v59 }
 0x30e PF: > { %s17_s21 = sadd.s32 1, %s2655_s21  }
 0x30f   : > { %p14_p5 = scmp.ge.s32.totalorder %s17_s21, 4  }
 0x311   :  { %16 = sbr.rel (!%p14_p5) target bundleno = 1 (0x1), region = 95 }

</bundles_post_ra>
